<compile_context>
chip_gen: v7x
topology: tpu7x:2x2x1
jax: 0.10.0
libtpu: 0.0.40
codegen_flags: <defaults>
</compile_context>

<pallas_src>
import jax
import jax.numpy as jnp
from jax import lax
from jax.experimental import pallas as pl
from jax.experimental.pallas import tpu as pltpu


def _round_up(x, m):
    return (x + m - 1) // m * m


# ----------------------------------------------------------------------------
# Pallas kernels
# ----------------------------------------------------------------------------
def _conv_relu_pool_kernel(p_ref, w_ref, b_ref, o_ref):
    """Fused conv (im2col matmul) + 2x2 max-pool + bias + ReLU for one M-tile.

    p_ref: (4, TM, K) bf16 — im2col patches, one slab per 2x2 pool position.
    w_ref: (K, C)     bf16 — reshaped conv weight (rows ordered (kh, kw, ci)).
    b_ref: (1, C)     f32  — bias.
    o_ref: (TM, C)    bf16 — pooled, biased, ReLU'd output rows.
    """
    P, TM, K = p_ref.shape
    # Merge leading dims (TM is a multiple of 8 -> layout no-op) so the RHS is
    # pushed to the MXU once for all four pool positions.
    p = p_ref[...].reshape(P * TM, K)
    y = jnp.dot(p, w_ref[...], preferred_element_type=jnp.float32)   # (4*TM, C)
    y = jnp.max(y.reshape(P, TM, -1), axis=0)                         # pool max
    # Bias + ReLU hoisted after the max (bias is branch-invariant, ReLU monotone).
    o_ref[...] = jnp.maximum(y + b_ref[...], 0.0).astype(o_ref.dtype)


def _head_kernel(x_ref, w1_ref, b1_ref, w2_ref, b2_ref, o_ref):
    """fc1 -> ReLU -> (dropout = identity) -> fc2 -> log_softmax for one batch tile."""
    h = jnp.dot(x_ref[...], w1_ref[...], preferred_element_type=jnp.float32)
    h = jnp.maximum(h + b1_ref[...], 0.0)
    # TODO(synk): nn.Dropout(0.2) is treated as identity (eval-mode semantics);
    # training-mode stochastic masking is not replicated here.
    logits = jnp.dot(h.astype(w2_ref.dtype), w2_ref[...],
                     preferred_element_type=jnp.float32) + b2_ref[...]
    m = jnp.max(logits, axis=-1, keepdims=True)
    s = logits - m
    lse = jnp.log(jnp.sum(jnp.exp(s), axis=-1, keepdims=True))
    o_ref[...] = s - lse


# ----------------------------------------------------------------------------
# Wrappers (pallas_call plumbing)
# ----------------------------------------------------------------------------
def conv_relu_pool(patches, w, b, *, tm=1024):
    """patches: (4, M, K) bf16; w: (K, C) bf16; b: (1, C) f32 -> (M, C) bf16."""
    P, M, K = patches.shape
    C = w.shape[1]
    TM = min(tm, _round_up(M, 8))
    Mp = _round_up(M, TM)
    if Mp != M:
        patches = jnp.pad(patches, ((0, 0), (0, Mp - M), (0, 0)))

    out = pl.pallas_call(
        _conv_relu_pool_kernel,
        out_shape=jax.ShapeDtypeStruct((Mp, C), jnp.bfloat16),
        grid=(Mp // TM,),
        in_specs=[
            pl.BlockSpec((P, TM, K), lambda i: (0, i, 0)),   # row tiles, pipelined
            pl.BlockSpec((K, C), lambda i: (0, 0)),          # weights resident
            pl.BlockSpec((1, C), lambda i: (0, 0)),          # bias resident
        ],
        out_specs=pl.BlockSpec((TM, C), lambda i: (i, 0)),
        compiler_params=pltpu.CompilerParams(
            dimension_semantics=("parallel",)),              # megacore on v7x
    )(patches, w, b)
    return out[:M]


def fc_head(x, w1, b1, w2, b2, *, tn=256):
    """x: (N, D) bf16; w1: (D, H) bf16; w2: (H, O) bf16; biases f32 -> (N, O) f32."""
    N, D = x.shape
    H = w1.shape[1]
    O = w2.shape[1]
    TN = min(tn, _round_up(N, 8))
    Np = _round_up(N, TN)
    if Np != N:
        x = jnp.pad(x, ((0, Np - N), (0, 0)))

    out = pl.pallas_call(
        _head_kernel,
        out_shape=jax.ShapeDtypeStruct((Np, O), jnp.float32),
        grid=(Np // TN,),
        in_specs=[
            pl.BlockSpec((TN, D), lambda i: (i, 0)),         # batch tiles
            pl.BlockSpec((D, H), lambda i: (0, 0)),          # fc1 weight resident
            pl.BlockSpec((1, H), lambda i: (0, 0)),
            pl.BlockSpec((H, O), lambda i: (0, 0)),          # fc2 weight resident
            pl.BlockSpec((1, O), lambda i: (0, 0)),
        ],
        out_specs=pl.BlockSpec((TN, O), lambda i: (i, 0)),
        compiler_params=pltpu.CompilerParams(
            dimension_semantics=("parallel",)),
    )(x, w1, b1, w2, b2)
    return out[:N]


# ----------------------------------------------------------------------------
# Plain-JAX glue: NHWC im2col, one slab per 2x2 pool position, built directly
# from strided slices of the activation (no full conv-resolution intermediate).
# ----------------------------------------------------------------------------
def im2col_pool_patches_nhwc(x, ksize=3, pool=2):
    """x: (N, H, W, C) -> ((4, N*Hp*Wp, ksize*ksize*C), (Hp, Wp)).

    K is ordered (kh, kw, ci) to match conv weights flattened as (KH, KW, I, O).
    The four slabs are the 2x2 pool positions (non-overlapping, stride 2).
    """
    N, H, W, C = x.shape
    Hc, Wc = H - ksize + 1, W - ksize + 1      # VALID conv output
    Hp, Wp = Hc // pool, Wc // pool            # floor-pooled output
    K = ksize * ksize * C
    pos = []
    for dh in range(pool):
        for dw in range(pool):
            cols = [
                x[:, dh + kh:dh + kh + pool * Hp:pool,
                     dw + kw:dw + kw + pool * Wp:pool, :]
                for kh in range(ksize) for kw in range(ksize)
            ]
            pos.append(jnp.concatenate(cols, axis=-1).reshape(N * Hp * Wp, K))
    return jnp.stack(pos, axis=0), (Hp, Wp)


# ----------------------------------------------------------------------------
# Full network forward (matches the PyTorch Net.forward semantics, eval mode)
# ----------------------------------------------------------------------------
def net_forward(x, params):
    c1w, c1b, c2w, c2b, f1w, f1b, f2w, f2b = params
    N = x.shape[0]

    # NCHW -> NHWC once; cast to bf16 so the im2col patches are materialized
    # (and DMA'd) at half the width.
    x = jnp.transpose(x, (0, 2, 3, 1)).astype(jnp.bfloat16)

    # conv1 (1->64, 3x3, VALID) + ReLU + maxpool(2,2):  28 -> 26 -> 13
    p1, (h1, w1_) = im2col_pool_patches_nhwc(x)
    w1m = jnp.transpose(c1w, (2, 3, 1, 0)).reshape(1 * 3 * 3, 64).astype(jnp.bfloat16)
    y1 = conv_relu_pool(p1, w1m, c1b.reshape(1, 64))            # (N*13*13, 64) bf16
    y1 = y1.reshape(N, h1, w1_, 64)                             # stay NHWC

    # conv2 (64->64, 3x3, VALID) + ReLU + maxpool(2,2): 13 -> 11 -> 5
    p2, (h2, w2_) = im2col_pool_patches_nhwc(y1)
    w2m = jnp.transpose(c2w, (2, 3, 1, 0)).reshape(64 * 3 * 3, 64).astype(jnp.bfloat16)
    y2 = conv_relu_pool(p2, w2m, c2b.reshape(1, 64))            # (N*5*5, 64) bf16

    # torch.flatten(x, 1) on NCHW flattens as (c, h, w).  We keep the NHWC
    # (h, w, c) flatten and permute fc1's columns once instead (pure weight
    # plumbing, no activation transpose in HBM).
    flat = y2.reshape(N, h2 * w2_ * 64)
    f1w_hwc = f1w.reshape(128, 64, h2, w2_).transpose(0, 2, 3, 1).reshape(128, -1)

    return fc_head(
        flat,
        jnp.transpose(f1w_hwc).astype(jnp.bfloat16), f1b.reshape(1, 128),
        jnp.transpose(f2w).astype(jnp.bfloat16), f2b.reshape(1, 10),
    )


# ----------------------------------------------------------------------------
# Pure-JAX reference (bf16 rounding points matched to the kernel path so the
# comparison only sees accumulation-order noise).
# ----------------------------------------------------------------------------
def net_forward_ref(x, params):
    c1w, c1b, c2w, c2b, f1w, f1b, f2w, f2b = params
    bf = lambda a: a.astype(jnp.bfloat16).astype(jnp.float32)
    dn = ("NCHW", "OIHW", "NCHW")

    y = lax.conv_general_dilated(bf(x), bf(c1w), (1, 1), "VALID",
                                 dimension_numbers=dn)
    y = jnp.maximum(y + c1b[None, :, None, None], 0.0)
    y = lax.reduce_window(y, -jnp.inf, lax.max, (1, 1, 2, 2), (1, 1, 2, 2), "VALID")
    y = bf(y)

    y = lax.conv_general_dilated(y, bf(c2w), (1, 1), "VALID",
                                 dimension_numbers=dn)
    y = jnp.maximum(y + c2b[None, :, None, None], 0.0)
    y = lax.reduce_window(y, -jnp.inf, lax.max, (1, 1, 2, 2), (1, 1, 2, 2), "VALID")
    y = bf(y)

    flat = y.reshape(y.shape[0], -1)                            # NCHW (c,h,w) flatten
    h = jnp.maximum(flat @ bf(f1w).T + f1b, 0.0)
    logits = bf(h) @ bf(f2w).T + f2b
    return jax.nn.log_softmax(logits, axis=-1)


def init_params(key):
    ks = jax.random.split(key, 8)
    c1w = jax.random.normal(ks[0], (64, 1, 3, 3), jnp.float32) * 0.1
    c1b = jax.random.normal(ks[1], (64,), jnp.float32) * 0.05
    c2w = jax.random.normal(ks[2], (64, 64, 3, 3), jnp.float32) * 0.05
    c2b = jax.random.normal(ks[3], (64,), jnp.float32) * 0.05
    f1w = jax.random.normal(ks[4], (128, 1600), jnp.float32) * 0.02
    f1b = jax.random.normal(ks[5], (128,), jnp.float32) * 0.02
    f2w = jax.random.normal(ks[6], (10, 128), jnp.float32) * 0.05
    f2b = jax.random.normal(ks[7], (10,), jnp.float32) * 0.05
    return (c1w, c1b, c2w, c2b, f1w, f1b, f2w, f2b)


if __name__ == "__main__":
    key = jax.random.PRNGKey(0)
    k_x, k_p = jax.random.split(key)
    # MNIST-shaped input (batch=2), NCHW like the PyTorch module expects
    # (28x28 is forced by fc1's 1600 = 64*5*5 input features).
    x = jax.random.normal(k_x, (2, 1, 28, 28), jnp.float32)
    params = init_params(k_p)

    fwd = jax.jit(net_forward)
    out = jax.block_until_ready(fwd(x, params))

    assert out.shape == (2, 10), out.shape
    # log_softmax sanity: rows of exp(out) must sum to 1.
    row_sums = jnp.exp(out).sum(axis=1)
    assert bool(jnp.all(jnp.abs(row_sums - 1.0) < 1e-3)), row_sums
    # Reference check (bf16-matched): catches any layout/permutation mistakes.
    ref = jax.block_until_ready(jax.jit(net_forward_ref)(x, params))
    assert bool(jnp.all(jnp.abs(out - ref) < 3e-2)), jnp.max(jnp.abs(out - ref))
    print("KERNEL_OK")
</pallas_src>

<mosaic_0001>
module attributes {stable_mosaic.version = 11 : i64} {
  func.func @_conv_relu_pool_kernel(%arg0: i32, %arg1: memref<4x344x9xbf16, #tpu.memory_space<vmem>>, %arg2: memref<9x64xbf16, #tpu.memory_space<vmem>>, %arg3: memref<1x64xf32, #tpu.memory_space<vmem>>, %arg4: memref<344x64xbf16, #tpu.memory_space<vmem>>) attributes {dimension_semantics = [#tpu.dimension_semantics<parallel>], iteration_bounds = array<i64: 1>, scalar_prefetch = 0 : i64, scratch_operands = 0 : i64, tpu.core_type = #tpu.core_type<tc>, window_params = [{transform_indices = @transform_0, window_bounds = array<i64: 4, 344, 9>}, {pipeline_mode = #tpu.pipeline_mode<synchronous>, transform_indices = @transform_1, window_bounds = array<i64: 9, 64>}, {pipeline_mode = #tpu.pipeline_mode<synchronous>, transform_indices = @transform_2, window_bounds = array<i64: 1, 64>}, {transform_indices = @transform_3, window_bounds = array<i64: 344, 64>}]} {
    %c0 = arith.constant 0 : index
    %c0_0 = arith.constant 0 : index
    %c0_1 = arith.constant 0 : index
    %0 = vector.load %arg1[%c0, %c0_0, %c0_1] : memref<4x344x9xbf16, #tpu.memory_space<vmem>>, vector<4x344x9xbf16>
    %1 = vector.shape_cast %0 : vector<4x344x9xbf16> to vector<1376x9xbf16>
    %c0_2 = arith.constant 0 : index
    %c0_3 = arith.constant 0 : index
    %2 = vector.load %arg2[%c0_2, %c0_3] : memref<9x64xbf16, #tpu.memory_space<vmem>>, vector<9x64xbf16>
    %cst = arith.constant dense<0.000000e+00> : vector<1376x64xf32>
    %3 = tpu.matmul %1, %2, %cst {dimension_numbers = #tpu.dot_dimension_numbers<[1], [0], [0], [1], [0, 0, 1, 1], [], []>} : vector<1376x9xbf16>, vector<9x64xbf16>, vector<1376x64xf32> -> vector<1376x64xf32>
    %4 = vector.shape_cast %3 : vector<1376x64xf32> to vector<4x344x64xf32>
    %cst_4 = arith.constant dense<0xFF800000> : vector<344x64xf32>
    %5 = vector.multi_reduction <maximumf>, %4, %cst_4 [0] : vector<4x344x64xf32> to vector<344x64xf32>
    %c0_5 = arith.constant 0 : index
    %c0_6 = arith.constant 0 : index
    %6 = vector.load %arg3[%c0_5, %c0_6] : memref<1x64xf32, #tpu.memory_space<vmem>>, vector<1x64xf32>
    %7 = vector.broadcast %6 : vector<1x64xf32> to vector<344x64xf32>
    %8 = arith.addf %5, %7 : vector<344x64xf32>
    %cst_7 = arith.constant 0.000000e+00 : f32
    %9 = vector.broadcast %cst_7 : f32 to vector<344x64xf32>
    %10 = arith.maximumf %8, %9 : vector<344x64xf32>
    %11 = arith.truncf %10 : vector<344x64xf32> to vector<344x64xbf16>
    %c0_8 = arith.constant 0 : index
    %c0_9 = arith.constant 0 : index
    %12 = vector.load %arg4[%c0_8, %c0_9] : memref<344x64xbf16, #tpu.memory_space<vmem>>, vector<344x64xbf16>
    tpu.vector_store %arg4[%c0_8, %c0_9], %11 {strides = array<i32>} : memref<344x64xbf16, #tpu.memory_space<vmem>>, vector<344x64xbf16>,
    return
  }
  func.func @transform_0(%arg0: i32) -> (i32, i32, i32) {
    %c0_i32 = arith.constant 0 : i32
    %c0_i32_0 = arith.constant 0 : i32
    %c0_i32_1 = arith.constant 0 : i32
    return %c0_i32, %arg0, %c0_i32_0 : i32, i32, i32
  }
  func.func @transform_1(%arg0: i32) -> (i32, i32) {
    %c0_i32 = arith.constant 0 : i32
    %c0_i32_0 = arith.constant 0 : i32
    %c0_i32_1 = arith.constant 0 : i32
    return %c0_i32, %c0_i32_0 : i32, i32
  }
  func.func @transform_2(%arg0: i32) -> (i32, i32) {
    %c0_i32 = arith.constant 0 : i32
    %c0_i32_0 = arith.constant 0 : i32
    %c0_i32_1 = arith.constant 0 : i32
    return %c0_i32, %c0_i32_0 : i32, i32
  }
  func.func @transform_3(%arg0: i32) -> (i32, i32) {
    %c0_i32 = arith.constant 0 : i32
    %c0_i32_0 = arith.constant 0 : i32
    return %arg0, %c0_i32 : i32, i32
  }
}

module attributes {stable_mosaic.version = 11 : i64} {
  func.func @_conv_relu_pool_kernel(%arg0: i32, %arg1: memref<4x56x576xbf16, #tpu.memory_space<vmem>>, %arg2: memref<576x64xbf16, #tpu.memory_space<vmem>>, %arg3: memref<1x64xf32, #tpu.memory_space<vmem>>, %arg4: memref<56x64xbf16, #tpu.memory_space<vmem>>) attributes {dimension_semantics = [#tpu.dimension_semantics<parallel>], iteration_bounds = array<i64: 1>, scalar_prefetch = 0 : i64, scratch_operands = 0 : i64, tpu.core_type = #tpu.core_type<tc>, window_params = [{transform_indices = @transform_0, window_bounds = array<i64: 4, 56, 576>}, {pipeline_mode = #tpu.pipeline_mode<synchronous>, transform_indices = @transform_1, window_bounds = array<i64: 576, 64>}, {pipeline_mode = #tpu.pipeline_mode<synchronous>, transform_indices = @transform_2, window_bounds = array<i64: 1, 64>}, {transform_indices = @transform_3, window_bounds = array<i64: 56, 64>}]} {
    %c0 = arith.constant 0 : index
    %c0_0 = arith.constant 0 : index
    %c0_1 = arith.constant 0 : index
    %0 = vector.load %arg1[%c0, %c0_0, %c0_1] : memref<4x56x576xbf16, #tpu.memory_space<vmem>>, vector<4x56x576xbf16>
    %1 = vector.shape_cast %0 : vector<4x56x576xbf16> to vector<224x576xbf16>
    %c0_2 = arith.constant 0 : index
    %c0_3 = arith.constant 0 : index
    %2 = vector.load %arg2[%c0_2, %c0_3] : memref<576x64xbf16, #tpu.memory_space<vmem>>, vector<576x64xbf16>
    %cst = arith.constant dense<0.000000e+00> : vector<224x64xf32>
    %3 = tpu.matmul %1, %2, %cst {dimension_numbers = #tpu.dot_dimension_numbers<[1], [0], [0], [1], [0, 0, 1, 1], [], []>} : vector<224x576xbf16>, vector<576x64xbf16>, vector<224x64xf32> -> vector<224x64xf32>
    %4 = vector.shape_cast %3 : vector<224x64xf32> to vector<4x56x64xf32>
    %cst_4 = arith.constant dense<0xFF800000> : vector<56x64xf32>
    %5 = vector.multi_reduction <maximumf>, %4, %cst_4 [0] : vector<4x56x64xf32> to vector<56x64xf32>
    %c0_5 = arith.constant 0 : index
    %c0_6 = arith.constant 0 : index
    %6 = vector.load %arg3[%c0_5, %c0_6] : memref<1x64xf32, #tpu.memory_space<vmem>>, vector<1x64xf32>
    %7 = vector.broadcast %6 : vector<1x64xf32> to vector<56x64xf32>
    %8 = arith.addf %5, %7 : vector<56x64xf32>
    %cst_7 = arith.constant 0.000000e+00 : f32
    %9 = vector.broadcast %cst_7 : f32 to vector<56x64xf32>
    %10 = arith.maximumf %8, %9 : vector<56x64xf32>
    %11 = arith.truncf %10 : vector<56x64xf32> to vector<56x64xbf16>
    %c0_8 = arith.constant 0 : index
    %c0_9 = arith.constant 0 : index
    %12 = vector.load %arg4[%c0_8, %c0_9] : memref<56x64xbf16, #tpu.memory_space<vmem>>, vector<56x64xbf16>
    tpu.vector_store %arg4[%c0_8, %c0_9], %11 {strides = array<i32>} : memref<56x64xbf16, #tpu.memory_space<vmem>>, vector<56x64xbf16>,
    return
  }
  func.func @transform_0(%arg0: i32) -> (i32, i32, i32) {
    %c0_i32 = arith.constant 0 : i32
    %c0_i32_0 = arith.constant 0 : i32
    %c0_i32_1 = arith.constant 0 : i32
    return %c0_i32, %arg0, %c0_i32_0 : i32, i32, i32
  }
  func.func @transform_1(%arg0: i32) -> (i32, i32) {
    %c0_i32 = arith.constant 0 : i32
    %c0_i32_0 = arith.constant 0 : i32
    %c0_i32_1 = arith.constant 0 : i32
    return %c0_i32, %c0_i32_0 : i32, i32
  }
  func.func @transform_2(%arg0: i32) -> (i32, i32) {
    %c0_i32 = arith.constant 0 : i32
    %c0_i32_0 = arith.constant 0 : i32
    %c0_i32_1 = arith.constant 0 : i32
    return %c0_i32, %c0_i32_0 : i32, i32
  }
  func.func @transform_3(%arg0: i32) -> (i32, i32) {
    %c0_i32 = arith.constant 0 : i32
    %c0_i32_0 = arith.constant 0 : i32
    return %arg0, %c0_i32 : i32, i32
  }
}

module attributes {stable_mosaic.version = 11 : i64} {
  func.func @_head_kernel(%arg0: i32, %arg1: memref<8x1600xbf16, #tpu.memory_space<vmem>>, %arg2: memref<1600x128xbf16, #tpu.memory_space<vmem>>, %arg3: memref<1x128xf32, #tpu.memory_space<vmem>>, %arg4: memref<128x10xbf16, #tpu.memory_space<vmem>>, %arg5: memref<1x10xf32, #tpu.memory_space<vmem>>, %arg6: memref<8x10xf32, #tpu.memory_space<vmem>>) attributes {dimension_semantics = [#tpu.dimension_semantics<parallel>], iteration_bounds = array<i64: 1>, scalar_prefetch = 0 : i64, scratch_operands = 0 : i64, tpu.core_type = #tpu.core_type<tc>, window_params = [{transform_indices = @transform_0, window_bounds = array<i64: 8, 1600>}, {pipeline_mode = #tpu.pipeline_mode<synchronous>, transform_indices = @transform_1, window_bounds = array<i64: 1600, 128>}, {pipeline_mode = #tpu.pipeline_mode<synchronous>, transform_indices = @transform_2, window_bounds = array<i64: 1, 128>}, {pipeline_mode = #tpu.pipeline_mode<synchronous>, transform_indices = @transform_3, window_bounds = array<i64: 128, 10>}, {pipeline_mode = #tpu.pipeline_mode<synchronous>, transform_indices = @transform_4, window_bounds = array<i64: 1, 10>}, {transform_indices = @transform_5, window_bounds = array<i64: 8, 10>}]} {
    %c0 = arith.constant 0 : index
    %c0_0 = arith.constant 0 : index
    %0 = vector.load %arg1[%c0, %c0_0] : memref<8x1600xbf16, #tpu.memory_space<vmem>>, vector<8x1600xbf16>
    %c0_1 = arith.constant 0 : index
    %c0_2 = arith.constant 0 : index
    %1 = vector.load %arg2[%c0_1, %c0_2] : memref<1600x128xbf16, #tpu.memory_space<vmem>>, vector<1600x128xbf16>
    %cst = arith.constant dense<0.000000e+00> : vector<8x128xf32>
    %2 = tpu.matmul %0, %1, %cst {dimension_numbers = #tpu.dot_dimension_numbers<[1], [0], [0], [1], [0, 0, 1, 1], [], []>} : vector<8x1600xbf16>, vector<1600x128xbf16>, vector<8x128xf32> -> vector<8x128xf32>
    %c0_3 = arith.constant 0 : index
    %c0_4 = arith.constant 0 : index
    %3 = vector.load %arg3[%c0_3, %c0_4] : memref<1x128xf32, #tpu.memory_space<vmem>>, vector<1x128xf32>
    %4 = vector.broadcast %3 : vector<1x128xf32> to vector<8x128xf32>
    %5 = arith.addf %2, %4 : vector<8x128xf32>
    %cst_5 = arith.constant 0.000000e+00 : f32
    %6 = vector.broadcast %cst_5 : f32 to vector<8x128xf32>
    %7 = arith.maximumf %5, %6 : vector<8x128xf32>
    %8 = arith.truncf %7 : vector<8x128xf32> to vector<8x128xbf16>
    %c0_6 = arith.constant 0 : index
    %c0_7 = arith.constant 0 : index
    %9 = vector.load %arg4[%c0_6, %c0_7] : memref<128x10xbf16, #tpu.memory_space<vmem>>, vector<128x10xbf16>
    %cst_8 = arith.constant dense<0.000000e+00> : vector<8x10xf32>
    %10 = tpu.matmul %8, %9, %cst_8 {dimension_numbers = #tpu.dot_dimension_numbers<[1], [0], [0], [1], [0, 0, 1, 1], [], []>} : vector<8x128xbf16>, vector<128x10xbf16>, vector<8x10xf32> -> vector<8x10xf32>
    %c0_9 = arith.constant 0 : index
    %c0_10 = arith.constant 0 : index
    %11 = vector.load %arg5[%c0_9, %c0_10] : memref<1x10xf32, #tpu.memory_space<vmem>>, vector<1x10xf32>
    %12 = vector.broadcast %11 : vector<1x10xf32> to vector<8x10xf32>
    %13 = arith.addf %10, %12 : vector<8x10xf32>
    %cst_11 = arith.constant dense<0xFF800000> : vector<8xf32>
    %14 = vector.multi_reduction <maximumf>, %13, %cst_11 [1] : vector<8x10xf32> to vector<8xf32>
    %15 = vector.shape_cast %14 : vector<8xf32> to vector<8x1xf32>
    %16 = vector.broadcast %15 : vector<8x1xf32> to vector<8x10xf32>
    %17 = arith.subf %13, %16 : vector<8x10xf32>
    %18 = math.exp %17 : vector<8x10xf32>
    %cst_12 = arith.constant dense<0.000000e+00> : vector<8xf32>
    %19 = vector.multi_reduction <add>, %18, %cst_12 [1] : vector<8x10xf32> to vector<8xf32>
    %20 = vector.shape_cast %19 : vector<8xf32> to vector<8x1xf32>
    %21 = math.log %20 : vector<8x1xf32>
    %22 = vector.broadcast %21 : vector<8x1xf32> to vector<8x10xf32>
    %23 = arith.subf %17, %22 : vector<8x10xf32>
    %c0_13 = arith.constant 0 : index
    %c0_14 = arith.constant 0 : index
    %24 = vector.load %arg6[%c0_13, %c0_14] : memref<8x10xf32, #tpu.memory_space<vmem>>, vector<8x10xf32>
    tpu.vector_store %arg6[%c0_13, %c0_14], %23 {strides = array<i32>} : memref<8x10xf32, #tpu.memory_space<vmem>>, vector<8x10xf32>,
    return
  }
  func.func @transform_0(%arg0: i32) -> (i32, i32) {
    %c0_i32 = arith.constant 0 : i32
    %c0_i32_0 = arith.constant 0 : i32
    return %arg0, %c0_i32 : i32, i32
  }
  func.func @transform_1(%arg0: i32) -> (i32, i32) {
    %c0_i32 = arith.constant 0 : i32
    %c0_i32_0 = arith.constant 0 : i32
    %c0_i32_1 = arith.constant 0 : i32
    return %c0_i32, %c0_i32_0 : i32, i32
  }
  func.func @transform_2(%arg0: i32) -> (i32, i32) {
    %c0_i32 = arith.constant 0 : i32
    %c0_i32_0 = arith.constant 0 : i32
    %c0_i32_1 = arith.constant 0 : i32
    return %c0_i32, %c0_i32_0 : i32, i32
  }
  func.func @transform_3(%arg0: i32) -> (i32, i32) {
    %c0_i32 = arith.constant 0 : i32
    %c0_i32_0 = arith.constant 0 : i32
    %c0_i32_1 = arith.constant 0 : i32
    return %c0_i32, %c0_i32_0 : i32, i32
  }
  func.func @transform_4(%arg0: i32) -> (i32, i32) {
    %c0_i32 = arith.constant 0 : i32
    %c0_i32_0 = arith.constant 0 : i32
    %c0_i32_1 = arith.constant 0 : i32
    return %c0_i32, %c0_i32_0 : i32, i32
  }
  func.func @transform_5(%arg0: i32) -> (i32, i32) {
    %c0_i32 = arith.constant 0 : i32
    %c0_i32_0 = arith.constant 0 : i32
    return %arg0, %c0_i32 : i32, i32
  }
}

</mosaic_0001>

<bundles_post_ra>
// kernel: net_forward.3
= control target key start
LH: loop header
LB: loop body
LE: loop exit
PB: predicated region body
PF: predicated region fallthrough
CT: control target
= control target key end

     0   :  { %vm883_vm0 = vcmask 1043456   ;;  %vm884_vm1 = vcmask 1044480   ;;  %vm624_vm2 = vcmask 72704   ;;  %v2838_v1 = vmov 65535   ;;  %s4156_s1 = inlined_call_operand.vmem [shape: bf16[9,64], index: 1, kind: input, shape index: {}]   ;;  %s4157_s0 = inlined_call_operand.vmem [shape: bf16[4,344,9], index: 0, kind: input, shape index: {}]   ;;  %s4158_s2 = inlined_call_operand.vmem [shape: f32[1,64], index: 2, kind: input, shape index: {}]   ;;  %s4159_s3 = inlined_call_operand.vmem [shape: bf16[344,64], index: 3, kind: output, shape index: {}]  }
   0x1   :  { %v2751_v0 = vld [vmem:[%s4156_s1] sm:$0x1f]   ;;  %v885_v2 = vsel %vm883_vm0, 4294967295, %v2838_v1  ;;  %v2753_v7 = vld [vmem:[%s4157_s0 + $0x8] sm:$0xff]   ;;  %v2756_v9 = vld [vmem:[%s4157_s0 + $0x10] sm:$0xff]   ;;  %vm1611_vm3 = vcmask 523264  }
   0x2   :  { %v2752_v3 = vld [vmem:[%s4157_s0] sm:$0xff]   ;;  %v886_v4 = vsel %vm884_vm1, %v885_v2, 0  ;;  %v2755_v8 = vld [vmem:[%s4157_s0 + $0x168] sm:$0xff]   ;;  %v2758_v10 = vld [vmem:[%s4157_s0 + $0x170] sm:$0xff]   ;;  %vm2179_vm4 = vcmask 519168  }
   0x3   :  { %v888_v5 = vand.u32 %v2751_v0, %v886_v4  ;;  %2576 = vmatprep.mubr.msk.bf16.mxu0 %vm624_vm2, %v2752_v3  ;;  %v2754_v6 = vld [vmem:[%s4157_s0 + $0x160] sm:$0xff]   ;;  %v2757_v11 = vld [vmem:[%s4157_s0 + $0x18] sm:$0xff]   ;;  %v2761_v15 = vld [vmem:[%s4157_s0 + $0x28] sm:$0xff]  }
   0x4   :  { %2664 = vmatprep.mubr.msk.bf16.mxu1 %vm624_vm2, %v2754_v6  ;;  %v2759_v12 = vld [vmem:[%s4157_s0 + $0x178] sm:$0xff]   ;;  %v2760_v13 = vld [vmem:[%s4157_s0 + $0x20] sm:$0xff]   ;;  %v2763_v16 = vld [vmem:[%s4157_s0 + $0x188] sm:$0xff]  }
   0x5   :  { %2574 = vmatprep.subr.bf16.mxu0 %v888_v5  ;;  %2748 = vmatprep.subr.bf16.mxu1 %v888_v5  ;;  %v2762_v14 = vld [vmem:[%s4157_s0 + $0x180] sm:$0xff]   ;;  %v2764_v17 = vld [vmem:[%s4157_s0 + $0x30] sm:$0xff]   ;;  %v2765_v19 = vld [vmem:[%s4157_s0 + $0x38] sm:$0xff]  }
   0x6   :  { %2575 = vmatpush3.bf16.msra.mxu0 %v888_v5  ;;  %2749 = vmatpush3.bf16.msra.mxu1 %v888_v5  ;;  %v2766_v18 = vld [vmem:[%s4157_s0 + $0x190] sm:$0xff]   ;;  %v2767_v20 = vld [vmem:[%s4157_s0 + $0x198] sm:$0xff]   ;;  %v2768_v21 = vld [vmem:[%s4157_s0 + $0x40] sm:$0xff]  }
   0x7   :  { %v2770_v22 = vld [vmem:[%s4157_s0 + $0x1a0] sm:$0xff]   ;;  %v2769_v23 = vld [vmem:[%s4157_s0 + $0x48] sm:$0xff]   ;;  %v2772_v25 = vld [vmem:[%s4157_s0 + $0x50] sm:$0xff]  }
   0x8   :  { %v2771_v24 = vld [vmem:[%s4157_s0 + $0x1a8] sm:$0xff]   ;;  %v2774_v26 = vld [vmem:[%s4157_s0 + $0x1b0] sm:$0xff]   ;;  %v2773_v27 = vld [vmem:[%s4157_s0 + $0x58] sm:$0xff]  }
   0x9   :  { %2577 = vmatmul.mubr.msk.bf16.vlgmr.msra.gmra.mrb[0].mxu0 %vm624_vm2, %v2753_v7  ;;  %2665 = vmatmul.mubr.msk.bf16.vlgmr.msra.gmra.mrb[0].mxu1 %vm624_vm2, %v2755_v8  ;;  %v2775_v28 = vld [vmem:[%s4157_s0 + $0x1b8] sm:$0xff]   ;;  %v2776_v29 = vld [vmem:[%s4157_s0 + $0x60] sm:$0xff]   ;;  %v2777_v31 = vld [vmem:[%s4157_s0 + $0x68] sm:$0xff]  }
   0xa   :  { %2580 = vmatprep.mubr.msk.bf16.mxu0 %vm624_vm2, %v2756_v9  ;;  %2668 = vmatprep.mubr.msk.bf16.mxu1 %vm624_vm2, %v2758_v10  ;;  %v2778_v30 = vld [vmem:[%s4157_s0 + $0x1c0] sm:$0xff]   ;;  %v2779_v32 = vld [vmem:[%s4157_s0 + $0x1c8] sm:$0xff]   ;;  %v2780_v33 = vld [vmem:[%s4157_s0 + $0x70] sm:$0xff]  }
   0xb   :  { %v2782_v34 = vld [vmem:[%s4157_s0 + $0x1d0] sm:$0xff]   ;;  %v2781_v35 = vld [vmem:[%s4157_s0 + $0x78] sm:$0xff]   ;;  %v2784_v37 = vld [vmem:[%s4157_s0 + $0x80] sm:$0xff]  }
   0xc   :  { %v2783_v36 = vld [vmem:[%s4157_s0 + $0x1d8] sm:$0xff]   ;;  %v2786_v38 = vld [vmem:[%s4157_s0 + $0x1e0] sm:$0xff]   ;;  %v2785_v39 = vld [vmem:[%s4157_s0 + $0x88] sm:$0xff]  }
   0xd   :  { %v2787_v40 = vld [vmem:[%s4157_s0 + $0x1e8] sm:$0xff]   ;;  %v2788_v41 = vld [vmem:[%s4157_s0 + $0x90] sm:$0xff]   ;;  %v2789_v43 = vld [vmem:[%s4157_s0 + $0x98] sm:$0xff]  }
   0xe   :  { %v2790_v42 = vld [vmem:[%s4157_s0 + $0x1f0] sm:$0xff]   ;;  %v2791_v44 = vld [vmem:[%s4157_s0 + $0x1f8] sm:$0xff]   ;;  %v2792_v45 = vld [vmem:[%s4157_s0 + $0xa0] sm:$0xff]  }
   0xf   :  { %v2794_v46 = vld [vmem:[%s4157_s0 + $0x200] sm:$0xff]   ;;  %v2793_v47 = vld [vmem:[%s4157_s0 + $0xa8] sm:$0xff]   ;;  %v2796_v49 = vld [vmem:[%s4157_s0 + $0xb0] sm:$0xff]  }
  0x10   :  { %v2795_v48 = vld [vmem:[%s4157_s0 + $0x208] sm:$0xff]   ;;  %v2798_v50 = vld [vmem:[%s4157_s0 + $0x210] sm:$0xff]   ;;  %v2797_v51 = vld [vmem:[%s4157_s0 + $0xb8] sm:$0xff]  }
  0x11   :  { %2581 = vmatmul.mubr.msk.bf16.gmra.mrb[4].mxu0 %vm624_vm2, %v2757_v11  ;;  %2669 = vmatmul.mubr.msk.bf16.gmra.mrb[4].mxu1 %vm624_vm2, %v2759_v12  ;;  %v2799_v52 = vld [vmem:[%s4157_s0 + $0x218] sm:$0xff]   ;;  %v2800_v53 = vld [vmem:[%s4157_s0 + $0xc0] sm:$0xff]   ;;  %v2801_v55 = vld [vmem:[%s4157_s0 + $0xc8] sm:$0xff]  }
  0x12   :  { %2584 = vmatprep.mubr.msk.bf16.mxu0 %vm624_vm2, %v2760_v13  ;;  %2672 = vmatprep.mubr.msk.bf16.mxu1 %vm624_vm2, %v2762_v14  ;;  %v2802_v54 = vld [vmem:[%s4157_s0 + $0x220] sm:$0xff]   ;;  %v2803_v56 = vld [vmem:[%s4157_s0 + $0x228] sm:$0xff]   ;;  %v2804_v57 = vld [vmem:[%s4157_s0 + $0xd0] sm:$0xff]  }
  0x13   :  { %v2806_v58 = vld [vmem:[%s4157_s0 + $0x230] sm:$0xff]   ;;  %v2805_v59 = vld [vmem:[%s4157_s0 + $0xd8] sm:$0xff]   ;;  %v2808_v61 = vld [vmem:[%s4157_s0 + $0xe0] sm:$0xff]  }
  0x14   :  { %v2807_v60 = vld [vmem:[%s4157_s0 + $0x238] sm:$0xff]   ;;  %v2810_v62 = vld [vmem:[%s4157_s0 + $0x240] sm:$0xff]   ;;  %v2809_v63 = vld [vmem:[%s4157_s0 + $0xe8] sm:$0xff]  }
  0x15   :  { %v2811_v0 = vld [vmem:[%s4157_s0 + $0x248] sm:$0xff]   ;;  %v2812_v1 = vld [vmem:[%s4157_s0 + $0xf0] sm:$0xff]   ;;  %v2813_v3 = vld [vmem:[%s4157_s0 + $0xf8] sm:$0xff]  }
  0x16   :  { %v2814_v2 = vld [vmem:[%s4157_s0 + $0x250] sm:$0xff]   ;;  %v2815_v4 = vld [vmem:[%s4157_s0 + $0x258] sm:$0xff]   ;;  %v2816_v5 = vld [vmem:[%s4157_s0 + $0x100] sm:$0xff]  }
  0x17   :  { %v2818_v6 = vld [vmem:[%s4157_s0 + $0x260] sm:$0xff]   ;;  %v2817_v7 = vld [vmem:[%s4157_s0 + $0x108] sm:$0xff]   ;;  %v2820_v9 = vld [vmem:[%s4157_s0 + $0x110] sm:$0xff]  }
  0x18   :  { %v2819_v8 = vld [vmem:[%s4157_s0 + $0x268] sm:$0xff]   ;;  %v2822_v10 = vld [vmem:[%s4157_s0 + $0x270] sm:$0xff]   ;;  %v2821_v11 = vld [vmem:[%s4157_s0 + $0x118] sm:$0xff]  }
  0x19   :  { %2585 = vmatmul.mubr.msk.bf16.gmra.mrb[8].mxu0 %vm624_vm2, %v2761_v15  ;;  %2673 = vmatmul.mubr.msk.bf16.gmra.mrb[8].mxu1 %vm624_vm2, %v2763_v16  ;;  %v2823_v12 = vld [vmem:[%s4157_s0 + $0x278] sm:$0xff]   ;;  %v2824_v13 = vld [vmem:[%s4157_s0 + $0x120] sm:$0xff]   ;;  %v2825_v15 = vld [vmem:[%s4157_s0 + $0x128] sm:$0xff]  }
  0x1a   :  { %2588 = vmatprep.mubr.msk.bf16.mxu0 %vm624_vm2, %v2764_v17  ;;  %2676 = vmatprep.mubr.msk.bf16.mxu1 %vm624_vm2, %v2766_v18  ;;  %v2826_v14 = vld [vmem:[%s4157_s0 + $0x280] sm:$0xff]   ;;  %v2827_v16 = vld [vmem:[%s4157_s0 + $0x288] sm:$0xff]   ;;  %v2828_v17 = vld [vmem:[%s4157_s0 + $0x130] sm:$0xff]  }
  0x1b   :  { %v2830_v18 = vld [vmem:[%s4157_s0 + $0x290] sm:$0xff]  }
  0x21   :  { %2589 = vmatmul.mubr.msk.bf16.gmra.mrb[12].mxu0 %vm624_vm2, %v2765_v19  ;;  %2677 = vmatmul.mubr.msk.bf16.gmra.mrb[12].mxu1 %vm624_vm2, %v2767_v20  ;;  %v2829_v19 = vld [vmem:[%s4157_s0 + $0x138] sm:$0xff]  }
  0x22   :  { %2592 = vmatprep.mubr.msk.bf16.mxu0 %vm624_vm2, %v2768_v21  ;;  %2680 = vmatprep.mubr.msk.bf16.mxu1 %vm624_vm2, %v2770_v22  ;;  %v2831_v20 = vld [vmem:[%s4157_s0 + $0x298] sm:$0xff]   ;;  %v2832_v21 = vld [vmem:[%s4157_s0 + $0x140] sm:$0xff]  }
  0x23   :  { %v2834_v22 = vld [vmem:[%s4157_s0 + $0x2a0] sm:$0xff]  }
  0x29   :  { %2593 = vmatmul.mubr.msk.bf16.gmra.mrb[16].mxu0 %vm624_vm2, %v2769_v23  ;;  %2681 = vmatmul.mubr.msk.bf16.gmra.mrb[16].mxu1 %vm624_vm2, %v2771_v24  ;;  %v2833_v23 = vld [vmem:[%s4157_s0 + $0x148] sm:$0xff]  }
  0x2a   :  { %2596 = vmatprep.mubr.msk.bf16.mxu0 %vm624_vm2, %v2772_v25  ;;  %2684 = vmatprep.mubr.msk.bf16.mxu1 %vm624_vm2, %v2774_v26  ;;  %v2835_v24 = vld [vmem:[%s4157_s0 + $0x2a8] sm:$0xff]   ;;  %v2836_v25 = vld [vmem:[%s4157_s0 + $0x150] sm:$0xff]   ;;  %v2837_v26 = vld [vmem:[%s4157_s0 + $0x158] sm:$0xff]  }
  0x31   :  { %2597 = vmatmul.mubr.msk.bf16.gmra.mrb[20].mxu0 %vm624_vm2, %v2773_v27  ;;  %2685 = vmatmul.mubr.msk.bf16.gmra.mrb[20].mxu1 %vm624_vm2, %v2775_v28 }
  0x32   :  { %2600 = vmatprep.mubr.msk.bf16.mxu0 %vm624_vm2, %v2776_v29  ;;  %2688 = vmatprep.mubr.msk.bf16.mxu1 %vm624_vm2, %v2778_v30 }
  0x39   :  { %2601 = vmatmul.mubr.msk.bf16.gmra.mrb[24].mxu0 %vm624_vm2, %v2777_v31  ;;  %2689 = vmatmul.mubr.msk.bf16.gmra.mrb[24].mxu1 %vm624_vm2, %v2779_v32 }
  0x3a   :  { %2604 = vmatprep.mubr.msk.bf16.mxu0 %vm624_vm2, %v2780_v33  ;;  %2692 = vmatprep.mubr.msk.bf16.mxu1 %vm624_vm2, %v2782_v34 }
  0x41   :  { %2605 = vmatmul.mubr.msk.bf16.gmra.mrb[28].mxu0 %vm624_vm2, %v2781_v35  ;;  %2693 = vmatmul.mubr.msk.bf16.gmra.mrb[28].mxu1 %vm624_vm2, %v2783_v36 }
  0x42   :  { %2608 = vmatprep.mubr.msk.bf16.mxu0 %vm624_vm2, %v2784_v37  ;;  %2696 = vmatprep.mubr.msk.bf16.mxu1 %vm624_vm2, %v2786_v38 }
  0x49   :  { %2609 = vmatmul.mubr.msk.bf16.gmra.mrb[32].mxu0 %vm624_vm2, %v2785_v39  ;;  %2697 = vmatmul.mubr.msk.bf16.gmra.mrb[32].mxu1 %vm624_vm2, %v2787_v40 }
  0x4a   :  { %2612 = vmatprep.mubr.msk.bf16.mxu0 %vm624_vm2, %v2788_v41  ;;  %2700 = vmatprep.mubr.msk.bf16.mxu1 %vm624_vm2, %v2790_v42 }
  0x51   :  { %2613 = vmatmul.mubr.msk.bf16.gmra.mrb[36].mxu0 %vm624_vm2, %v2789_v43  ;;  %2701 = vmatmul.mubr.msk.bf16.gmra.mrb[36].mxu1 %vm624_vm2, %v2791_v44 }
  0x52   :  { %2616 = vmatprep.mubr.msk.bf16.mxu0 %vm624_vm2, %v2792_v45  ;;  %2704 = vmatprep.mubr.msk.bf16.mxu1 %vm624_vm2, %v2794_v46 }
  0x59   :  { %2617 = vmatmul.mubr.msk.bf16.gmra.mrb[40].mxu0 %vm624_vm2, %v2793_v47  ;;  %2705 = vmatmul.mubr.msk.bf16.gmra.mrb[40].mxu1 %vm624_vm2, %v2795_v48 }
  0x5a   :  { %2620 = vmatprep.mubr.msk.bf16.mxu0 %vm624_vm2, %v2796_v49  ;;  %2708 = vmatprep.mubr.msk.bf16.mxu1 %vm624_vm2, %v2798_v50 }
  0x61   :  { %2621 = vmatmul.mubr.msk.bf16.gmra.mrb[44].mxu0 %vm624_vm2, %v2797_v51  ;;  %2709 = vmatmul.mubr.msk.bf16.gmra.mrb[44].mxu1 %vm624_vm2, %v2799_v52 }
  0x62   :  { %2624 = vmatprep.mubr.msk.bf16.mxu0 %vm624_vm2, %v2800_v53  ;;  %2712 = vmatprep.mubr.msk.bf16.mxu1 %vm624_vm2, %v2802_v54 }
  0x69   :  { %2625 = vmatmul.mubr.msk.bf16.gmra.mrb[48].mxu0 %vm624_vm2, %v2801_v55  ;;  %2713 = vmatmul.mubr.msk.bf16.gmra.mrb[48].mxu1 %vm624_vm2, %v2803_v56 }
  0x6a   :  { %2628 = vmatprep.mubr.msk.bf16.mxu0 %vm624_vm2, %v2804_v57  ;;  %2716 = vmatprep.mubr.msk.bf16.mxu1 %vm624_vm2, %v2806_v58 }
  0x71   :  { %2629 = vmatmul.mubr.msk.bf16.gmra.mrb[52].mxu0 %vm624_vm2, %v2805_v59  ;;  %2717 = vmatmul.mubr.msk.bf16.gmra.mrb[52].mxu1 %vm624_vm2, %v2807_v60 }
  0x72   :  { %2632 = vmatprep.mubr.msk.bf16.mxu0 %vm624_vm2, %v2808_v61  ;;  %2720 = vmatprep.mubr.msk.bf16.mxu1 %vm624_vm2, %v2810_v62 }
  0x79   :  { %2633 = vmatmul.mubr.msk.bf16.gmra.mrb[56].mxu0 %vm624_vm2, %v2809_v63  ;;  %2721 = vmatmul.mubr.msk.bf16.gmra.mrb[56].mxu1 %vm624_vm2, %v2811_v0 }
  0x7a   :  { %2636 = vmatprep.mubr.msk.bf16.mxu0 %vm624_vm2, %v2812_v1  ;;  %2724 = vmatprep.mubr.msk.bf16.mxu1 %vm624_vm2, %v2814_v2 }
  0x81   :  { %2637 = vmatmul.mubr.msk.bf16.gmra.mrb[60].mxu0 %vm624_vm2, %v2813_v3  ;;  %2725 = vmatmul.mubr.msk.bf16.gmra.mrb[60].mxu1 %vm624_vm2, %v2815_v4 }
  0x82   :  { %2640 = vmatprep.mubr.msk.bf16.mxu0 %vm624_vm2, %v2816_v5  ;;  %2728 = vmatprep.mubr.msk.bf16.mxu1 %vm624_vm2, %v2818_v6 }
  0x89   :  { %2641 = vmatmul.mubr.msk.bf16.gmra.mrb[64].mxu0 %vm624_vm2, %v2817_v7  ;;  %2729 = vmatmul.mubr.msk.bf16.gmra.mrb[64].mxu1 %vm624_vm2, %v2819_v8 }
  0x8a   :  { %2644 = vmatprep.mubr.msk.bf16.mxu0 %vm624_vm2, %v2820_v9  ;;  %2732 = vmatprep.mubr.msk.bf16.mxu1 %vm624_vm2, %v2822_v10 }
  0x91   :  { %2645 = vmatmul.mubr.msk.bf16.gmra.mrb[68].mxu0 %vm624_vm2, %v2821_v11  ;;  %2733 = vmatmul.mubr.msk.bf16.gmra.mrb[68].mxu1 %vm624_vm2, %v2823_v12 }
  0x92   :  { %2648 = vmatprep.mubr.msk.bf16.mxu0 %vm624_vm2, %v2824_v13  ;;  %2736 = vmatprep.mubr.msk.bf16.mxu1 %vm624_vm2, %v2826_v14 }
  0x99   :  { %2649 = vmatmul.mubr.msk.bf16.gmra.mrb[72].mxu0 %vm624_vm2, %v2825_v15  ;;  %2737 = vmatmul.mubr.msk.bf16.gmra.mrb[72].mxu1 %vm624_vm2, %v2827_v16 }
  0x9a   :  { %2652 = vmatprep.mubr.msk.bf16.mxu0 %vm624_vm2, %v2828_v17  ;;  %2740 = vmatprep.mubr.msk.bf16.mxu1 %vm624_vm2, %v2830_v18 }
  0xa1   :  { %2653 = vmatmul.mubr.msk.bf16.gmra.mrb[76].mxu0 %vm624_vm2, %v2829_v19  ;;  %2741 = vmatmul.mubr.msk.bf16.gmra.mrb[76].mxu1 %vm624_vm2, %v2831_v20 }
  0xa2   :  { %2656 = vmatprep.mubr.msk.bf16.mxu0 %vm624_vm2, %v2832_v21  ;;  %2744 = vmatprep.mubr.msk.bf16.mxu1 %vm624_vm2, %v2834_v22 }
  0xa9   :  { %2657 = vmatmul.mubr.msk.bf16.gmra.mrb[80].mxu0 %vm624_vm2, %v2833_v23  ;;  %2745 = vmatmul.mubr.msk.bf16.gmra.mrb[80].mxu1 %vm624_vm2, %v2835_v24 }
  0xaa   :  { %2660 = vmatprep.mubr.msk.bf16.mxu0 %vm624_vm2, %v2836_v25 }
  0xb1   :  { %2661 = vmatmul.mubr.msk.bf16.gmra.mrb[84].mxu0 %vm624_vm2, %v2837_v26 }
  0xdc   :  { %v3206_v27 = vpop.f32.mrb[0].mxu0  ;;  %v3208_v28 = vpop.f32.mrb[0].mxu1 }
  0xdd   :  { %v3210_v29 = vpop.f32.mrb[1].mxu0  ;;  %v3212_v30 = vpop.f32.mrb[1].mxu1 }
  0xde   :  { %v3214_v31 = vpop.f32.mrb[2].mxu0  ;;  %v3216_v32 = vpop.f32.mrb[2].mxu1 }
  0xdf   :  { %v3218_v33 = vpop.f32.mrb[3].mxu0  ;;  %v3220_v34 = vpop.f32.mrb[3].mxu1 }
  0xe4   :  { %v3222_v35 = vpop.f32.mrb[4].mxu0  ;;  %v3224_v36 = vpop.f32.mrb[4].mxu1 }
  0xe5   :  { %v3226_v37 = vpop.f32.mrb[5].mxu0  ;;  %v3228_v38 = vpop.f32.mrb[5].mxu1 }
  0xe6   :  { %v3230_v39 = vpop.f32.mrb[6].mxu0  ;;  %v3232_v40 = vpop.f32.mrb[6].mxu1 }
  0xe7   :  { %v3234_v41 = vpop.f32.mrb[7].mxu0  ;;  %v3236_v42 = vpop.f32.mrb[7].mxu1 }
  0xec   :  { %v3238_v43 = vpop.f32.mrb[8].mxu0  ;;  %v3240_v44 = vpop.f32.mrb[8].mxu1 }
  0xed   :  { %v3242_v45 = vpop.f32.mrb[9].mxu0  ;;  %v3244_v46 = vpop.f32.mrb[9].mxu1 }
  0xee   :  { %v3246_v47 = vpop.f32.mrb[10].mxu0  ;;  %v3248_v48 = vpop.f32.mrb[10].mxu1 }
  0xef   :  { %v3250_v49 = vpop.f32.mrb[11].mxu0  ;;  %v3252_v50 = vpop.f32.mrb[11].mxu1 }
  0xf4   :  { %v3254_v51 = vpop.f32.mrb[12].mxu0  ;;  %v3256_v52 = vpop.f32.mrb[12].mxu1 }
  0xf5   :  { %v3258_v53 = vpop.f32.mrb[13].mxu0  ;;  %v3260_v54 = vpop.f32.mrb[13].mxu1 }
  0xf6   :  { %v3262_v55 = vpop.f32.mrb[14].mxu0  ;;  %v3264_v56 = vpop.f32.mrb[14].mxu1 }
  0xf7   :  { %v3266_v57 = vpop.f32.mrb[15].mxu0  ;;  %v3268_v58 = vpop.f32.mrb[15].mxu1 }
  0xfc   :  { %v3270_v59 = vpop.f32.mrb[16].mxu0  ;;  %v3272_v60 = vpop.f32.mrb[16].mxu1 }
  0xfd   :  { %v3274_v61 = vpop.f32.mrb[17].mxu0  ;;  %v3276_v62 = vpop.f32.mrb[17].mxu1 }
  0xfe   :  { %v3278_v63 = vpop.f32.mrb[18].mxu0  ;;  %v3280_v0 = vpop.f32.mrb[18].mxu1 }
  0xff   :  { %v3282_v1 = vpop.f32.mrb[19].mxu0  ;;  %v3284_v2 = vpop.f32.mrb[19].mxu1 }
 0x104   :  { %v3286_v3 = vpop.f32.mrb[20].mxu0  ;;  %v3288_v4 = vpop.f32.mrb[20].mxu1 }
 0x105   :  { %v3290_v5 = vpop.f32.mrb[21].mxu0  ;;  %v3292_v6 = vpop.f32.mrb[21].mxu1 }
 0x106   :  { %v3294_v7 = vpop.f32.mrb[22].mxu0  ;;  %v3296_v8 = vpop.f32.mrb[22].mxu1 }
 0x107   :  { %v3298_v9 = vpop.f32.mrb[23].mxu0  ;;  %v3300_v10 = vpop.f32.mrb[23].mxu1 }
 0x10c   :  { %v3302_v11 = vpop.f32.mrb[24].mxu0  ;;  %v3304_v12 = vpop.f32.mrb[24].mxu1 }
 0x10d   :  { %v3306_v13 = vpop.f32.mrb[25].mxu0  ;;  %v3308_v14 = vpop.f32.mrb[25].mxu1 }
 0x10e   :  { %v3310_v15 = vpop.f32.mrb[26].mxu0  ;;  %v3312_v16 = vpop.f32.mrb[26].mxu1 }
 0x10f   :  { %4164 = vst [vmem:[#allocation2_spill] sm:$0xff] %v3312_v16  ;;  %v3314_v17 = vpop.f32.mrb[27].mxu0  ;;  %v3316_v18 = vpop.f32.mrb[27].mxu1 }
 0x110   :  { %4165 = vst [vmem:[#allocation3_spill] sm:$0xff] %v3314_v17  ;;  %4166 = vst [vmem:[#allocation4_spill] sm:$0xff] %v3316_v18 }
 0x114   :  { %v3318_v19 = vpop.f32.mrb[28].mxu0  ;;  %v3320_v20 = vpop.f32.mrb[28].mxu1 }
 0x115   :  { %4167 = vst [vmem:[#allocation5_spill] sm:$0xff] %v3318_v19  ;;  %4168 = vst [vmem:[#allocation6_spill] sm:$0xff] %v3320_v20  ;;  %v3322_v21 = vpop.f32.mrb[29].mxu0  ;;  %v3324_v22 = vpop.f32.mrb[29].mxu1 }
 0x116   :  { %4169 = vst [vmem:[#allocation7_spill] sm:$0xff] %v3322_v21  ;;  %4170 = vst [vmem:[#allocation8_spill] sm:$0xff] %v3324_v22  ;;  %v3326_v23 = vpop.f32.mrb[30].mxu0  ;;  %v3328_v24 = vpop.f32.mrb[30].mxu1 }
 0x117   :  { %4171 = vst [vmem:[#allocation9_spill] sm:$0xff] %v3326_v23  ;;  %v3330_v25 = vpop.f32.mrb[31].mxu0  ;;  %v3332_v26 = vpop.f32.mrb[31].mxu1 }
 0x118   :  { %4172 = vst [vmem:[#allocation10_spill] sm:$0xff] %v3332_v26  ;;  %v3352_v26 = vsel %vm1611_vm3, %v3206_v27, -inf  ;;  %v3372_v27 = vsel %vm1611_vm3, %v3218_v33, -inf  ;;  %v3392_v33 = vsel %vm1611_vm3, %v3226_v37, -inf  ;;  %v3412_v37 = vsel %vm1611_vm3, %v3234_v41, -inf }
 0x119   :  { %4178 = vst [vmem:[#allocation16_spill] sm:$0xff] %v3352_v26  ;;  %4181 = vst [vmem:[#allocation19_spill] sm:$0xff] %v3372_v27  ;;  %v3432_v41 = vsel %vm1611_vm3, %v3242_v45, -inf  ;;  %v3452_v45 = vsel %vm1611_vm3, %v3244_v46, -inf  ;;  %v3472_v46 = vsel %vm1611_vm3, %v3256_v52, -inf  ;;  %v3492_v52 = vsel %vm1611_vm3, %v3270_v59, -inf }
 0x11a   :  { %4187 = vst [vmem:[#allocation25_spill] sm:$0xff] %v3472_v46  ;;  %4188 = vst [vmem:[#allocation26_spill] sm:$0xff] %v3492_v52  ;;  %v3512_v59 = vsel %vm1611_vm3, %v3278_v63, -inf  ;;  %v3532_v63 = vsel %vm1611_vm3, %v3286_v3, -inf  ;;  %v3554_v3 = vsel %vm1611_vm3, %v3292_v6, -inf  ;;  %v3577_v6 = vsel %vm1611_vm3, %v3300_v10, -inf }
 0x11b   :  { %4193 = vst [vmem:[#allocation31_spill] sm:$0xff] %v3532_v63  ;;  %v3569_v63 = vsel %vm1611_vm3, %v3298_v9, -inf  ;;  %v3591_v9 = vsel %vm1611_vm3, %v3304_v12, -inf  ;;  %v4200_v10 = vld [vmem:[#allocation3_spill] sm:$0xff] }
 0x11c   :  { %v3334_v16 = vpop.f32.mrb[32].mxu0  ;;  %v3336_v17 = vpop.f32.mrb[32].mxu1  ;;  %4198 = vst [vmem:[#allocation36_spill] sm:$0xff] %v3591_v9 }
 0x11d   :  { %4173 = vst [vmem:[#allocation11_spill] sm:$0xff] %v3336_v17  ;;  %v3338_v18 = vpop.f32.mrb[33].mxu0  ;;  %v3340_v19 = vpop.f32.mrb[33].mxu1  ;;  %v3356_v17 = vsel %vm1611_vm3, %v3210_v29, -inf  ;;  %v3376_v29 = vsel %vm1611_vm3, %v3212_v30, -inf  ;;  %v3396_v30 = vsel %vm1611_vm3, %v3220_v34, -inf }
 0x11e   :  { %4174 = vst [vmem:[#allocation12_spill] sm:$0xff] %v3340_v19  ;;  %v3342_v20 = vpop.f32.mrb[34].mxu0  ;;  %v3344_v21 = vpop.f32.mrb[34].mxu1  ;;  %4179 = vst [vmem:[#allocation17_spill] sm:$0xff] %v3356_v17  ;;  %v3360_v19 = vsel %vm1611_vm3, %v3208_v28, -inf  ;;  %v3380_v28 = vsel %vm1611_vm3, %v3216_v32, -inf }
 0x11f   :  { %4175 = vst [vmem:[#allocation13_spill] sm:$0xff] %v3342_v20  ;;  %4176 = vst [vmem:[#allocation14_spill] sm:$0xff] %v3344_v21  ;;  %v3346_v22 = vpop.f32.mrb[35].mxu0  ;;  %v3348_v23 = vpop.f32.mrb[35].mxu1  ;;  %v3400_v32 = vsel %vm1611_vm3, %v3224_v36, -inf  ;;  %v3416_v34 = vsel %vm1611_vm3, %v3228_v38, -inf }
 0x120   :  { %4177 = vst [vmem:[#allocation15_spill] sm:$0xff] %v3348_v23  ;;  %4180 = vst [vmem:[#allocation18_spill] sm:$0xff] %v3360_v19  ;;  %v3368_v23 = vsel %vm1611_vm3, %v3214_v31, -inf  ;;  %v3388_v31 = vsel %vm1611_vm3, %v3222_v35, -inf  ;;  %v3408_v35 = vsel %vm1611_vm3, %v3230_v39, -inf  ;;  %v3420_v36 = vsel %vm1611_vm3, %v3232_v40, -inf }
 0x121   :  { %4182 = vst [vmem:[#allocation20_spill] sm:$0xff] %v3376_v29  ;;  %4183 = vst [vmem:[#allocation21_spill] sm:$0xff] %v3380_v28  ;;  %v3428_v39 = vsel %vm1611_vm3, %v3238_v43, -inf  ;;  %v3436_v38 = vsel %vm1611_vm3, %v3236_v42, -inf  ;;  %v3440_v40 = vsel %vm1611_vm3, %v3240_v44, -inf  ;;  %v3448_v43 = vsel %vm1611_vm3, %v3250_v49, -inf }
 0x122   :  { %4184 = vst [vmem:[#allocation22_spill] sm:$0xff] %v3388_v31  ;;  %4185 = vst [vmem:[#allocation23_spill] sm:$0xff] %v3400_v32  ;;  %v3456_v42 = vsel %vm1611_vm3, %v3248_v48, -inf  ;;  %v3460_v44 = vsel %vm1611_vm3, %v3254_v51, -inf  ;;  %v3468_v49 = vsel %vm1611_vm3, %v3252_v50, -inf  ;;  %v3476_v48 = vsel %vm1611_vm3, %v3262_v55, -inf }
 0x123   :  { %4186 = vst [vmem:[#allocation24_spill] sm:$0xff] %v3420_v36  ;;  %v3444_v36 = vsel %vm1611_vm3, %v3246_v47, -inf  ;;  %v3464_v47 = vsel %vm1611_vm3, %v3258_v53, -inf  ;;  %v3480_v51 = vsel %vm1611_vm3, %v3266_v57, -inf  ;;  %v3484_v53 = vsel %vm1611_vm3, %v3260_v54, -inf  ;;  %v4206_v17 = vld [vmem:[#allocation4_spill] sm:$0xff] }
 0x124   :  { %v3362_v20 = vpop.f32.mrb[36].mxu0  ;;  %v3364_v21 = vpop.f32.mrb[36].mxu1  ;;  %v3488_v50 = vsel %vm1611_vm3, %v3264_v56, -inf  ;;  %v3496_v55 = vsel %vm1611_vm3, %v3274_v61, -inf  ;;  %v3500_v57 = vsel %vm1611_vm3, %v3268_v58, -inf  ;;  %v3504_v54 = vsel %vm1611_vm3, %v3272_v60, -inf }
 0x125   :  { %v3382_v19 = vpop.f32.mrb[37].mxu0  ;;  %v3384_v26 = vpop.f32.mrb[37].mxu1  ;;  %4189 = vst [vmem:[#allocation27_spill] sm:$0xff] %v3504_v54  ;;  %v3516_v61 = vsel %vm1611_vm3, %v3282_v1, -inf  ;;  %v3520_v58 = vsel %vm1611_vm3, %v3276_v62, -inf  ;;  %v3524_v60 = vsel %vm1611_vm3, %v3280_v0, -inf }
 0x126   :  { %v3402_v28 = vpop.f32.mrb[38].mxu0  ;;  %v3404_v29 = vpop.f32.mrb[38].mxu1  ;;  %4190 = vst [vmem:[#allocation28_spill] sm:$0xff] %v3520_v58  ;;  %4191 = vst [vmem:[#allocation29_spill] sm:$0xff] %v3524_v60  ;;  %v3536_v1 = vsel %vm1611_vm3, %v3290_v5, -inf  ;;  %v3540_v62 = vsel %vm1611_vm3, %v3284_v2, -inf }
 0x127   :  { %v3422_v32 = vpop.f32.mrb[39].mxu0  ;;  %v3424_v31 = vpop.f32.mrb[39].mxu1  ;;  %v3544_v0 = vsel %vm1611_vm3, %v3288_v4, -inf  ;;  %v3558_v5 = vsel %vm1611_vm3, %v3296_v8, -inf  ;;  %v4202_v8 = vld [vmem:[#allocation5_spill] sm:$0xff]  ;;  %v3611_v12 = vsel %vm1611_vm3, %v4206_v17, -inf }
 0x128   :  { %4194 = vst [vmem:[#allocation32_spill] sm:$0xff] %v3544_v0  ;;  %4195 = vst [vmem:[#allocation33_spill] sm:$0xff] %v3558_v5  ;;  %v3587_v5 = vsel %vm1611_vm3, %v3310_v15, -inf  ;;  %v4208_v9 = vld [vmem:[#allocation7_spill] sm:$0xff]  ;;  %v3631_v17 = vsel %vm1611_vm3, %v3330_v25, -inf }
 0x129   :  { %4207 = vst [vmem:[#allocation4_spill] sm:$0xff] %v3611_v12  ;;  %4216 = vst [vmem:[#allocation38_spill] sm:$0xff] %v3631_v17  ;;  %v4222_v25 = vld [vmem:[#allocation11_spill] sm:$0xff] }
 0x12c   :  { %v3506_v46 = vpop.f32.mrb[40].mxu0  ;;  %v3508_v56 = vpop.f32.mrb[40].mxu1 }
 0x12d   :  { %v3526_v54 = vpop.f32.mrb[41].mxu0  ;;  %v3528_v52 = vpop.f32.mrb[41].mxu1 }
 0x12e   :  { %4192 = vst [vmem:[#allocation30_spill] sm:$0xff] %v3528_v52  ;;  %v2619_v60 = vpop.f32.mrb[42].mxu0  ;;  %v3546_v58 = vpop.f32.mrb[42].mxu1  ;;  %v3550_v52 = vsel %vm1611_vm3, %v3294_v7, -inf  ;;  %v3573_v7 = vsel %vm1611_vm3, %v3302_v11, -inf  ;;  %v3595_v11 = vsel %vm1611_vm3, %v3308_v14, -inf }
 0x12f   :  { %v3561_v2 = vsel %vm1611_vm3, %v2619_v60, -inf  ;;  %v3563_v4 = vpop.f32.mrb[43].mxu0  ;;  %v3565_v0 = vpop.f32.mrb[43].mxu1  ;;  %4197 = vst [vmem:[#allocation35_spill] sm:$0xff] %v3573_v7  ;;  %v3583_v60 = vsel %vm1611_vm3, %v3306_v13, -inf  ;;  %4199 = vst [vmem:[#allocation37_spill] sm:$0xff] %v3595_v11 }
 0x130   :  { %4196 = vst [vmem:[#allocation34_spill] sm:$0xff] %v3561_v2  ;;  %v3599_v7 = vsel %vm1611_vm3, %v4200_v10, -inf  ;;  %v3603_v13 = vsel %vm1611_vm3, %v4202_v8, -inf  ;;  %v4204_v2 = vld [vmem:[#allocation2_spill] sm:$0xff]  ;;  %v3615_v14 = vsel %vm1611_vm3, %v4208_v9, -inf  ;;  %v4210_v11 = vld [vmem:[#allocation9_spill] sm:$0xff] }
 0x131   :  { %4201 = vst [vmem:[#allocation3_spill] sm:$0xff] %v3599_v7  ;;  %4203 = vst [vmem:[#allocation5_spill] sm:$0xff] %v3603_v13  ;;  %v3607_v15 = vsel %vm1611_vm3, %v4204_v2, -inf  ;;  %v3619_v10 = vsel %vm1611_vm3, %v4210_v11, -inf  ;;  %v4212_v7 = vld [vmem:[#allocation6_spill] sm:$0xff]  ;;  %v4214_v13 = vld [vmem:[#allocation8_spill] sm:$0xff] }
 0x132   :  { %4205 = vst [vmem:[#allocation2_spill] sm:$0xff] %v3607_v15  ;;  %4209 = vst [vmem:[#allocation7_spill] sm:$0xff] %v3615_v14  ;;  %v3623_v8 = vsel %vm1611_vm3, %v4212_v7, -inf  ;;  %v3627_v2 = vsel %vm1611_vm3, %v4214_v13, -inf  ;;  %v3635_v9 = vsel %vm1611_vm3, %v3334_v16, -inf  ;;  %v3639_v11 = vsel %vm1611_vm3, %v3328_v24, -inf }
 0x133   :  { %4211 = vst [vmem:[#allocation9_spill] sm:$0xff] %v3619_v10  ;;  %4213 = vst [vmem:[#allocation6_spill] sm:$0xff] %v3623_v8  ;;  %v4219_v15 = vld [vmem:[#allocation10_spill] sm:$0xff]  ;;  %v3647_v13 = vsel %vm1611_vm3, %v3338_v18, -inf  ;;  %v4224_v16 = vld [vmem:[#allocation12_spill] sm:$0xff] }
 0x134   :  { %4215 = vst [vmem:[#allocation8_spill] sm:$0xff] %v3627_v2  ;;  %4217 = vst [vmem:[#allocation39_spill] sm:$0xff] %v3635_v9  ;;  %v3643_v7 = vsel %vm1611_vm3, %v4219_v15, -inf  ;;  %v2622_v8 = vpop.f32.mrb[44].mxu0  ;;  %v2710_v10 = vpop.f32.mrb[44].mxu1  ;;  %v3651_v2 = vsel %vm1611_vm3, %v4222_v25, -inf }
 0x135   :  { %4218 = vst [vmem:[#allocation40_spill] sm:$0xff] %v3639_v11  ;;  %4220 = vst [vmem:[#allocation10_spill] sm:$0xff] %v3643_v7  ;;  %v3655_v9 = vsel %vm1611_vm3, %v4224_v16, -inf  ;;  %v1634_v24 = vsel %vm1611_vm3, %v2622_v8, -inf  ;;  %v1100_v11 = vpop.f32.mrb[45].mxu0  ;;  %v1452_v17 = vpop.f32.mrb[45].mxu1 }
 0x136   :  { %4221 = vst [vmem:[#allocation41_spill] sm:$0xff] %v3647_v13  ;;  %4223 = vst [vmem:[#allocation11_spill] sm:$0xff] %v3651_v2  ;;  %v4226_v15 = vld [vmem:[#allocation13_spill] sm:$0xff]  ;;  %v4228_v14 = vld [vmem:[#allocation14_spill] sm:$0xff]  ;;  %v1635_v13 = vmax.f32 %v3368_v23, %v1634_v24  ;;  %v3668_v25 = vsel %vm1611_vm3, %v1100_v11, -inf  ;;  %v2623_v2 = vpop.f32.mrb[46].mxu0 }
 0x137   :  { %4225 = vst [vmem:[#allocation12_spill] sm:$0xff] %v3655_v9  ;;  %v3660_v7 = vsel %vm1611_vm3, %v4226_v15, -inf  ;;  %v3664_v18 = vsel %vm1611_vm3, %v4228_v14, -inf  ;;  %4230 = vst [vmem:[#allocation42_spill] sm:$0xff] %v3668_v25  ;;  %v3670_v16 = vpop.f32.mrb[46].mxu1  ;;  %v3674_v8 = vsel %vm1611_vm3, %v3346_v22, -inf }
 0x138   :  { %4227 = vst [vmem:[#allocation13_spill] sm:$0xff] %v3660_v7  ;;  %4229 = vst [vmem:[#allocation14_spill] sm:$0xff] %v3664_v18  ;;  %v1641_v9 = vsel %vm1611_vm3, %v2623_v2, -inf  ;;  %v1103_v7 = vpop.f32.mrb[47].mxu0  ;;  %v1638_v14 = vsel %vm1611_vm3, %v1452_v17, -inf  ;;  %v1455_v23 = vpop.f32.mrb[47].mxu1  ;;  %v1637_v22 = vmax.f32 %v1635_v13, %v3396_v30 }
 0x139   :  { %v4231_v24 = vld [vmem:[#allocation15_spill] sm:$0xff]  ;;  %v1642_v18 = vmax.f32 %v3392_v33, %v1641_v9  ;;  %v1627_v12 = vsel %vm1611_vm3, %v1103_v7, -inf  ;;  %v3689_v15 = vsel %vm1611_vm3, %v3362_v20, -inf  ;;  %v3693_v2 = vsel %vm1611_vm3, %v3364_v21, -inf  ;;  %v4234_v17 = vld [vmem:[#allocation16_spill] sm:$0xff]  ;;  %v4236_v21 = vld [vmem:[#allocation18_spill] sm:$0xff] }
 0x13a   :  { %v3682_v11 = vsel %vm1611_vm3, %v4231_v24, -inf  ;;  %4232 = vst [vmem:[#allocation15_spill] sm:$0xff] %v3689_v15  ;;  %4233 = vst [vmem:[#allocation43_spill] sm:$0xff] %v3693_v2  ;;  %v1628_v25 = vmax.f32 %v4234_v17, %v1627_v12  ;;  %v3699_v24 = vld [vmem:[%s4158_s2] ss:$0 sm:$0xff]  ;;  %v1645_v33 = vsel %vm1611_vm3, %v1455_v23, -inf  ;;  %v1639_v9 = vmax.f32 %v1637_v22, %v1638_v14 }
 0x13b   :  { %v3704_v30 = vsel %vm1611_vm3, %v3382_v19, -inf  ;;  %v3708_v20 = vsel %vm1611_vm3, %v3384_v26, -inf  ;;  %v1644_v7 = vmax.f32 %v1642_v18, %v4236_v21  ;;  %v3713_v12 = vsel %vm1611_vm3, %v3402_v28, -inf  ;;  %v4239_v19 = vld [vmem:[#allocation20_spill] sm:$0xff]  ;;  %v4243_v15 = vld [vmem:[#allocation22_spill] sm:$0xff] }
 0x13c   :  { %4235 = vst [vmem:[#allocation16_spill] sm:$0xff] %v3708_v20  ;;  %v3717_v13 = vsel %vm1611_vm3, %v3422_v32, -inf  ;;  %v3721_v23 = vsel %vm1611_vm3, %v3404_v29, -inf  ;;  %v1630_v17 = vmax.f32 %v1628_v25, %v4239_v19  ;;  %v3726_v26 = vsel %vm1611_vm3, %v3424_v31, -inf  ;;  %v2626_v22 = vpop.f32.mrb[48].mxu0  ;;  %v2714_v21 = vpop.f32.mrb[48].mxu1 }
 0x13d   :  { %4237 = vst [vmem:[#allocation18_spill] sm:$0xff] %v3717_v13  ;;  %4238 = vst [vmem:[#allocation44_spill] sm:$0xff] %v3721_v23  ;;  %v1631_v18 = vsel %vm1611_vm3, %v3546_v58, -inf  ;;  %v1923_v28 = vadd.f32 %v3699_v24, %v1639_v9  ;;  %v1646_v14 = vmax.f32 %v1644_v7, %v1645_v33  ;;  %v3733_v32 = vsel %vm1611_vm3, %v3506_v46, -inf  ;;  %v1116_v19 = vpop.f32.mrb[49].mxu0  ;;  %v1468_v31 = vpop.f32.mrb[49].mxu1 }
 0x13e   :  { %4240 = vst [vmem:[#allocation20_spill] sm:$0xff] %v3726_v26  ;;  %4241 = vst [vmem:[#allocation45_spill] sm:$0xff] %v3733_v32  ;;  %v1632_v29 = vmax.f32 %v1630_v17, %v1631_v18  ;;  %v1652_v27 = vsel %vm1611_vm3, %v2710_v10, -inf  ;;  %v1662_v25 = vsel %vm1611_vm3, %v2626_v22, -inf  ;;  %v1648_v33 = vsel %vm1611_vm3, %v1116_v19, -inf  ;;  %v2627_v9 = vpop.f32.mrb[50].mxu0 }
 0x13f   :  { %v1966_v23 = vmax.f32 %v1923_v28, 0.0  ;;  %v1924_v2 = vadd.f32 %v3699_v24, %v1646_v14  ;;  %v1663_v58 = vmax.f32 %v3408_v35, %v1662_v25  ;;  %v3740_v7 = vpop.f32.mrb[50].mxu1  ;;  %v1649_v17 = vmax.f32 %v3412_v37, %v1648_v33  ;;  %v1119_v18 = vpop.f32.mrb[51].mxu0  ;;  %v4242_v19 = vld [vmem:[#allocation21_spill] sm:$0xff] }
 0x140   :  { %v1922_v46 = vadd.f32 %v3699_v24, %v1632_v29  ;;  %v1669_v10 = vsel %vm1611_vm3, %v2627_v9, -inf  ;;  %v1666_v22 = vsel %vm1611_vm3, %v1468_v31, -inf  ;;  %v1471_v32 = vpop.f32.mrb[51].mxu1  ;;  %v1655_v35 = vsel %vm1611_vm3, %v1119_v18, -inf }
 0x141   :  { %v2447_v28 = vpack.c.bf16 %v1966_v23, %v1966_v23  ;;  %v1967_v20 = vmax.f32 %v1924_v2, 0.0  ;;  %v1670_v14 = vmax.f32 %v3432_v41, %v1669_v10  ;;  %v1651_v26 = vmax.f32 %v1649_v17, %v4242_v19  ;;  %v4244_v41 = vld [vmem:[#allocation23_spill] sm:$0xff] }
 0x142   :  { %v1965_v25 = vmax.f32 %v1922_v46, 0.0  ;;  %v1656_v13 = vmax.f32 %v4243_v15, %v1655_v35  ;;  %v1665_v29 = vmax.f32 %v1663_v58, %v3436_v38  ;;  %v3753_v37 = vsel %vm1611_vm3, %v3508_v56, -inf }
 0x143   :  { %2183 = vst.msk [vmem:[%s4159_s3 + $0xc] sm:$0xf] %vm2179_vm4, %v2447_v28  ;;  %v2448_v2 = vpack.c.bf16 %v1967_v20, %v1967_v20  ;;  %v1672_v23 = vmax.f32 %v1670_v14, %v4244_v41  ;;  %v1673_v31 = vsel %vm1611_vm3, %v1471_v32, -inf  ;;  %v1653_v9 = vmax.f32 %v1651_v26, %v1652_v27 }
 0x144   :  { %v2446_v33 = vpack.c.bf16 %v1965_v25, %v1965_v25  ;;  %v1658_v15 = vmax.f32 %v1656_v13, %v3416_v34  ;;  %v1667_v46 = vmax.f32 %v1665_v29, %v1666_v22  ;;  %v3764_v38 = vsel %vm1611_vm3, %v3526_v54, -inf  ;;  %v2630_v26 = vpop.f32.mrb[52].mxu0  ;;  %v2718_v34 = vpop.f32.mrb[52].mxu1 }
 0x145   :  { %v3768_v56 = vsel %vm1611_vm3, %v3563_v4, -inf  ;;  %v1659_v20 = vsel %vm1611_vm3, %v3670_v16, -inf  ;;  %2184 = vst.msk [vmem:[%s4159_s3 + $0x10] sm:$0xf] %vm2179_vm4, %v2448_v2  ;;  %v1674_v27 = vmax.f32 %v1672_v23, %v1673_v31  ;;  %v1925_v54 = vadd.f32 %v3699_v24, %v1653_v9  ;;  %v1132_v32 = vpop.f32.mrb[53].mxu0  ;;  %v1484_v58 = vpop.f32.mrb[53].mxu1 }
 0x146   :  { %2182 = vst.msk [vmem:[%s4159_s3 + $0x8] sm:$0xf] %vm2179_vm4, %v2446_v33  ;;  %v1660_v4 = vmax.f32 %v1658_v15, %v1659_v20  ;;  %v1927_v13 = vadd.f32 %v3699_v24, %v1667_v46  ;;  %v1690_v16 = vsel %vm1611_vm3, %v2630_v26, -inf  ;;  %v1680_v17 = vsel %vm1611_vm3, %v2714_v21, -inf  ;;  %v2631_v28 = vpop.f32.mrb[54].mxu0  ;;  %v3787_v14 = vpop.f32.mrb[54].mxu1 }
 0x147   :  { %v1928_v10 = vadd.f32 %v3699_v24, %v1674_v27  ;;  %v1691_v18 = vmax.f32 %v3444_v36, %v1690_v16  ;;  %v1676_v22 = vsel %vm1611_vm3, %v1132_v32, -inf  ;;  %v1968_v35 = vmax.f32 %v1925_v54, 0.0  ;;  %v1135_v2 = vpop.f32.mrb[55].mxu0  ;;  %v1487_v41 = vpop.f32.mrb[55].mxu1  ;;  %v4245_v46 = vld [vmem:[#allocation24_spill] sm:$0xff] }
 0x148   :  { %v1926_v25 = vadd.f32 %v3699_v24, %v1660_v4  ;;  %v1970_v19 = vmax.f32 %v1927_v13, 0.0  ;;  %v1677_v29 = vmax.f32 %v3448_v43, %v1676_v22  ;;  %v1697_v21 = vsel %vm1611_vm3, %v2631_v28, -inf }
 0x149   :  { %v1971_v23 = vmax.f32 %v1928_v10, 0.0  ;;  %v1683_v31 = vsel %vm1611_vm3, %v1135_v2, -inf  ;;  %v1693_v36 = vmax.f32 %v1691_v18, %v3468_v49  ;;  %v2449_v33 = vpack.c.bf16 %v1968_v35, %v1968_v35 }
 0x14a   :  { %v1969_v9 = vmax.f32 %v1926_v25, 0.0  ;;  %v2451_v15 = vpack.c.bf16 %v1970_v19, %v1970_v19  ;;  %v1679_v20 = vmax.f32 %v1677_v29, %v4245_v46  ;;  %v1698_v26 = vmax.f32 %v3464_v47, %v1697_v21 }
 0x14b   :  { %v2452_v27 = vpack.c.bf16 %v1971_v23, %v1971_v23  ;;  %v1684_v54 = vmax.f32 %v3428_v39, %v1683_v31  ;;  %v1694_v43 = vsel %vm1611_vm3, %v1484_v58, -inf  ;;  %v3800_v4 = vsel %vm1611_vm3, %v3565_v0, -inf  ;;  %2185 = vst.msk [vmem:[%s4159_s3 + $0x14] sm:$0xf] %vm2179_vm4, %v2449_v33 }
 0x14c   :  { %v2450_v49 = vpack.c.bf16 %v1969_v9, %v1969_v9  ;;  %2187 = vst.msk [vmem:[%s4159_s3 + $0x1c] sm:$0xf] %vm2179_vm4, %v2451_v15  ;;  %v1681_v47 = vmax.f32 %v1679_v20, %v1680_v17  ;;  %v1695_v13 = vmax.f32 %v1693_v36, %v1694_v43  ;;  %v1687_v39 = vsel %vm1611_vm3, %v3740_v7, -inf  ;;  %v2634_v58 = vpop.f32.mrb[56].mxu0  ;;  %v2722_v10 = vpop.f32.mrb[56].mxu1 }
 0x14d   :  { %2188 = vst.msk [vmem:[%s4159_s3 + $0x20] sm:$0xf] %vm2179_vm4, %v2452_v27  ;;  %v1686_v0 = vmax.f32 %v1684_v54, %v3452_v45  ;;  %v1700_v16 = vmax.f32 %v1698_v26, %v3440_v40  ;;  %v1701_v32 = vsel %vm1611_vm3, %v1487_v41, -inf  ;;  %v1708_v17 = vsel %vm1611_vm3, %v2718_v34, -inf  ;;  %v1148_v45 = vpop.f32.mrb[57].mxu0  ;;  %v1500_v28 = vpop.f32.mrb[57].mxu1 }
 0x14e   :  { %2186 = vst.msk [vmem:[%s4159_s3 + $0x18] sm:$0xf] %vm2179_vm4, %v2450_v49  ;;  %v1929_v7 = vadd.f32 %v3699_v24, %v1681_v47  ;;  %v1931_v18 = vadd.f32 %v3699_v24, %v1695_v13  ;;  %v1718_v22 = vsel %vm1611_vm3, %v2634_v58, -inf  ;;  %v1704_v19 = vsel %vm1611_vm3, %v1148_v45, -inf  ;;  %v2635_v29 = vpop.f32.mrb[58].mxu0  ;;  %v3829_v2 = vpop.f32.mrb[58].mxu1 }
 0x14f   :  { %v1688_v40 = vmax.f32 %v1686_v0, %v1687_v39  ;;  %v1702_v35 = vmax.f32 %v1700_v16, %v1701_v32  ;;  %v1719_v25 = vmax.f32 %v3476_v48, %v1718_v22  ;;  %v1705_v21 = vmax.f32 %v3480_v51, %v1704_v19  ;;  %v1151_v31 = vpop.f32.mrb[59].mxu0  ;;  %v1503_v36 = vpop.f32.mrb[59].mxu1  ;;  %v4246_v47 = vld [vmem:[#allocation25_spill] sm:$0xff] }
 0x150   :  { %v1972_v41 = vmax.f32 %v1929_v7, 0.0  ;;  %v1974_v23 = vmax.f32 %v1931_v18, 0.0  ;;  %v1725_v34 = vsel %vm1611_vm3, %v2635_v29, -inf  ;;  %v1711_v48 = vsel %vm1611_vm3, %v1151_v31, -inf }
 0x151   :  { %v1930_v33 = vadd.f32 %v3699_v24, %v1688_v40  ;;  %v1932_v9 = vadd.f32 %v3699_v24, %v1702_v35  ;;  %v1726_v15 = vmax.f32 %v3496_v55, %v1725_v34  ;;  %v1707_v27 = vmax.f32 %v1705_v21, %v3456_v42 }
 0x152   :  { %v2453_v46 = vpack.c.bf16 %v1972_v41, %v1972_v41  ;;  %v2455_v20 = vpack.c.bf16 %v1974_v23, %v1974_v23  ;;  %v1712_v26 = vmax.f32 %v3460_v44, %v1711_v48  ;;  %v1721_v43 = vmax.f32 %v1719_v25, %v3500_v57 }
 0x153   :  { %v1973_v54 = vmax.f32 %v1930_v33, 0.0  ;;  %v1975_v51 = vmax.f32 %v1932_v9, 0.0  ;;  %v1722_v49 = vsel %vm1611_vm3, %v1500_v28, -inf  ;;  %v1715_v42 = vsel %vm1611_vm3, %v3787_v14, -inf }
 0x154   :  { %2189 = vst.msk [vmem:[%s4159_s3 + $0x24] sm:$0xf] %vm2179_vm4, %v2453_v46  ;;  %2191 = vst.msk [vmem:[%s4159_s3 + $0x2c] sm:$0xf] %vm2179_vm4, %v2455_v20  ;;  %v1709_v44 = vmax.f32 %v1707_v27, %v1708_v17  ;;  %v1714_v55 = vmax.f32 %v1712_v26, %v3484_v53  ;;  %v1728_v57 = vmax.f32 %v1726_v15, %v4246_v47  ;;  %v1729_v16 = vsel %vm1611_vm3, %v1503_v36, -inf  ;;  %v2638_v32 = vpop.f32.mrb[60].mxu0 }
 0x155   :  { %v2454_v13 = vpack.c.bf16 %v1973_v54, %v1973_v54  ;;  %v2456_v39 = vpack.c.bf16 %v1975_v51, %v1975_v51  ;;  %v1723_v0 = vmax.f32 %v1721_v43, %v1722_v49  ;;  %v2726_v58 = vpop.f32.mrb[60].mxu1  ;;  %v1746_v45 = vsel %vm1611_vm3, %v2638_v32, -inf  ;;  %v1164_v28 = vpop.f32.mrb[61].mxu0  ;;  %v4247_v26 = vld [vmem:[#allocation26_spill] sm:$0xff] }
 0x156   :  { %v1933_v7 = vadd.f32 %v3699_v24, %v1709_v44  ;;  %v1716_v18 = vmax.f32 %v1714_v55, %v1715_v42  ;;  %v1730_v22 = vmax.f32 %v1728_v57, %v1729_v16  ;;  %v1516_v14 = vpop.f32.mrb[61].mxu1  ;;  %v1736_v53 = vsel %vm1611_vm3, %v2722_v10, -inf  ;;  %v2639_v25 = vpop.f32.mrb[62].mxu0  ;;  %v4249_v44 = vld [vmem:[#allocation27_spill] sm:$0xff] }
 0x157   :  { %2190 = vst.msk [vmem:[%s4159_s3 + $0x28] sm:$0xf] %vm2179_vm4, %v2454_v13  ;;  %2192 = vst.msk [vmem:[%s4159_s3 + $0x30] sm:$0xf] %vm2179_vm4, %v2456_v39  ;;  %v1935_v17 = vadd.f32 %v3699_v24, %v1723_v0  ;;  %v1747_v40 = vmax.f32 %v3512_v59, %v1746_v45  ;;  %v1732_v35 = vsel %vm1611_vm3, %v1164_v28, -inf  ;;  %v3868_v19 = vpop.f32.mrb[62].mxu1 }
 0x158   :  { %v1976_v29 = vmax.f32 %v1933_v7, 0.0  ;;  %v1934_v41 = vadd.f32 %v3699_v24, %v1716_v18  ;;  %v1936_v23 = vadd.f32 %v3699_v24, %v1730_v22  ;;  %v1733_v21 = vmax.f32 %v3516_v61, %v1732_v35  ;;  %v1167_v34 = vpop.f32.mrb[63].mxu0  ;;  %v1519_v31 = vpop.f32.mrb[63].mxu1 }
 0x159   :  { %v1978_v36 = vmax.f32 %v1935_v17, 0.0  ;;  %v1753_v10 = vsel %vm1611_vm3, %v2639_v25, -inf  ;;  %v1739_v33 = vsel %vm1611_vm3, %v1167_v34, -inf  ;;  %v1749_v59 = vmax.f32 %v1747_v40, %v3540_v62 }
 0x15a   :  { %v2457_v9 = vpack.c.bf16 %v1976_v29, %v1976_v29  ;;  %v1977_v15 = vmax.f32 %v1934_v41, 0.0  ;;  %v1979_v48 = vmax.f32 %v1936_v23, 0.0  ;;  %v1735_v46 = vmax.f32 %v1733_v21, %v3488_v50 }
 0x15b   :  { %v2459_v20 = vpack.c.bf16 %v1978_v36, %v1978_v36  ;;  %v1754_v27 = vmax.f32 %v3536_v1, %v1753_v10  ;;  %v1740_v54 = vmax.f32 %v4247_v26, %v1739_v33  ;;  %v1750_v61 = vsel %vm1611_vm3, %v1516_v14, -inf  ;;  %v4248_v1 = vld [vmem:[#allocation28_spill] sm:$0xff]  ;;  %v4250_v36 = vld [vmem:[#allocation29_spill] sm:$0xff]  ;;  %v4251_v33 = vld [vmem:[#allocation31_spill] sm:$0xff] }
 0x15c   :  { %2193 = vst.msk [vmem:[%s4159_s3 + $0x34] sm:$0xf] %vm2179_vm4, %v2457_v9  ;;  %v2458_v51 = vpack.c.bf16 %v1977_v15, %v1977_v15  ;;  %v2460_v43 = vpack.c.bf16 %v1979_v48, %v1979_v48  ;;  %v1737_v62 = vmax.f32 %v1735_v46, %v1736_v53  ;;  %v1751_v49 = vmax.f32 %v1749_v59, %v1750_v61  ;;  %v2642_v57 = vpop.f32.mrb[64].mxu0  ;;  %v2730_v13 = vpop.f32.mrb[64].mxu1 }
 0x15d   :  { %2195 = vst.msk [vmem:[%s4159_s3 + $0x3c] sm:$0xf] %vm2179_vm4, %v2459_v20  ;;  %v1743_v50 = vsel %vm1611_vm3, %v3829_v2, -inf  ;;  %v1742_v42 = vmax.f32 %v1740_v54, %v4248_v1  ;;  %v1756_v55 = vmax.f32 %v1754_v27, %v4249_v44  ;;  %v1757_v47 = vsel %vm1611_vm3, %v1519_v31, -inf  ;;  %v1180_v32 = vpop.f32.mrb[65].mxu0  ;;  %v1532_v7 = vpop.f32.mrb[65].mxu1 }
 0x15e   :  { %2194 = vst.msk [vmem:[%s4159_s3 + $0x38] sm:$0xf] %vm2179_vm4, %v2458_v51  ;;  %2196 = vst.msk [vmem:[%s4159_s3 + $0x40] sm:$0xf] %vm2179_vm4, %v2460_v43  ;;  %v1937_v2 = vadd.f32 %v3699_v24, %v1737_v62  ;;  %v1764_v39 = vsel %vm1611_vm3, %v2726_v58, -inf  ;;  %v1939_v0 = vadd.f32 %v3699_v24, %v1751_v49  ;;  %v1774_v16 = vsel %vm1611_vm3, %v2642_v57, -inf }
 0x15f   :  { %v1744_v18 = vmax.f32 %v1742_v42, %v1743_v50  ;;  %v1758_v22 = vmax.f32 %v1756_v55, %v1757_v47  ;;  %v1775_v45 = vmax.f32 %v3550_v52, %v1774_v16  ;;  %v1760_v28 = vsel %vm1611_vm3, %v1180_v32, -inf  ;;  %v2643_v14 = vpop.f32.mrb[66].mxu0  ;;  %v3907_v53 = vpop.f32.mrb[66].mxu1  ;;  %v4252_v27 = vld [vmem:[#allocation32_spill] sm:$0xff] }
 0x160   :  { %v1980_v17 = vmax.f32 %v1937_v2, 0.0  ;;  %v1982_v40 = vmax.f32 %v1939_v0, 0.0  ;;  %v1761_v35 = vmax.f32 %v3569_v63, %v1760_v28  ;;  %v1781_v58 = vsel %vm1611_vm3, %v2643_v14, -inf  ;;  %v1183_v25 = vpop.f32.mrb[67].mxu0  ;;  %v1535_v29 = vpop.f32.mrb[67].mxu1 }
 0x161   :  { %v1938_v41 = vadd.f32 %v3699_v24, %v1744_v18  ;;  %v1940_v23 = vadd.f32 %v3699_v24, %v1758_v22  ;;  %v1782_v21 = vmax.f32 %v3583_v60, %v1781_v58  ;;  %v1767_v52 = vsel %vm1611_vm3, %v1183_v25, -inf  ;;  %v4255_v25 = vld [vmem:[#allocation33_spill] sm:$0xff] }
 0x162   :  { %v2461_v34 = vpack.c.bf16 %v1980_v17, %v1980_v17  ;;  %v2463_v31 = vpack.c.bf16 %v1982_v40, %v1982_v40  ;;  %v1763_v10 = vmax.f32 %v1761_v35, %v4250_v36  ;;  %v1768_v59 = vmax.f32 %v4251_v33, %v1767_v52  ;;  %v4257_v52 = vld [vmem:[#allocation35_spill] sm:$0xff] }
 0x163   :  { %v1981_v9 = vmax.f32 %v1938_v41, 0.0  ;;  %v1983_v63 = vmax.f32 %v1940_v23, 0.0  ;;  %v1777_v15 = vmax.f32 %v1775_v45, %v3577_v6  ;;  %v1778_v48 = vsel %vm1611_vm3, %v1532_v7, -inf  ;;  %v4253_v7 = vld [vmem:[#allocation3_spill] sm:$0xff] }
 0x164   :  { %2197 = vst.msk [vmem:[%s4159_s3 + $0x44] sm:$0xf] %vm2179_vm4, %v2461_v34  ;;  %2199 = vst.msk [vmem:[%s4159_s3 + $0x4c] sm:$0xf] %vm2179_vm4, %v2463_v31  ;;  %v1771_v60 = vsel %vm1611_vm3, %v3868_v19, -inf  ;;  %v1765_v46 = vmax.f32 %v1763_v10, %v1764_v39  ;;  %v1770_v20 = vmax.f32 %v1768_v59, %v3554_v3  ;;  %v1784_v6 = vmax.f32 %v1782_v21, %v4252_v27  ;;  %v2646_v43 = vpop.f32.mrb[68].mxu0 }
 0x165   :  { %v2462_v26 = vpack.c.bf16 %v1981_v9, %v1981_v9  ;;  %v2464_v54 = vpack.c.bf16 %v1983_v63, %v1983_v63  ;;  %v1779_v61 = vmax.f32 %v1777_v15, %v1778_v48  ;;  %v1785_v51 = vsel %vm1611_vm3, %v1535_v29, -inf  ;;  %v2734_v62 = vpop.f32.mrb[68].mxu1  ;;  %v1196_v44 = vpop.f32.mrb[69].mxu0  ;;  %v4256_v23 = vld [vmem:[#allocation7_spill] sm:$0xff]  ;;  %v4258_v63 = vld [vmem:[#allocation37_spill] sm:$0xff]  ;;  %v4259_v48 = vld [vmem:[#allocation36_spill] sm:$0xff] }
 0x166   :  { %v1941_v49 = vadd.f32 %v3699_v24, %v1765_v46  ;;  %v1772_v50 = vmax.f32 %v1770_v20, %v1771_v60  ;;  %v1786_v1 = vmax.f32 %v1784_v6, %v1785_v51  ;;  %v1802_v42 = vsel %vm1611_vm3, %v2646_v43, -inf  ;;  %v1548_v19 = vpop.f32.mrb[69].mxu1  ;;  %v2647_v2 = vpop.f32.mrb[70].mxu0 }
 0x167   :  { %2198 = vst.msk [vmem:[%s4159_s3 + $0x48] sm:$0xf] %vm2179_vm4, %v2462_v26  ;;  %2200 = vst.msk [vmem:[%s4159_s3 + $0x50] sm:$0xf] %vm2179_vm4, %v2464_v54  ;;  %v1792_v3 = vsel %vm1611_vm3, %v2730_v13, -inf  ;;  %v1943_v55 = vadd.f32 %v3699_v24, %v1779_v61  ;;  %v1803_v47 = vmax.f32 %v3587_v5, %v1802_v42  ;;  %v1788_v57 = vsel %vm1611_vm3, %v1196_v44, -inf }
 0x168   :  { %v3946_v39 = vpop.f32.mrb[70].mxu1  ;;  %v1984_v0 = vmax.f32 %v1941_v49, 0.0  ;;  %v1942_v16 = vadd.f32 %v3699_v24, %v1772_v50  ;;  %v1944_v32 = vadd.f32 %v3699_v24, %v1786_v1  ;;  %v1789_v18 = vmax.f32 %v4253_v7, %v1788_v57  ;;  %v1199_v22 = vpop.f32.mrb[71].mxu0  ;;  %v4254_v5 = vld [vmem:[#allocation4_spill] sm:$0xff]  ;;  %v4260_v50 = vld [vmem:[#allocation9_spill] sm:$0xff] }
 0x169   :  { %v1551_v45 = vpop.f32.mrb[71].mxu1  ;;  %v1986_v28 = vmax.f32 %v1943_v55, 0.0  ;;  %v1809_v13 = vsel %vm1611_vm3, %v2647_v2, -inf  ;;  %v1795_v14 = vsel %vm1611_vm3, %v1199_v22, -inf  ;;  %v1805_v17 = vmax.f32 %v1803_v47, %v4254_v5  ;;  %v4261_v47 = vld [vmem:[#allocation38_spill] sm:$0xff]  ;;  %v4262_v7 = vld [vmem:[#allocation41_spill] sm:$0xff] }
 0x16a   :  { %v2465_v40 = vpack.c.bf16 %v1984_v0, %v1984_v0  ;;  %v1985_v35 = vmax.f32 %v1942_v16, 0.0  ;;  %v1987_v58 = vmax.f32 %v1944_v32, 0.0  ;;  %v1791_v29 = vmax.f32 %v1789_v18, %v4255_v25  ;;  %v4264_v5 = vld [vmem:[#allocation5_spill] sm:$0xff] }
 0x16b   :  { %v2467_v41 = vpack.c.bf16 %v1986_v28, %v1986_v28  ;;  %v1810_v21 = vmax.f32 %v4256_v23, %v1809_v13  ;;  %v1796_v34 = vmax.f32 %v4257_v52, %v1795_v14  ;;  %v1806_v31 = vsel %vm1611_vm3, %v1548_v19, -inf  ;;  %v4263_v13 = vld [vmem:[#allocation2_spill] sm:$0xff] }
 0x16c   :  { %2201 = vst.msk [vmem:[%s4159_s3 + $0x54] sm:$0xf] %vm2179_vm4, %v2465_v40  ;;  %v2466_v36 = vpack.c.bf16 %v1985_v35, %v1985_v35  ;;  %v2468_v10 = vpack.c.bf16 %v1987_v58, %v1987_v58  ;;  %v1793_v33 = vmax.f32 %v1791_v29, %v1792_v3  ;;  %v1807_v59 = vmax.f32 %v1805_v17, %v1806_v31  ;;  %v2650_v20 = vpop.f32.mrb[72].mxu0  ;;  %v2738_v27 = vpop.f32.mrb[72].mxu1  ;;  %v4265_v58 = vld [vmem:[#allocation10_spill] sm:$0xff] }
 0x16d   :  { %2203 = vst.msk [vmem:[%s4159_s3 + $0x5c] sm:$0xf] %vm2179_vm4, %v2467_v41  ;;  %v1799_v9 = vsel %vm1611_vm3, %v3907_v53, -inf  ;;  %v1798_v15 = vmax.f32 %v1796_v34, %v4258_v63  ;;  %v1812_v60 = vmax.f32 %v1810_v21, %v4259_v48  ;;  %v1813_v46 = vsel %vm1611_vm3, %v1551_v45, -inf  ;;  %v1212_v61 = vpop.f32.mrb[73].mxu0  ;;  %v1564_v51 = vpop.f32.mrb[73].mxu1 }
 0x16e   :  { %2202 = vst.msk [vmem:[%s4159_s3 + $0x58] sm:$0xf] %vm2179_vm4, %v2466_v36  ;;  %2204 = vst.msk [vmem:[%s4159_s3 + $0x60] sm:$0xf] %vm2179_vm4, %v2468_v10  ;;  %v1945_v53 = vadd.f32 %v3699_v24, %v1793_v33  ;;  %v1820_v6 = vsel %vm1611_vm3, %v2734_v62, -inf  ;;  %v1947_v26 = vadd.f32 %v3699_v24, %v1807_v59  ;;  %v1830_v54 = vsel %vm1611_vm3, %v2650_v20, -inf }
 0x16f   :  { %v1800_v43 = vmax.f32 %v1798_v15, %v1799_v9  ;;  %v1814_v49 = vmax.f32 %v1812_v60, %v1813_v46  ;;  %v1831_v1 = vmax.f32 %v4260_v50, %v1830_v54  ;;  %v1816_v42 = vsel %vm1611_vm3, %v1212_v61, -inf  ;;  %v2651_v44 = vpop.f32.mrb[74].mxu0  ;;  %v3985_v19 = vpop.f32.mrb[74].mxu1  ;;  %v4266_v21 = vld [vmem:[#allocation8_spill] sm:$0xff]  ;;  %v4267_v34 = vld [vmem:[#allocation6_spill] sm:$0xff] }
 0x170   :  { %v1988_v3 = vmax.f32 %v1945_v53, 0.0  ;;  %v1990_v55 = vmax.f32 %v1947_v26, 0.0  ;;  %v1817_v57 = vmax.f32 %v4261_v47, %v1816_v42  ;;  %v1837_v62 = vsel %vm1611_vm3, %v2651_v44, -inf  ;;  %v1215_v2 = vpop.f32.mrb[75].mxu0  ;;  %v1567_v0 = vpop.f32.mrb[75].mxu1  ;;  %v4268_v26 = vld [vmem:[#allocation13_spill] sm:$0xff] }
 0x171   :  { %v1946_v16 = vadd.f32 %v3699_v24, %v1800_v43  ;;  %v1948_v32 = vadd.f32 %v3699_v24, %v1814_v49  ;;  %v1838_v18 = vmax.f32 %v4262_v7, %v1837_v62  ;;  %v1823_v22 = vsel %vm1611_vm3, %v1215_v2, -inf }
 0x172   :  { %v2469_v45 = vpack.c.bf16 %v1988_v3, %v1988_v3  ;;  %v2471_v28 = vpack.c.bf16 %v1990_v55, %v1990_v55  ;;  %v1819_v14 = vmax.f32 %v1817_v57, %v4263_v13  ;;  %v1824_v17 = vmax.f32 %v4264_v5, %v1823_v22  ;;  %v4270_v22 = vld [vmem:[#allocation39_spill] sm:$0xff]  ;;  %v4271_v5 = vld [vmem:[#allocation12_spill] sm:$0xff] }
 0x173   :  { %v1989_v40 = vmax.f32 %v1946_v16, 0.0  ;;  %v1991_v35 = vmax.f32 %v1948_v32, 0.0  ;;  %v1833_v25 = vmax.f32 %v1831_v1, %v4265_v58  ;;  %v1834_v29 = vsel %vm1611_vm3, %v1564_v51, -inf  ;;  %v4269_v16 = vld [vmem:[#allocation40_spill] sm:$0xff] }
 0x174   :  { %2205 = vst.msk [vmem:[%s4159_s3 + $0x64] sm:$0xf] %vm2179_vm4, %v2469_v45  ;;  %2207 = vst.msk [vmem:[%s4159_s3 + $0x6c] sm:$0xf] %vm2179_vm4, %v2471_v28  ;;  %v1827_v41 = vsel %vm1611_vm3, %v3946_v39, -inf  ;;  %v1821_v23 = vmax.f32 %v1819_v14, %v1820_v6  ;;  %v1826_v52 = vmax.f32 %v1824_v17, %v4266_v21  ;;  %v1840_v31 = vmax.f32 %v1838_v18, %v4267_v34  ;;  %v2654_v9 = vpop.f32.mrb[76].mxu0 }
 0x175   :  { %v2470_v36 = vpack.c.bf16 %v1989_v40, %v1989_v40  ;;  %v2472_v10 = vpack.c.bf16 %v1991_v35, %v1991_v35  ;;  %v1835_v33 = vmax.f32 %v1833_v25, %v1834_v29  ;;  %v1841_v59 = vsel %vm1611_vm3, %v1567_v0, -inf  ;;  %v2742_v63 = vpop.f32.mrb[76].mxu1  ;;  %v1228_v20 = vpop.f32.mrb[77].mxu0  ;;  %v4272_v40 = vld [vmem:[#allocation11_spill] sm:$0xff] }
 0x176   :  { %v1949_v15 = vadd.f32 %v3699_v24, %v1821_v23  ;;  %v1828_v48 = vmax.f32 %v1826_v52, %v1827_v41  ;;  %v1842_v60 = vmax.f32 %v1840_v31, %v1841_v59  ;;  %v1858_v46 = vsel %vm1611_vm3, %v2654_v9, -inf  ;;  %v1580_v39 = vpop.f32.mrb[77].mxu1  ;;  %v2655_v51 = vpop.f32.mrb[78].mxu0 }
 0x177   :  { %2206 = vst.msk [vmem:[%s4159_s3 + $0x68] sm:$0xf] %vm2179_vm4, %v2470_v36  ;;  %2208 = vst.msk [vmem:[%s4159_s3 + $0x70] sm:$0xf] %vm2179_vm4, %v2472_v10  ;;  %v1848_v53 = vsel %vm1611_vm3, %v2738_v27, -inf  ;;  %v1951_v6 = vadd.f32 %v3699_v24, %v1835_v33  ;;  %v1859_v54 = vmax.f32 %v4268_v26, %v1858_v46  ;;  %v1844_v61 = vsel %vm1611_vm3, %v1228_v20, -inf }
 0x178   :  { %v4024_v43 = vpop.f32.mrb[78].mxu1  ;;  %v1992_v49 = vmax.f32 %v1949_v15, 0.0  ;;  %v1950_v50 = vadd.f32 %v3699_v24, %v1828_v48  ;;  %v1952_v1 = vadd.f32 %v3699_v24, %v1842_v60  ;;  %v1845_v42 = vmax.f32 %v3674_v8, %v1844_v61  ;;  %v1231_v44 = vpop.f32.mrb[79].mxu0  ;;  %v4273_v60 = vld [vmem:[#allocation18_spill] sm:$0xff] }
 0x179   :  { %v1583_v3 = vpop.f32.mrb[79].mxu1  ;;  %v1994_v55 = vmax.f32 %v1951_v6, 0.0  ;;  %v1865_v27 = vsel %vm1611_vm3, %v2655_v51, -inf  ;;  %v1851_v47 = vsel %vm1611_vm3, %v1231_v44, -inf  ;;  %v1861_v57 = vmax.f32 %v1859_v54, %v3682_v11  ;;  %v4274_v51 = vld [vmem:[#allocation14_spill] sm:$0xff] }
 0x17a   :  { %v2473_v62 = vpack.c.bf16 %v1992_v49, %v1992_v49  ;;  %v1993_v2 = vmax.f32 %v1950_v50, 0.0  ;;  %v1995_v0 = vmax.f32 %v1952_v1, 0.0  ;;  %v1847_v32 = vmax.f32 %v1845_v42, %v4269_v16  ;;  %v4275_v50 = vld [vmem:[#allocation15_spill] sm:$0xff] }
 0x17b   :  { %v2475_v7 = vpack.c.bf16 %v1994_v55, %v1994_v55  ;;  %v1866_v18 = vmax.f32 %v3704_v30, %v1865_v27  ;;  %v1852_v45 = vmax.f32 %v4270_v22, %v1851_v47  ;;  %v1862_v8 = vsel %vm1611_vm3, %v1580_v39, -inf }
 0x17c   :  { %2209 = vst.msk [vmem:[%s4159_s3 + $0x74] sm:$0xf] %vm2179_vm4, %v2473_v62  ;;  %v2474_v28 = vpack.c.bf16 %v1993_v2, %v1993_v2  ;;  %v2476_v13 = vpack.c.bf16 %v1995_v0, %v1995_v0  ;;  %v1849_v11 = vmax.f32 %v1847_v32, %v1848_v53  ;;  %v1863_v14 = vmax.f32 %v1861_v57, %v1862_v8  ;;  %v2658_v25 = vpop.f32.mrb[80].mxu0  ;;  %v2746_v29 = vpop.f32.mrb[80].mxu1  ;;  %v4277_v57 = vld [vmem:[#allocation16_spill] sm:$0xff]  ;;  %v4278_v2 = vld [vmem:[#allocation43_spill] sm:$0xff] }
 0x17d   :  { %2211 = vst.msk [vmem:[%s4159_s3 + $0x7c] sm:$0xf] %vm2179_vm4, %v2475_v7  ;;  %v1855_v30 = vsel %vm1611_vm3, %v3985_v19, -inf  ;;  %v1854_v17 = vmax.f32 %v1852_v45, %v4271_v5  ;;  %v1868_v35 = vmax.f32 %v1866_v18, %v4272_v40  ;;  %v1869_v58 = vsel %vm1611_vm3, %v1583_v3, -inf  ;;  %v1244_v52 = vpop.f32.mrb[81].mxu0  ;;  %v1596_v34 = vpop.f32.mrb[81].mxu1 }
 0x17e   :  { %2210 = vst.msk [vmem:[%s4159_s3 + $0x78] sm:$0xf] %vm2179_vm4, %v2474_v28  ;;  %2212 = vst.msk [vmem:[%s4159_s3 + $0x80] sm:$0xf] %vm2179_vm4, %v2476_v13  ;;  %v1953_v19 = vadd.f32 %v3699_v24, %v1849_v11  ;;  %v1876_v41 = vsel %vm1611_vm3, %v2742_v63, -inf  ;;  %v1955_v23 = vadd.f32 %v3699_v24, %v1863_v14  ;;  %v1886_v21 = vsel %vm1611_vm3, %v2658_v25, -inf }
 0x17f   :  { %v1856_v31 = vmax.f32 %v1854_v17, %v1855_v30  ;;  %v1870_v36 = vmax.f32 %v1868_v35, %v1869_v58  ;;  %v1887_v10 = vmax.f32 %v3713_v12, %v1886_v21  ;;  %v1872_v33 = vsel %vm1611_vm3, %v1244_v52, -inf  ;;  %v2659_v59 = vpop.f32.mrb[82].mxu0  ;;  %v4063_v9 = vpop.f32.mrb[82].mxu1  ;;  %v4276_v3 = vld [vmem:[#allocation20_spill] sm:$0xff]  ;;  %v4279_v30 = vld [vmem:[#allocation17_spill] sm:$0xff]  ;;  %v4280_v5 = vld [vmem:[#allocation34_spill] sm:$0xff] }
 0x180   :  { %v1996_v15 = vmax.f32 %v1953_v19, 0.0  ;;  %v1998_v48 = vmax.f32 %v1955_v23, 0.0  ;;  %v1873_v46 = vmax.f32 %v4273_v60, %v1872_v33  ;;  %v1893_v63 = vsel %vm1611_vm3, %v2659_v59, -inf  ;;  %v1247_v20 = vpop.f32.mrb[83].mxu0  ;;  %v1599_v39 = vpop.f32.mrb[83].mxu1  ;;  %v4282_v59 = vld [vmem:[#allocation44_spill] sm:$0xff] }
 0x181   :  { %v1954_v53 = vadd.f32 %v3699_v24, %v1856_v31  ;;  %v1956_v6 = vadd.f32 %v3699_v24, %v1870_v36  ;;  %v1894_v26 = vmax.f32 %v3764_v38, %v1893_v63  ;;  %v1879_v12 = vsel %vm1611_vm3, %v1247_v20, -inf  ;;  %v4284_v63 = vld [vmem:[#allocation42_spill] sm:$0xff] }
 0x182   :  { %v2477_v54 = vpack.c.bf16 %v1996_v15, %v1996_v15  ;;  %v2479_v61 = vpack.c.bf16 %v1998_v48, %v1998_v48  ;;  %v1875_v49 = vmax.f32 %v1873_v46, %v4274_v51  ;;  %v1880_v1 = vmax.f32 %v4275_v50, %v1879_v12  ;;  %v4283_v46 = vld [vmem:[#allocation19_spill] sm:$0xff] }
 0x183   :  { %v1997_v42 = vmax.f32 %v1954_v53, 0.0  ;;  %v1999_v44 = vmax.f32 %v1956_v6, 0.0  ;;  %v1889_v55 = vmax.f32 %v1887_v10, %v4276_v3  ;;  %v1890_v27 = vsel %vm1611_vm3, %v1596_v34, -inf  ;;  %v4287_v6 = vld [vmem:[#allocation30_spill] sm:$0xff] }
 0x184   :  { %2213 = vst.msk [vmem:[%s4159_s3 + $0x84] sm:$0xf] %vm2179_vm4, %v2477_v54  ;;  %2215 = vst.msk [vmem:[%s4159_s3 + $0x8c] sm:$0xf] %vm2179_vm4, %v2479_v61  ;;  %v1883_v38 = vsel %vm1611_vm3, %v4024_v43, -inf  ;;  %v1877_v47 = vmax.f32 %v1875_v49, %v1876_v41  ;;  %v1882_v62 = vmax.f32 %v1880_v1, %v4277_v57  ;;  %v1896_v0 = vmax.f32 %v1894_v26, %v4278_v2  ;;  %v2662_v22 = vpop.f32.mrb[84].mxu0 }
 0x185   :  { %v2478_v16 = vpack.c.bf16 %v1997_v42, %v1997_v42  ;;  %v2480_v32 = vpack.c.bf16 %v1999_v44, %v1999_v44  ;;  %v1891_v7 = vmax.f32 %v1889_v55, %v1890_v27  ;;  %v1897_v18 = vsel %vm1611_vm3, %v1599_v39, -inf  ;;  %v1260_v11 = vpop.f32.mrb[85].mxu0  ;;  %v4286_v39 = vld [vmem:[#allocation45_spill] sm:$0xff] }
 0x186   :  { %v1957_v45 = vadd.f32 %v3699_v24, %v1877_v47  ;;  %v1884_v8 = vmax.f32 %v1882_v62, %v1883_v38  ;;  %v1898_v28 = vmax.f32 %v1896_v0, %v1897_v18  ;;  %v1615_v13 = vsel %vm1611_vm3, %v2662_v22, -inf  ;;  %v2663_v58 = vpop.f32.mrb[86].mxu0 }
 0x187   :  { %2214 = vst.msk [vmem:[%s4159_s3 + $0x88] sm:$0xf] %vm2179_vm4, %v2478_v16  ;;  %2216 = vst.msk [vmem:[%s4159_s3 + $0x90] sm:$0xf] %vm2179_vm4, %v2480_v32  ;;  %v1904_v43 = vsel %vm1611_vm3, %v2746_v29, -inf  ;;  %v1959_v14 = vadd.f32 %v3699_v24, %v1891_v7  ;;  %v4281_v17 = vmax.f32 %v4279_v30, %v4280_v5  ;;  %v1900_v35 = vsel %vm1611_vm3, %v1260_v11, -inf }
 0x188   :  { %v2000_v25 = vmax.f32 %v1957_v45, 0.0  ;;  %v1958_v19 = vadd.f32 %v3699_v24, %v1884_v8  ;;  %v1960_v41 = vadd.f32 %v3699_v24, %v1898_v28  ;;  %v1901_v23 = vmax.f32 %v3768_v56, %v1900_v35  ;;  %v1263_v21 = vpop.f32.mrb[87].mxu0 }
 0x189   :  { %v1616_v40 = vmax.f32 %v4281_v17, %v1615_v13  ;;  %v2002_v52 = vmax.f32 %v1959_v14, 0.0  ;;  %v1622_v34 = vsel %vm1611_vm3, %v2663_v58, -inf  ;;  %v1907_v31 = vsel %vm1611_vm3, %v1263_v21, -inf }
 0x18a   :  { %v2481_v36 = vpack.c.bf16 %v2000_v25, %v2000_v25  ;;  %v2001_v10 = vmax.f32 %v1958_v19, 0.0  ;;  %v2003_v33 = vmax.f32 %v1960_v41, 0.0  ;;  %v1903_v15 = vmax.f32 %v1901_v23, %v4282_v59 }
 0x18b   :  { %v1618_v29 = vmax.f32 %v1616_v40, %v3800_v4  ;;  %v2483_v48 = vpack.c.bf16 %v2002_v52, %v2002_v52  ;;  %v4285_v20 = vmax.f32 %v4283_v46, %v4284_v63  ;;  %v1908_v53 = vmax.f32 %v4286_v39, %v1907_v31 }
 0x18c   :  { %v1909_v4 = vsel %vm1611_vm3, %v4287_v6, -inf  ;;  %2217 = vst.msk [vmem:[%s4159_s3 + $0x94] sm:$0xf] %vm2179_vm4, %v2481_v36  ;;  %v2482_v26 = vpack.c.bf16 %v2001_v10, %v2001_v10  ;;  %v2484_v12 = vpack.c.bf16 %v2003_v33, %v2003_v33  ;;  %v1905_v54 = vmax.f32 %v1903_v15, %v1904_v43 }
 0x18d   :  { %v1920_v60 = vadd.f32 %v3699_v24, %v1618_v29  ;;  %v1623_v56 = vmax.f32 %v4285_v20, %v1622_v34  ;;  %2219 = vst.msk [vmem:[%s4159_s3 + $0x9c] sm:$0xf] %vm2179_vm4, %v2483_v48  ;;  %v1910_v49 = vmax.f32 %v1908_v53, %v1909_v4  ;;  %v1911_v50 = vsel %vm1611_vm3, %v4063_v9, -inf }
 0x18e   :  { %2218 = vst.msk [vmem:[%s4159_s3 + $0x98] sm:$0xf] %vm2179_vm4, %v2482_v26  ;;  %2220 = vst.msk [vmem:[%s4159_s3 + $0xa0] sm:$0xf] %vm2179_vm4, %v2484_v12  ;;  %v1961_v1 = vadd.f32 %v3699_v24, %v1905_v54 }
 0x18f   :  { %v1963_v61 = vmax.f32 %v1920_v60, 0.0  ;;  %v1625_v51 = vmax.f32 %v1623_v56, %v3753_v37  ;;  %v1912_v37 = vmax.f32 %v1910_v49, %v1911_v50 }
 0x190   :  { %v2004_v3 = vmax.f32 %v1961_v1, 0.0 }
 0x191   :  { %v2444_v42 = vpack.c.bf16 %v1963_v61, %v1963_v61  ;;  %v1921_v44 = vadd.f32 %v3699_v24, %v1625_v51  ;;  %v1962_v9 = vadd.f32 %v3699_v24, %v1912_v37 }
 0x192   :  { %v2485_v27 = vpack.c.bf16 %v2004_v3, %v2004_v3 }
 0x193   :  { %2180 = vst.msk [vmem:[%s4159_s3] sm:$0xf] %vm2179_vm4, %v2444_v42  ;;  %v1964_v55 = vmax.f32 %v1921_v44, 0.0  ;;  %v2005_v47 = vmax.f32 %v1962_v9, 0.0 }
 0x194   :  { %2221 = vst.msk [vmem:[%s4159_s3 + $0xa4] sm:$0xf] %vm2179_vm4, %v2485_v27 }
 0x195   :  { %v2445_v38 = vpack.c.bf16 %v1964_v55, %v1964_v55  ;;  %v2486_v57 = vpack.c.bf16 %v2005_v47, %v2005_v47 }
 0x197   :  { %2181 = vst.msk [vmem:[%s4159_s3 + $0x4] sm:$0xf] %vm2179_vm4, %v2445_v38  ;;  %2222 = vst.msk [vmem:[%s4159_s3 + $0xa8] sm:$0xf] %vm2179_vm4, %v2486_v57 }

// kernel: net_forward.4
= control target key start
LH: loop header
LB: loop body
LE: loop exit
PB: predicated region body
PF: predicated region fallthrough
CT: control target
= control target key end

     0   :  { %vm737_vm0 = vcmask 523264   ;;  %vm1314_vm1 = vcmask 519168   ;;  %s2349_s1 = inlined_call_operand.vmem [shape: bf16[576,64], index: 1, kind: input, shape index: {}]   ;;  %s2350_s0 = inlined_call_operand.vmem [shape: bf16[4,56,576], index: 0, kind: input, shape index: {}]   ;;  %s2351_s2 = inlined_call_operand.vmem [shape: f32[1,64], index: 2, kind: input, shape index: {}]   ;;  %s2352_s3 = inlined_call_operand.vmem [shape: bf16[56,64], index: 3, kind: output, shape index: {}]  }
   0x1   :  { %v1723_v0 = vld [vmem:[%s2349_s1 + $0x40] sm:$0xff]   ;;  %v1727_v4 = vld [vmem:[%s2349_s1 + $0x48] sm:$0xff]   ;;  %v1731_v8 = vld [vmem:[%s2349_s1 + $0x50] sm:$0xff]  }
   0x2   :  { %v1724_v1 = vld [vmem:[%s2349_s1 + $0xc0] sm:$0xff]   ;;  %1461 = vmatprep.subr.bf16.mxu0 %v1723_v0  ;;  %v1728_v5 = vld [vmem:[%s2349_s1 + $0xc8] sm:$0xff]   ;;  %v1732_v9 = vld [vmem:[%s2349_s1 + $0xd0] sm:$0xff]  }
   0x3   :  { %v1725_v2 = vld [vmem:[%s2349_s1] sm:$0xff]   ;;  %1561 = vmatprep.subr.bf16.mxu1 %v1724_v1  ;;  %v1729_v6 = vld [vmem:[%s2349_s1 + $0x8] sm:$0xff]   ;;  %v1733_v10 = vld [vmem:[%s2349_s1 + $0x10] sm:$0xff]  }
   0x4   :  { %v1726_v3 = vld [vmem:[%s2349_s1 + $0x80] sm:$0xff]   ;;  %1462 = vmatpush3.bf16.msra.mxu0 %v1725_v2  ;;  %v1730_v7 = vld [vmem:[%s2349_s1 + $0x88] sm:$0xff]   ;;  %v1734_v11 = vld [vmem:[%s2349_s1 + $0x90] sm:$0xff]  }
   0x5   :  { %1562 = vmatpush3.bf16.msra.mxu1 %v1726_v3  ;;  %1463 = vmatprep.subr.bf16.mxu0 %v1727_v4  ;;  %v1735_v12 = vld [vmem:[%s2349_s1 + $0x58] sm:$0xff]   ;;  %v1739_v16 = vld [vmem:[%s2349_s1 + $0x60] sm:$0xff]   ;;  %v1743_v20 = vld [vmem:[%s2349_s1 + $0x68] sm:$0xff]  }
   0x6   :  { %1563 = vmatprep.subr.bf16.mxu1 %v1728_v5  ;;  %v1736_v13 = vld [vmem:[%s2349_s1 + $0xd8] sm:$0xff]   ;;  %v1740_v17 = vld [vmem:[%s2349_s1 + $0xe0] sm:$0xff]   ;;  %v1744_v21 = vld [vmem:[%s2349_s1 + $0xe8] sm:$0xff]  }
   0x7   :  { %v1737_v14 = vld [vmem:[%s2349_s1 + $0x18] sm:$0xff]   ;;  %v1741_v18 = vld [vmem:[%s2349_s1 + $0x20] sm:$0xff]   ;;  %v1745_v22 = vld [vmem:[%s2349_s1 + $0x28] sm:$0xff]  }
   0x8   :  { %1464 = vmatpush3.bf16.msra.mxu0 %v1729_v6  ;;  %v1738_v15 = vld [vmem:[%s2349_s1 + $0x98] sm:$0xff]   ;;  %v1742_v19 = vld [vmem:[%s2349_s1 + $0xa0] sm:$0xff]   ;;  %v1746_v23 = vld [vmem:[%s2349_s1 + $0xa8] sm:$0xff]  }
   0x9   :  { %1564 = vmatpush3.bf16.msra.mxu1 %v1730_v7  ;;  %1465 = vmatprep.subr.bf16.mxu0 %v1731_v8  ;;  %v1747_v24 = vld [vmem:[%s2349_s1 + $0x70] sm:$0xff]   ;;  %v1751_v28 = vld [vmem:[%s2349_s1 + $0x78] sm:$0xff]   ;;  %v1760_v35 = vld [vmem:[%s2350_s0 + $0xc] ss:$20 sps:$4 sm:$0xff]  }
   0xa   :  { %1565 = vmatprep.subr.bf16.mxu1 %v1732_v9  ;;  %v1748_v25 = vld [vmem:[%s2349_s1 + $0xf0] sm:$0xff]   ;;  %v1752_v29 = vld [vmem:[%s2349_s1 + $0xf8] sm:$0xff]   ;;  %v1761_v36 = vld [vmem:[%s2349_s1 + $0x100] sm:$0xff]   ;;  %957 = vmatprep.mubr.bf16.mxu1 %v1760_v35 }
   0xb   :  { %v1749_v26 = vld [vmem:[%s2349_s1 + $0x30] sm:$0xff]   ;;  %v1753_v30 = vld [vmem:[%s2349_s1 + $0x38] sm:$0xff]   ;;  %v1762_v37 = vld [vmem:[%s2350_s0 + $0x2c] ss:$20 sps:$4 sm:$0xff]  }
   0xc   :  { %1466 = vmatpush3.bf16.msra.mxu0 %v1733_v10  ;;  %v1750_v27 = vld [vmem:[%s2349_s1 + $0xb0] sm:$0xff]   ;;  %v1754_v31 = vld [vmem:[%s2349_s1 + $0xb8] sm:$0xff]   ;;  %v1780_v43 = vld [vmem:[%s2349_s1 + $0x108] sm:$0xff]  }
   0xd   :  { %1566 = vmatpush3.bf16.msra.mxu1 %v1734_v11  ;;  %1467 = vmatprep.subr.bf16.mxu0 %v1735_v12  ;;  %v1755_v32 = vld [vmem:[%s2350_s0] ss:$20 sps:$4 sm:$0xff]   ;;  %v1757_v33 = vld [vmem:[%s2350_s0 + $0x4] ss:$20 sps:$4 sm:$0xff]   ;;  %v1758_v34 = vld [vmem:[%s2350_s0 + $0x8] ss:$20 sps:$4 sm:$0xff]  }
   0xe   :  { %1567 = vmatprep.subr.bf16.mxu1 %v1736_v13  ;;  %812 = vmatprep.mubr.bf16.mxu0 %v1757_v33  ;;  %v1764_v38 = vld [vmem:[%s2350_s0 + $0x34] ss:$20 sps:$4 sm:$0xff]   ;;  %v1767_v40 = vld [vmem:[%s2350_s0 + $0x30] ss:$20 sps:$4 sm:$0xff]   ;;  %v1773_v45 = vld [vmem:[%s2350_s0 + $0x58] ss:$20 sps:$4 sm:$0xff]  }
   0xf   :  { %v1766_v39 = vld [vmem:[%s2350_s0 + $0x28] ss:$20 sps:$4 sm:$0xff]   ;;  %v1772_v44 = vld [vmem:[%s2350_s0 + $0x50] ss:$20 sps:$4 sm:$0xff]   ;;  %v1778_v48 = vld [vmem:[%s2350_s0 + $0x78] ss:$20 sps:$4 sm:$0xff]  }
  0x10   :  { %1468 = vmatpush3.bf16.msra.mxu0 %v1737_v14  ;;  %v1768_v41 = vld [vmem:[%s2350_s0 + $0x54] ss:$20 sps:$4 sm:$0xff]   ;;  %v1770_v42 = vld [vmem:[%s2350_s0 + $0x5c] ss:$20 sps:$4 sm:$0xff]   ;;  %v1776_v47 = vld [vmem:[%s2350_s0 + $0x84] ss:$20 sps:$4 sm:$0xff]  }
  0x11   :  { %1568 = vmatpush3.bf16.msra.mxu1 %v1738_v15  ;;  %1469 = vmatprep.subr.bf16.mxu0 %v1739_v16  ;;  %v1774_v46 = vld [vmem:[%s2350_s0 + $0x7c] ss:$20 sps:$4 sm:$0xff]   ;;  %v1779_v49 = vld [vmem:[%s2350_s0 + $0x80] ss:$20 sps:$4 sm:$0xff]   ;;  %v1781_v51 = vld [vmem:[%s2350_s0 + $0xa4] ss:$20 sps:$4 sm:$0xff]  }
  0x12   :  { %1569 = vmatprep.subr.bf16.mxu1 %v1740_v17  ;;  %v1805_v50 = vld [vmem:[%s2349_s1 + $0x110] sm:$0xff]   ;;  %v1783_v52 = vld [vmem:[%s2350_s0 + $0xac] ss:$20 sps:$4 sm:$0xff]   ;;  %v1786_v54 = vld [vmem:[%s2350_s0 + $0xa8] ss:$20 sps:$4 sm:$0xff]  }
  0x13   :  { %v1785_v53 = vld [vmem:[%s2350_s0 + $0xa0] ss:$20 sps:$4 sm:$0xff]   ;;  %v1824_v56 = vld [vmem:[%s2349_s1 + $0x118] sm:$0xff]   ;;  %v1792_v59 = vld [vmem:[%s2350_s0 + $0xd0] ss:$20 sps:$4 sm:$0xff]  }
  0x14   :  { %1470 = vmatpush3.bf16.msra.mxu0 %v1741_v18  ;;  %v1787_v55 = vld [vmem:[%s2350_s0 + $0xcc] ss:$20 sps:$4 sm:$0xff]   ;;  %v1789_v57 = vld [vmem:[%s2350_s0 + $0xd4] ss:$20 sps:$4 sm:$0xff]   ;;  %v1795_v61 = vld [vmem:[%s2350_s0 + $0xfc] ss:$20 sps:$4 sm:$0xff]  }
  0x15   :  { %1570 = vmatpush3.bf16.msra.mxu1 %v1742_v19  ;;  %1471 = vmatprep.subr.bf16.mxu0 %v1743_v20  ;;  %v1791_v58 = vld [vmem:[%s2350_s0 + $0xc8] ss:$20 sps:$4 sm:$0xff]   ;;  %v1797_v62 = vld [vmem:[%s2350_s0 + $0xf0] ss:$20 sps:$4 sm:$0xff]   ;;  %v1798_v63 = vld [vmem:[%s2350_s0 + $0xf8] ss:$20 sps:$4 sm:$0xff]  }
  0x16   :  { %1571 = vmatprep.subr.bf16.mxu1 %v1744_v21  ;;  %v1793_v60 = vld [vmem:[%s2350_s0 + $0xf4] ss:$20 sps:$4 sm:$0xff]   ;;  %v1799_v0 = vld [vmem:[%s2350_s0 + $0x11c] ss:$20 sps:$4 sm:$0xff]   ;;  %v1801_v1 = vld [vmem:[%s2350_s0 + $0x124] ss:$20 sps:$4 sm:$0xff]  }
  0x17   :  { %v1803_v2 = vld [vmem:[%s2350_s0 + $0x118] ss:$20 sps:$4 sm:$0xff]   ;;  %v1804_v3 = vld [vmem:[%s2350_s0 + $0x120] ss:$20 sps:$4 sm:$0xff]   ;;  %v1811_v7 = vld [vmem:[%s2350_s0 + $0x148] ss:$20 sps:$4 sm:$0xff]  }
  0x18   :  { %1472 = vmatpush3.bf16.msra.mxu0 %v1745_v22  ;;  %v1806_v4 = vld [vmem:[%s2350_s0 + $0x144] ss:$20 sps:$4 sm:$0xff]   ;;  %v1808_v5 = vld [vmem:[%s2350_s0 + $0x14c] ss:$20 sps:$4 sm:$0xff]   ;;  %v1814_v9 = vld [vmem:[%s2350_s0 + $0x174] ss:$20 sps:$4 sm:$0xff]  }
  0x19   :  { %1572 = vmatpush3.bf16.msra.mxu1 %v1746_v23  ;;  %1473 = vmatprep.subr.bf16.mxu0 %v1747_v24  ;;  %v1810_v6 = vld [vmem:[%s2350_s0 + $0x140] ss:$20 sps:$4 sm:$0xff]   ;;  %v1816_v10 = vld [vmem:[%s2350_s0 + $0x168] ss:$20 sps:$4 sm:$0xff]   ;;  %v1817_v11 = vld [vmem:[%s2350_s0 + $0x170] ss:$20 sps:$4 sm:$0xff]  }
  0x1a   :  { %1573 = vmatprep.subr.bf16.mxu1 %v1748_v25  ;;  %v1812_v8 = vld [vmem:[%s2350_s0 + $0x16c] ss:$20 sps:$4 sm:$0xff]   ;;  %v1818_v12 = vld [vmem:[%s2350_s0 + $0x194] ss:$20 sps:$4 sm:$0xff]   ;;  %v1820_v13 = vld [vmem:[%s2350_s0 + $0x19c] ss:$20 sps:$4 sm:$0xff]  }
  0x1b   :  { %v1822_v14 = vld [vmem:[%s2350_s0 + $0x190] ss:$20 sps:$4 sm:$0xff]   ;;  %v1823_v15 = vld [vmem:[%s2350_s0 + $0x198] ss:$20 sps:$4 sm:$0xff]   ;;  %v1830_v19 = vld [vmem:[%s2350_s0 + $0x1c0] ss:$20 sps:$4 sm:$0xff]  }
  0x1c   :  { %1474 = vmatpush3.bf16.msra.mxu0 %v1749_v26  ;;  %v1825_v16 = vld [vmem:[%s2350_s0 + $0x1bc] ss:$20 sps:$4 sm:$0xff]   ;;  %v1827_v17 = vld [vmem:[%s2350_s0 + $0x1c4] ss:$20 sps:$4 sm:$0xff]   ;;  %v1833_v21 = vld [vmem:[%s2350_s0 + $0x1ec] ss:$20 sps:$4 sm:$0xff]  }
  0x1d   :  { %1574 = vmatpush3.bf16.msra.mxu1 %v1750_v27  ;;  %1475 = vmatprep.subr.bf16.mxu0 %v1751_v28  ;;  %v1829_v18 = vld [vmem:[%s2350_s0 + $0x1b8] ss:$20 sps:$4 sm:$0xff]   ;;  %v1835_v22 = vld [vmem:[%s2350_s0 + $0x1e0] ss:$20 sps:$4 sm:$0xff]   ;;  %v1836_v23 = vld [vmem:[%s2350_s0 + $0x1e8] ss:$20 sps:$4 sm:$0xff]  }
  0x1e   :  { %1575 = vmatprep.subr.bf16.mxu1 %v1752_v29  ;;  %v1831_v20 = vld [vmem:[%s2350_s0 + $0x1e4] ss:$20 sps:$4 sm:$0xff]   ;;  %v1837_v24 = vld [vmem:[%s2350_s0 + $0x20c] ss:$20 sps:$4 sm:$0xff]   ;;  %v1839_v25 = vld [vmem:[%s2350_s0 + $0x214] ss:$20 sps:$4 sm:$0xff]  }
  0x1f   :  { %v1841_v26 = vld [vmem:[%s2350_s0 + $0x208] ss:$20 sps:$4 sm:$0xff]   ;;  %v1842_v27 = vld [vmem:[%s2350_s0 + $0x210] ss:$20 sps:$4 sm:$0xff]   ;;  %v1848_v33 = vld [vmem:[%s2350_s0 + $0x1a0] ss:$20 sps:$4 sm:$0xff]  }
  0x20   :  { %1476 = vmatpush3.bf16.msra.mxu0 %v1753_v30  ;;  %v1843_v28 = vld [vmem:[%s2350_s0 + $0x10] ss:$20 sps:$4 sm:$0xff]   ;;  %v1845_v30 = vld [vmem:[%s2350_s0 + $0x38] ss:$20 sps:$4 sm:$0xff]   ;;  %v1850_v35 = vld [vmem:[%s2350_s0 + $0x1c8] ss:$20 sps:$4 sm:$0xff]  }
  0x21   :  { %1576 = vmatpush3.bf16.msra.mxu1 %v1754_v31  ;;  %1679 = vmatprep.subr.bf16.mxu0 %v1761_v36  ;;  %v1844_v29 = vld [vmem:[%s2350_s0 + $0x150] ss:$20 sps:$4 sm:$0xff]   ;;  %v1846_v31 = vld [vmem:[%s2350_s0 + $0x178] ss:$20 sps:$4 sm:$0xff]  }
  0x22   :  { %1715 = vmatprep.subr.bf16.mxu1 %v1761_v36 }
  0x23   :  { %813 = vmatmul.mubr.bf16.vlgmr.msra.gmra.mrb[0].mxu0 %v1755_v32  ;;  %v1847_v32 = vld [vmem:[%s2350_s0 + $0x60] ss:$20 sps:$4 sm:$0xff]  }
  0x24   :  { %958 = vmatmul.mubr.bf16.vlgmr.msra.gmra.mrb[0].mxu1 %v1758_v34  ;;  %1680 = vmatpush3.bf16.msra.mxu0 %v1761_v36  ;;  %v1849_v34 = vld [vmem:[%s2350_s0 + $0x88] ss:$20 sps:$4 sm:$0xff]  }
  0x25   :  { %820 = vmatprep.mubr.bf16.mxu0 %v1762_v37  ;;  %965 = vmatprep.mubr.bf16.mxu1 %v1764_v38  ;;  %v1852_v37 = vld [vmem:[%s2350_s0 + $0x1f0] ss:$20 sps:$4 sm:$0xff]   ;;  %v1853_v38 = vld [vmem:[%s2350_s0 + $0xd8] ss:$20 sps:$4 sm:$0xff]  }
  0x26   :  { %1719 = vmatpush3.bf16.msra.mxu1 %v1761_v36  ;;  %1681 = vmatprep.subr.bf16.mxu0 %v1780_v43  ;;  %v1851_v36 = vld [vmem:[%s2350_s0 + $0xb0] ss:$20 sps:$4 sm:$0xff]  }
  0x27   :  { %1716 = vmatprep.subr.bf16.mxu1 %v1780_v43 }
  0x28   :  { %1682 = vmatpush3.bf16.msra.mxu0 %v1780_v43 }
  0x29   :  { %1683 = vmatprep.subr.bf16.mxu0 %v1805_v50 }
  0x2a   :  { %1720 = vmatpush3.bf16.msra.mxu1 %v1780_v43 }
  0x2b   :  { %821 = vmatmul.mubr.bf16.gmra.mrb[4].mxu0 %v1766_v39  ;;  %1717 = vmatprep.subr.bf16.mxu1 %v1805_v50  ;;  %v1854_v39 = vld [vmem:[%s2350_s0 + $0x218] ss:$20 sps:$4 sm:$0xff]  }
  0x2c   :  { %966 = vmatmul.mubr.bf16.gmra.mrb[4].mxu1 %v1767_v40  ;;  %828 = vmatprep.mubr.bf16.mxu0 %v1768_v41  ;;  %v1855_v40 = vld [vmem:[%s2350_s0 + $0x100] ss:$20 sps:$4 sm:$0xff]   ;;  %v1856_v41 = vld [vmem:[%s2350_s0 + $0x128] ss:$20 sps:$4 sm:$0xff]  }
  0x2d   :  { %973 = vmatprep.mubr.bf16.mxu1 %v1770_v42  ;;  %1684 = vmatpush3.bf16.msra.mxu0 %v1805_v50 }
  0x2e   :  { %1721 = vmatpush3.bf16.msra.mxu1 %v1805_v50  ;;  %1685 = vmatprep.subr.bf16.mxu0 %v1824_v56 }
  0x2f   :  { %1718 = vmatprep.subr.bf16.mxu1 %v1824_v56 }
  0x31   :  { %1686 = vmatpush3.bf16.msra.mxu0 %v1824_v56 }
  0x32   :  { %1722 = vmatpush3.bf16.msra.mxu1 %v1824_v56 }
  0x33   :  { %829 = vmatmul.mubr.bf16.gmra.mrb[8].mxu0 %v1772_v44 }
  0x34   :  { %974 = vmatmul.mubr.bf16.gmra.mrb[8].mxu1 %v1773_v45  ;;  %836 = vmatprep.mubr.bf16.mxu0 %v1774_v46 }
  0x35   :  { %981 = vmatprep.mubr.bf16.mxu1 %v1776_v47 }
  0x3b   :  { %837 = vmatmul.mubr.bf16.gmra.mrb[12].mxu0 %v1778_v48 }
  0x3c   :  { %982 = vmatmul.mubr.bf16.gmra.mrb[12].mxu1 %v1779_v49  ;;  %844 = vmatprep.mubr.bf16.mxu0 %v1781_v51 }
  0x3d   :  { %989 = vmatprep.mubr.bf16.mxu1 %v1783_v52 }
  0x43   :  { %845 = vmatmul.mubr.bf16.gmra.mrb[16].mxu0 %v1785_v53 }
  0x44   :  { %990 = vmatmul.mubr.bf16.gmra.mrb[16].mxu1 %v1786_v54  ;;  %852 = vmatprep.mubr.bf16.mxu0 %v1787_v55 }
  0x45   :  { %997 = vmatprep.mubr.bf16.mxu1 %v1789_v57 }
  0x4b   :  { %853 = vmatmul.mubr.bf16.gmra.mrb[20].mxu0 %v1791_v58 }
  0x4c   :  { %998 = vmatmul.mubr.bf16.gmra.mrb[20].mxu1 %v1792_v59  ;;  %860 = vmatprep.mubr.bf16.mxu0 %v1793_v60 }
  0x4d   :  { %1005 = vmatprep.mubr.bf16.mxu1 %v1795_v61 }
  0x53   :  { %861 = vmatmul.mubr.bf16.gmra.mrb[24].mxu0 %v1797_v62 }
  0x54   :  { %1006 = vmatmul.mubr.bf16.gmra.mrb[24].mxu1 %v1798_v63  ;;  %868 = vmatprep.mubr.bf16.mxu0 %v1799_v0 }
  0x55   :  { %1013 = vmatprep.mubr.bf16.mxu1 %v1801_v1 }
  0x5b   :  { %869 = vmatmul.mubr.bf16.gmra.mrb[28].mxu0 %v1803_v2 }
  0x5c   :  { %1014 = vmatmul.mubr.bf16.gmra.mrb[28].mxu1 %v1804_v3  ;;  %876 = vmatprep.mubr.bf16.mxu0 %v1806_v4 }
  0x5d   :  { %1021 = vmatprep.mubr.bf16.mxu1 %v1808_v5 }
  0x63   :  { %877 = vmatmul.mubr.bf16.gmra.mrb[32].mxu0 %v1810_v6 }
  0x64   :  { %1022 = vmatmul.mubr.bf16.gmra.mrb[32].mxu1 %v1811_v7  ;;  %884 = vmatprep.mubr.bf16.mxu0 %v1812_v8 }
  0x65   :  { %1029 = vmatprep.mubr.bf16.mxu1 %v1814_v9 }
  0x6b   :  { %885 = vmatmul.mubr.bf16.gmra.mrb[36].mxu0 %v1816_v10 }
  0x6c   :  { %1030 = vmatmul.mubr.bf16.gmra.mrb[36].mxu1 %v1817_v11  ;;  %892 = vmatprep.mubr.bf16.mxu0 %v1818_v12 }
  0x6d   :  { %1037 = vmatprep.mubr.bf16.mxu1 %v1820_v13 }
  0x73   :  { %893 = vmatmul.mubr.bf16.gmra.mrb[40].mxu0 %v1822_v14 }
  0x74   :  { %1038 = vmatmul.mubr.bf16.gmra.mrb[40].mxu1 %v1823_v15  ;;  %900 = vmatprep.mubr.bf16.mxu0 %v1825_v16 }
  0x75   :  { %1045 = vmatprep.mubr.bf16.mxu1 %v1827_v17 }
  0x7b   :  { %901 = vmatmul.mubr.bf16.gmra.mrb[44].mxu0 %v1829_v18 }
  0x7c   :  { %1046 = vmatmul.mubr.bf16.gmra.mrb[44].mxu1 %v1830_v19  ;;  %908 = vmatprep.mubr.bf16.mxu0 %v1831_v20 }
  0x7d   :  { %1053 = vmatprep.mubr.bf16.mxu1 %v1833_v21 }
  0x83   :  { %909 = vmatmul.mubr.bf16.gmra.mrb[48].mxu0 %v1835_v22 }
  0x84   :  { %1054 = vmatmul.mubr.bf16.gmra.mrb[48].mxu1 %v1836_v23  ;;  %916 = vmatprep.mubr.bf16.mxu0 %v1837_v24 }
  0x85   :  { %1061 = vmatprep.mubr.bf16.mxu1 %v1839_v25 }
  0x8b   :  { %917 = vmatmul.mubr.bf16.gmra.mrb[52].mxu0 %v1841_v26 }
  0x8c   :  { %1062 = vmatmul.mubr.bf16.gmra.mrb[52].mxu1 %v1842_v27  ;;  %1687 = vmatprep.mubr.msk.bf16.mxu0 %vm737_vm0, %v1843_v28 }
  0x8d   :  { %1703 = vmatprep.mubr.msk.bf16.mxu1 %vm737_vm0, %v1844_v29 }
  0x93   :  { %1688 = vmatmul.mubr.msk.bf16.vlgmr.msra.gmra.mrb[56].mxu0 %vm737_vm0, %v1845_v30 }
  0x94   :  { %1704 = vmatmul.mubr.msk.bf16.vlgmr.msra.gmra.mrb[56].mxu1 %vm737_vm0, %v1846_v31  ;;  %1691 = vmatprep.mubr.msk.bf16.mxu0 %vm737_vm0, %v1847_v32 }
  0x95   :  { %1707 = vmatprep.mubr.msk.bf16.mxu1 %vm737_vm0, %v1848_v33 }
  0x9b   :  { %1692 = vmatmul.mubr.msk.bf16.gmra.mrb[60].mxu0 %vm737_vm0, %v1849_v34 }
  0x9c   :  { %1708 = vmatmul.mubr.msk.bf16.gmra.mrb[60].mxu1 %vm737_vm0, %v1850_v35  ;;  %1695 = vmatprep.mubr.msk.bf16.mxu0 %vm737_vm0, %v1851_v36 }
  0x9d   :  { %1711 = vmatprep.mubr.msk.bf16.mxu1 %vm737_vm0, %v1852_v37 }
  0xa3   :  { %1696 = vmatmul.mubr.msk.bf16.gmra.mrb[64].mxu0 %vm737_vm0, %v1853_v38 }
  0xa4   :  { %1712 = vmatmul.mubr.msk.bf16.gmra.mrb[64].mxu1 %vm737_vm0, %v1854_v39  ;;  %1699 = vmatprep.mubr.msk.bf16.mxu0 %vm737_vm0, %v1855_v40 }
  0xab   :  { %1700 = vmatmul.mubr.msk.bf16.gmra.mrb[68].mxu0 %vm737_vm0, %v1856_v41 }
  0xf6   :  { %v1477_v42 = vpop.f32.mrb[0].mxu0 }
  0xf7   :  { %v1577_v43 = vpop.f32.mrb[0].mxu1  ;;  %v1478_v44 = vpop.f32.mrb[1].mxu0 }
  0xf8   :  { %v1479_v45 = vadd.f32 %v1478_v44, %v1477_v42  ;;  %v1578_v46 = vpop.f32.mrb[1].mxu1  ;;  %v1480_v47 = vpop.f32.mrb[2].mxu0 }
  0xf9   :  { %v1579_v48 = vadd.f32 %v1578_v46, %v1577_v43  ;;  %v1580_v49 = vpop.f32.mrb[2].mxu1  ;;  %v1481_v50 = vpop.f32.mrb[3].mxu0 }
  0xfa   :  { %v1482_v51 = vadd.f32 %v1481_v50, %v1480_v47  ;;  %v1581_v52 = vpop.f32.mrb[3].mxu1 }
  0xfb   :  { %v1582_v53 = vadd.f32 %v1581_v52, %v1580_v49  ;;  %v2209_v54 = vadd.f32 %v1579_v48, %v1479_v45 }
  0xfd   :  { %v2211_v55 = vadd.f32 %v1582_v53, %v1482_v51 }
  0xfe   :  { %v1483_v56 = vpop.f32.mrb[4].mxu0 }
  0xff   :  { %v1583_v57 = vpop.f32.mrb[4].mxu1  ;;  %v1484_v58 = vpop.f32.mrb[5].mxu0 }
 0x100   :  { %v1485_v59 = vadd.f32 %v1484_v58, %v1483_v56  ;;  %v1584_v60 = vpop.f32.mrb[5].mxu1  ;;  %v1486_v61 = vpop.f32.mrb[6].mxu0 }
 0x101   :  { %v1585_v62 = vadd.f32 %v1584_v60, %v1583_v57  ;;  %v1586_v63 = vpop.f32.mrb[6].mxu1  ;;  %v1487_v0 = vpop.f32.mrb[7].mxu0 }
 0x102   :  { %v1488_v1 = vadd.f32 %v1487_v0, %v1486_v61  ;;  %v1587_v2 = vpop.f32.mrb[7].mxu1 }
 0x103   :  { %v1588_v3 = vadd.f32 %v1587_v2, %v1586_v63  ;;  %v2213_v4 = vadd.f32 %v1585_v62, %v1485_v59 }
 0x105   :  { %v2215_v5 = vadd.f32 %v1588_v3, %v1488_v1 }
 0x106   :  { %v1489_v6 = vpop.f32.mrb[8].mxu0 }
 0x107   :  { %v1589_v7 = vpop.f32.mrb[8].mxu1  ;;  %v1490_v8 = vpop.f32.mrb[9].mxu0 }
 0x108   :  { %v1491_v9 = vadd.f32 %v1490_v8, %v1489_v6  ;;  %v1590_v10 = vpop.f32.mrb[9].mxu1  ;;  %v1492_v11 = vpop.f32.mrb[10].mxu0 }
 0x109   :  { %v1591_v12 = vadd.f32 %v1590_v10, %v1589_v7  ;;  %v1592_v13 = vpop.f32.mrb[10].mxu1  ;;  %v1493_v14 = vpop.f32.mrb[11].mxu0 }
 0x10a   :  { %v1494_v15 = vadd.f32 %v1493_v14, %v1492_v11  ;;  %v1593_v16 = vpop.f32.mrb[11].mxu1 }
 0x10b   :  { %v1594_v17 = vadd.f32 %v1593_v16, %v1592_v13  ;;  %v2217_v18 = vadd.f32 %v1591_v12, %v1491_v9 }
 0x10d   :  { %v2219_v19 = vadd.f32 %v1594_v17, %v1494_v15 }
 0x10e   :  { %v1495_v20 = vpop.f32.mrb[12].mxu0 }
 0x10f   :  { %v1595_v21 = vpop.f32.mrb[12].mxu1  ;;  %v1496_v22 = vpop.f32.mrb[13].mxu0 }
 0x110   :  { %v1497_v23 = vadd.f32 %v1496_v22, %v1495_v20  ;;  %v1596_v24 = vpop.f32.mrb[13].mxu1  ;;  %v1498_v25 = vpop.f32.mrb[14].mxu0 }
 0x111   :  { %v1597_v26 = vadd.f32 %v1596_v24, %v1595_v21  ;;  %v1598_v27 = vpop.f32.mrb[14].mxu1  ;;  %v1499_v28 = vpop.f32.mrb[15].mxu0 }
 0x112   :  { %v1500_v29 = vadd.f32 %v1499_v28, %v1498_v25  ;;  %v1599_v30 = vpop.f32.mrb[15].mxu1 }
 0x113   :  { %v1600_v31 = vadd.f32 %v1599_v30, %v1598_v27  ;;  %v2221_v32 = vadd.f32 %v1597_v26, %v1497_v23 }
 0x115   :  { %v2223_v33 = vadd.f32 %v1600_v31, %v1500_v29 }
 0x116   :  { %v1501_v34 = vpop.f32.mrb[16].mxu0 }
 0x117   :  { %v1601_v35 = vpop.f32.mrb[16].mxu1  ;;  %v1502_v36 = vpop.f32.mrb[17].mxu0 }
 0x118   :  { %v1503_v37 = vadd.f32 %v1502_v36, %v1501_v34  ;;  %v1602_v38 = vpop.f32.mrb[17].mxu1  ;;  %v1504_v39 = vpop.f32.mrb[18].mxu0 }
 0x119   :  { %v1603_v40 = vadd.f32 %v1602_v38, %v1601_v35  ;;  %v1604_v41 = vpop.f32.mrb[18].mxu1  ;;  %v1505_v42 = vpop.f32.mrb[19].mxu0 }
 0x11a   :  { %v1506_v43 = vadd.f32 %v1505_v42, %v1504_v39  ;;  %v1605_v44 = vpop.f32.mrb[19].mxu1 }
 0x11b   :  { %v1606_v45 = vadd.f32 %v1605_v44, %v1604_v41  ;;  %v2225_v46 = vadd.f32 %v1603_v40, %v1503_v37 }
 0x11d   :  { %v2227_v47 = vadd.f32 %v1606_v45, %v1506_v43 }
 0x11e   :  { %v1507_v48 = vpop.f32.mrb[20].mxu0 }
 0x11f   :  { %v1607_v49 = vpop.f32.mrb[20].mxu1  ;;  %v1508_v50 = vpop.f32.mrb[21].mxu0 }
 0x120   :  { %v1509_v51 = vadd.f32 %v1508_v50, %v1507_v48  ;;  %v1608_v52 = vpop.f32.mrb[21].mxu1  ;;  %v1510_v53 = vpop.f32.mrb[22].mxu0 }
 0x121   :  { %v1609_v56 = vadd.f32 %v1608_v52, %v1607_v49  ;;  %v1610_v57 = vpop.f32.mrb[22].mxu1  ;;  %v1511_v58 = vpop.f32.mrb[23].mxu0 }
 0x122   :  { %v1512_v59 = vadd.f32 %v1511_v58, %v1510_v53  ;;  %v1611_v60 = vpop.f32.mrb[23].mxu1 }
 0x123   :  { %v1612_v61 = vadd.f32 %v1611_v60, %v1610_v57  ;;  %v2229_v62 = vadd.f32 %v1609_v56, %v1509_v51 }
 0x125   :  { %v2231_v63 = vadd.f32 %v1612_v61, %v1512_v59 }
 0x126   :  { %v1513_v0 = vpop.f32.mrb[24].mxu0 }
 0x127   :  { %v1613_v1 = vpop.f32.mrb[24].mxu1  ;;  %v1514_v2 = vpop.f32.mrb[25].mxu0 }
 0x128   :  { %v1515_v3 = vadd.f32 %v1514_v2, %v1513_v0  ;;  %v1614_v6 = vpop.f32.mrb[25].mxu1  ;;  %v1516_v7 = vpop.f32.mrb[26].mxu0 }
 0x129   :  { %v1615_v8 = vadd.f32 %v1614_v6, %v1613_v1  ;;  %v1616_v9 = vpop.f32.mrb[26].mxu1  ;;  %v1517_v10 = vpop.f32.mrb[27].mxu0 }
 0x12a   :  { %v1518_v11 = vadd.f32 %v1517_v10, %v1516_v7  ;;  %v1617_v12 = vpop.f32.mrb[27].mxu1 }
 0x12b   :  { %v1618_v13 = vadd.f32 %v1617_v12, %v1616_v9  ;;  %v2233_v14 = vadd.f32 %v1615_v8, %v1515_v3 }
 0x12d   :  { %v2235_v15 = vadd.f32 %v1618_v13, %v1518_v11 }
 0x12e   :  { %v1519_v16 = vpop.f32.mrb[28].mxu0 }
 0x12f   :  { %v1619_v17 = vpop.f32.mrb[28].mxu1  ;;  %v1520_v20 = vpop.f32.mrb[29].mxu0 }
 0x130   :  { %v1521_v21 = vadd.f32 %v1520_v20, %v1519_v16  ;;  %v1620_v22 = vpop.f32.mrb[29].mxu1  ;;  %v1522_v23 = vpop.f32.mrb[30].mxu0 }
 0x131   :  { %v1621_v24 = vadd.f32 %v1620_v22, %v1619_v17  ;;  %v1622_v25 = vpop.f32.mrb[30].mxu1  ;;  %v1523_v26 = vpop.f32.mrb[31].mxu0 }
 0x132   :  { %v1524_v27 = vadd.f32 %v1523_v26, %v1522_v23  ;;  %v1623_v28 = vpop.f32.mrb[31].mxu1 }
 0x133   :  { %v1624_v29 = vadd.f32 %v1623_v28, %v1622_v25  ;;  %v2237_v30 = vadd.f32 %v1621_v24, %v1521_v21 }
 0x135   :  { %v2239_v31 = vadd.f32 %v1624_v29, %v1524_v27 }
 0x136   :  { %v1525_v34 = vpop.f32.mrb[32].mxu0 }
 0x137   :  { %v1625_v35 = vpop.f32.mrb[32].mxu1  ;;  %v1526_v36 = vpop.f32.mrb[33].mxu0 }
 0x138   :  { %v1527_v37 = vadd.f32 %v1526_v36, %v1525_v34  ;;  %v1626_v38 = vpop.f32.mrb[33].mxu1  ;;  %v1528_v39 = vpop.f32.mrb[34].mxu0 }
 0x139   :  { %v1627_v40 = vadd.f32 %v1626_v38, %v1625_v35  ;;  %v1628_v41 = vpop.f32.mrb[34].mxu1  ;;  %v1529_v42 = vpop.f32.mrb[35].mxu0 }
 0x13a   :  { %v1530_v43 = vadd.f32 %v1529_v42, %v1528_v39  ;;  %v1629_v44 = vpop.f32.mrb[35].mxu1 }
 0x13b   :  { %v1630_v45 = vadd.f32 %v1629_v44, %v1628_v41  ;;  %v2241_v48 = vadd.f32 %v1627_v40, %v1527_v37 }
 0x13d   :  { %v2243_v49 = vadd.f32 %v1630_v45, %v1530_v43 }
 0x13e   :  { %v1531_v50 = vpop.f32.mrb[36].mxu0 }
 0x13f   :  { %v1631_v51 = vpop.f32.mrb[36].mxu1  ;;  %v1532_v52 = vpop.f32.mrb[37].mxu0 }
 0x140   :  { %v1533_v53 = vadd.f32 %v1532_v52, %v1531_v50  ;;  %v1632_v56 = vpop.f32.mrb[37].mxu1  ;;  %v1534_v57 = vpop.f32.mrb[38].mxu0 }
 0x141   :  { %v1633_v58 = vadd.f32 %v1632_v56, %v1631_v51  ;;  %v1634_v59 = vpop.f32.mrb[38].mxu1  ;;  %v1535_v60 = vpop.f32.mrb[39].mxu0 }
 0x142   :  { %v1536_v61 = vadd.f32 %v1535_v60, %v1534_v57  ;;  %v1635_v0 = vpop.f32.mrb[39].mxu1 }
 0x143   :  { %v1636_v1 = vadd.f32 %v1635_v0, %v1634_v59  ;;  %v1032_v2 = vadd.f32 %v1633_v58, %v1533_v53 }
 0x145   :  { %v2245_v3 = vadd.f32 %v1636_v1, %v1536_v61 }
 0x146   :  { %v1537_v6 = vpop.f32.mrb[40].mxu0 }
 0x147   :  { %v1637_v7 = vpop.f32.mrb[40].mxu1  ;;  %v1538_v8 = vpop.f32.mrb[41].mxu0 }
 0x148   :  { %v1539_v9 = vadd.f32 %v1538_v8, %v1537_v6  ;;  %v1638_v10 = vpop.f32.mrb[41].mxu1  ;;  %v1540_v11 = vpop.f32.mrb[42].mxu0 }
 0x149   :  { %v1639_v12 = vadd.f32 %v1638_v10, %v1637_v7  ;;  %v1640_v13 = vpop.f32.mrb[42].mxu1  ;;  %v1541_v16 = vpop.f32.mrb[43].mxu0 }
 0x14a   :  { %v1542_v17 = vadd.f32 %v1541_v16, %v1540_v11  ;;  %v1641_v20 = vpop.f32.mrb[43].mxu1 }
 0x14b   :  { %v1642_v21 = vadd.f32 %v1641_v20, %v1640_v13  ;;  %v2247_v22 = vadd.f32 %v1639_v12, %v1539_v9 }
 0x14d   :  { %v2249_v23 = vadd.f32 %v1642_v21, %v1542_v17 }
 0x14e   :  { %v1543_v24 = vpop.f32.mrb[44].mxu0 }
 0x14f   :  { %v1643_v25 = vpop.f32.mrb[44].mxu1  ;;  %v1544_v26 = vpop.f32.mrb[45].mxu0 }
 0x150   :  { %v1545_v27 = vadd.f32 %v1544_v26, %v1543_v24  ;;  %v1644_v28 = vpop.f32.mrb[45].mxu1  ;;  %v1546_v29 = vpop.f32.mrb[46].mxu0 }
 0x151   :  { %v1645_v34 = vadd.f32 %v1644_v28, %v1643_v25  ;;  %v1646_v35 = vpop.f32.mrb[46].mxu1  ;;  %v1547_v36 = vpop.f32.mrb[47].mxu0 }
 0x152   :  { %v1548_v37 = vadd.f32 %v1547_v36, %v1546_v29  ;;  %v1647_v38 = vpop.f32.mrb[47].mxu1 }
 0x153   :  { %v1648_v39 = vadd.f32 %v1647_v38, %v1646_v35  ;;  %v1048_v40 = vadd.f32 %v1645_v34, %v1545_v27 }
 0x155   :  { %v1051_v41 = vadd.f32 %v1648_v39, %v1548_v37 }
 0x156   :  { %v1549_v42 = vpop.f32.mrb[48].mxu0 }
 0x157   :  { %v1649_v43 = vpop.f32.mrb[48].mxu1  ;;  %v1550_v44 = vpop.f32.mrb[49].mxu0 }
 0x158   :  { %v1551_v45 = vadd.f32 %v1550_v44, %v1549_v42  ;;  %v1650_v50 = vpop.f32.mrb[49].mxu1  ;;  %v1552_v51 = vpop.f32.mrb[50].mxu0 }
 0x159   :  { %v1651_v52 = vadd.f32 %v1650_v50, %v1649_v43  ;;  %v1652_v53 = vpop.f32.mrb[50].mxu1  ;;  %v1553_v56 = vpop.f32.mrb[51].mxu0 }
 0x15a   :  { %v1554_v57 = vadd.f32 %v1553_v56, %v1552_v51  ;;  %v1653_v58 = vpop.f32.mrb[51].mxu1 }
 0x15b   :  { %v1654_v59 = vadd.f32 %v1653_v58, %v1652_v53  ;;  %v1056_v60 = vadd.f32 %v1651_v52, %v1551_v45 }
 0x15d   :  { %v2251_v61 = vadd.f32 %v1654_v59, %v1554_v57 }
 0x15e   :  { %v1555_v0 = vpop.f32.mrb[52].mxu0 }
 0x15f   :  { %v1655_v1 = vpop.f32.mrb[52].mxu1  ;;  %v1556_v6 = vpop.f32.mrb[53].mxu0 }
 0x160   :  { %v1557_v7 = vadd.f32 %v1556_v6, %v1555_v0  ;;  %v1656_v8 = vpop.f32.mrb[53].mxu1  ;;  %v1558_v9 = vpop.f32.mrb[54].mxu0 }
 0x161   :  { %v1657_v10 = vadd.f32 %v1656_v8, %v1655_v1  ;;  %v1658_v11 = vpop.f32.mrb[54].mxu1  ;;  %v1559_v12 = vpop.f32.mrb[55].mxu0 }
 0x162   :  { %v1560_v13 = vadd.f32 %v1559_v12, %v1558_v9  ;;  %v1659_v16 = vpop.f32.mrb[55].mxu1 }
 0x163   :  { %v1660_v17 = vadd.f32 %v1659_v16, %v1658_v11  ;;  %v1064_v20 = vadd.f32 %v1657_v10, %v1557_v7 }
 0x165   :  { %v1067_v21 = vadd.f32 %v1660_v17, %v1560_v13 }
 0x166   :  { %v1689_v24 = vpop.f32.mrb[56].mxu0 }
 0x167   :  { %v2254_v25 = vadd.f32 %v1689_v24, %v2213_v4  ;;  %v1705_v26 = vpop.f32.mrb[56].mxu1  ;;  %v1104_v27 = vpop.f32.mrb[57].mxu0 }
 0x168   :  { %v1177_v28 = vadd.f32 %v1705_v26, %v1032_v2  ;;  %v1105_v29 = vadd.f32 %v1104_v27, %v2209_v54  ;;  %v1168_v34 = vpop.f32.mrb[57].mxu1  ;;  %v1690_v35 = vpop.f32.mrb[58].mxu0 }
 0x169   :  { %v1169_v36 = vadd.f32 %v1168_v34, %v2241_v48  ;;  %v1116_v37 = vadd.f32 %v1690_v35, %v2215_v5  ;;  %v1706_v38 = vpop.f32.mrb[58].mxu1  ;;  %v1107_v39 = vpop.f32.mrb[59].mxu0  ;;  %v1229_v35 = vsel %vm737_vm0, %v2254_v25, -inf }
 0x16a   :  { %v1180_v42 = vadd.f32 %v1706_v38, %v2245_v3  ;;  %v1108_v43 = vadd.f32 %v1107_v39, %v2211_v55  ;;  %v1171_v44 = vpop.f32.mrb[59].mxu1  ;;  %v1446_v38 = vld [vmem:[%s2351_s2] ss:$0 sm:$0xff] }
 0x16b   :  { %v1172_v4 = vadd.f32 %v1171_v44, %v2243_v49 }
 0x16c   :  { %v1222_v9 = vsel %vm737_vm0, %v1108_v43, -inf }
 0x16e   :  { %v1693_v45 = vpop.f32.mrb[60].mxu0 }
 0x16f   :  { %v1129_v2 = vadd.f32 %v1693_v45, %v2221_v32  ;;  %v1709_v50 = vpop.f32.mrb[60].mxu1  ;;  %v1120_v54 = vpop.f32.mrb[61].mxu0  ;;  %v1215_v32 = vsel %vm737_vm0, %v1105_v29, -inf }
 0x170   :  { %v2263_v51 = vadd.f32 %v1709_v50, %v1048_v40  ;;  %v1121_v48 = vadd.f32 %v1120_v54, %v2217_v18  ;;  %v1184_v52 = vpop.f32.mrb[61].mxu1  ;;  %v1694_v5 = vpop.f32.mrb[62].mxu0 }
 0x171   :  { %v2267_v53 = vadd.f32 %v1184_v52, %v2247_v22  ;;  %v1132_v3 = vadd.f32 %v1694_v5, %v2223_v33  ;;  %v1710_v55 = vpop.f32.mrb[62].mxu1  ;;  %v1123_v56 = vpop.f32.mrb[63].mxu0  ;;  %v1236_v33 = vsel %vm737_vm0, %v1116_v37, -inf  ;;  %v1246_v37 = vsel %vm737_vm0, %v1177_v28, -inf }
 0x172   :  { %v1196_v57 = vadd.f32 %v1710_v55, %v1051_v41  ;;  %v1124_v49 = vadd.f32 %v1123_v56, %v2219_v19  ;;  %v1187_v58 = vpop.f32.mrb[63].mxu1  ;;  %v1257_v25 = vsel %vm737_vm0, %v1129_v2, -inf }
 0x173   :  { %v1216_v40 = vsel %vm737_vm0, %v1132_v3, -inf  ;;  %v1188_v59 = vadd.f32 %v1187_v58, %v2249_v23 }
 0x174   :  { %v1217_v18 = vmax.f32 %v1215_v32, %v1216_v40  ;;  %v1250_v56 = vsel %vm737_vm0, %v1124_v49, -inf }
 0x176   :  { %v1697_v0 = vpop.f32.mrb[64].mxu0 }
 0x177   :  { %v1145_v1 = vadd.f32 %v1697_v0, %v2229_v62  ;;  %v1713_v22 = vpop.f32.mrb[64].mxu1  ;;  %v1136_v6 = vpop.f32.mrb[65].mxu0  ;;  %v1239_v62 = vsel %vm737_vm0, %v1172_v4, -inf }
 0x178   :  { %v2276_v7 = vadd.f32 %v1713_v22, %v1064_v20  ;;  %v1137_v41 = vadd.f32 %v1136_v6, %v2225_v46  ;;  %v1200_v19 = vpop.f32.mrb[65].mxu1  ;;  %v1698_v8 = vpop.f32.mrb[66].mxu0  ;;  %v1243_v46 = vsel %vm737_vm0, %v1121_v48, -inf }
 0x179   :  { %v1237_v10 = vsel %vm737_vm0, %v1145_v1, -inf  ;;  %v1201_v11 = vadd.f32 %v1200_v19, %v1056_v60  ;;  %v1148_v23 = vadd.f32 %v1698_v8, %v2231_v63  ;;  %v1714_v12 = vpop.f32.mrb[66].mxu1  ;;  %v1139_v13 = vpop.f32.mrb[67].mxu0  ;;  %v1220_v1 = vsel %vm737_vm0, %v1188_v59, -inf }
 0x17a   :  { %v1238_v16 = vmax.f32 %v1236_v33, %v1237_v10  ;;  %v1223_v17 = vsel %vm737_vm0, %v1137_v41, -inf  ;;  %v2284_v20 = vadd.f32 %v1714_v12, %v1067_v21  ;;  %v1203_v24 = vpop.f32.mrb[67].mxu1  ;;  %v1140_v29 = vadd.f32 %v1139_v13, %v2227_v47 }
 0x17b   :  { %v1224_v26 = vmax.f32 %v1222_v9, %v1223_v17  ;;  %v1244_v27 = vsel %vm737_vm0, %v1148_v23, -inf  ;;  %v1204_v34 = vadd.f32 %v1203_v24, %v2251_v61  ;;  %v1241_v21 = vsel %vm737_vm0, %v1201_v11, -inf }
 0x17c   :  { %v1240_v60 = vmax.f32 %v1238_v16, %v1239_v62  ;;  %v1245_v63 = vmax.f32 %v1243_v46, %v1244_v27  ;;  %v1230_v39 = vsel %vm737_vm0, %v1140_v29, -inf  ;;  %v1232_v47 = vsel %vm737_vm0, %v1169_v36, -inf }
 0x17d   :  { %v1231_v44 = vmax.f32 %v1229_v35, %v1230_v39  ;;  %v1253_v61 = vsel %vm737_vm0, %v1180_v42, -inf  ;;  %v1248_v28 = vsel %vm737_vm0, %v1204_v34, -inf  ;;  %v1234_v36 = vsel %vm737_vm0, %v1196_v57, -inf }
 0x17e   :  { %v1242_v43 = vmax.f32 %v1240_v60, %v1241_v21  ;;  %v1247_v4 = vmax.f32 %v1245_v63, %v1246_v37  ;;  %v1701_v45 = vpop.f32.mrb[68].mxu0  ;;  %v1260_v11 = vsel %vm737_vm0, %v2267_v53, -inf  ;;  %v1262_v17 = vsel %vm737_vm0, %v2284_v20, -inf }
 0x17f   :  { %v1161_v50 = vadd.f32 %v1701_v45, %v2237_v30  ;;  %v1152_v54 = vpop.f32.mrb[69].mxu0  ;;  %v1233_v52 = vmax.f32 %v1231_v44, %v1232_v47 }
 0x180   :  { %v1274_v48 = vadd.f32 %v1446_v38, %v1242_v43  ;;  %v1249_v5 = vmax.f32 %v1247_v4, %v1248_v28  ;;  %v1153_v3 = vadd.f32 %v1152_v54, %v2233_v14  ;;  %v1702_v55 = vpop.f32.mrb[70].mxu0 }
 0x181   :  { %v1218_v58 = vsel %vm737_vm0, %v1161_v50, -inf  ;;  %v1164_v42 = vadd.f32 %v1702_v55, %v2239_v31  ;;  %v1155_v2 = vpop.f32.mrb[71].mxu0  ;;  %v1235_v40 = vmax.f32 %v1233_v52, %v1234_v36  ;;  %v1227_v31 = vsel %vm737_vm0, %v2263_v51, -inf }
 0x182   :  { %v1281_v32 = vmax.f32 %v1274_v48, 0.0  ;;  %v1275_v0 = vadd.f32 %v1446_v38, %v1249_v5  ;;  %v1219_v30 = vmax.f32 %v1217_v18, %v1218_v58  ;;  %v1251_v22 = vsel %vm737_vm0, %v1153_v3, -inf }
 0x183   :  { %v1225_v14 = vsel %vm737_vm0, %v1164_v42, -inf  ;;  %v1156_v6 = vadd.f32 %v1155_v2, %v2235_v15  ;;  %v1273_v33 = vadd.f32 %v1446_v38, %v1235_v40  ;;  %v1252_v19 = vmax.f32 %v1250_v56, %v1251_v22 }
 0x184   :  { %v1457_v57 = vpack.c.bf16 %v1281_v32, %v1281_v32  ;;  %v1282_v49 = vmax.f32 %v1275_v0, 0.0  ;;  %v1221_v41 = vmax.f32 %v1219_v30, %v1220_v1  ;;  %v1226_v8 = vmax.f32 %v1224_v26, %v1225_v14 }
 0x185   :  { %v1258_v9 = vsel %vm737_vm0, %v1156_v6, -inf  ;;  %v1280_v59 = vmax.f32 %v1273_v33, 0.0  ;;  %v1254_v23 = vmax.f32 %v1252_v19, %v1253_v61  ;;  %v1255_v51 = vsel %vm737_vm0, %v2276_v7, -inf }
 0x186   :  { %1318 = vst.msk [vmem:[%s2352_s3 + $0xc] sm:$0xf] %vm1314_vm1, %v1457_v57  ;;  %v1458_v18 = vpack.c.bf16 %v1282_v49, %v1282_v49  ;;  %v1271_v10 = vadd.f32 %v1446_v38, %v1221_v41  ;;  %v1259_v15 = vmax.f32 %v1257_v25, %v1258_v9  ;;  %v1228_v12 = vmax.f32 %v1226_v8, %v1227_v31 }
 0x187   :  { %v1456_v13 = vpack.c.bf16 %v1280_v59, %v1280_v59  ;;  %v1256_v24 = vmax.f32 %v1254_v23, %v1255_v51 }
 0x188   :  { %1319 = vst.msk [vmem:[%s2352_s3 + $0x10] sm:$0xf] %vm1314_vm1, %v1458_v18  ;;  %v1278_v62 = vmax.f32 %v1271_v10, 0.0  ;;  %v1261_v16 = vmax.f32 %v1259_v15, %v1260_v11  ;;  %v1272_v46 = vadd.f32 %v1446_v38, %v1228_v12 }
 0x189   :  { %1317 = vst.msk [vmem:[%s2352_s3 + $0x8] sm:$0xf] %vm1314_vm1, %v1456_v13  ;;  %v1276_v26 = vadd.f32 %v1446_v38, %v1256_v24 }
 0x18a   :  { %v1454_v53 = vpack.c.bf16 %v1278_v62, %v1278_v62  ;;  %v1263_v7 = vmax.f32 %v1261_v16, %v1262_v17  ;;  %v1279_v27 = vmax.f32 %v1272_v46, 0.0 }
 0x18b   :  { %v1283_v60 = vmax.f32 %v1276_v26, 0.0 }
 0x18c   :  { %1315 = vst.msk [vmem:[%s2352_s3] sm:$0xf] %vm1314_vm1, %v1454_v53  ;;  %v1277_v29 = vadd.f32 %v1446_v38, %v1263_v7  ;;  %v1455_v63 = vpack.c.bf16 %v1279_v27, %v1279_v27 }
 0x18d   :  { %v1459_v34 = vpack.c.bf16 %v1283_v60, %v1283_v60 }
 0x18e   :  { %v1284_v20 = vmax.f32 %v1277_v29, 0.0  ;;  %1316 = vst.msk [vmem:[%s2352_s3 + $0x4] sm:$0xf] %vm1314_vm1, %v1455_v63 }
 0x18f   :  { %1320 = vst.msk [vmem:[%s2352_s3 + $0x14] sm:$0xf] %vm1314_vm1, %v1459_v34 }
 0x190   :  { %v1460_v35 = vpack.c.bf16 %v1284_v20, %v1284_v20 }
 0x192   :  { %1321 = vst.msk [vmem:[%s2352_s3 + $0x18] sm:$0xf] %vm1314_vm1, %v1460_v35 }

// kernel: net_forward.5
= control target key start
LH: loop header
LB: loop body
LE: loop exit
PB: predicated region body
PF: predicated region fallthrough
CT: control target
= control target key end

     0   :  { %vm1725_vm0 = vmmov 0   ;;  %vm880_vm1 = vcmask 523264   ;;  %vm1277_vm2 = vcmask 80896   ;;  %s2113_s1 = inlined_call_operand.vmem [shape: bf16[1600,128], index: 1, kind: input, shape index: {}]   ;;  %s2114_s0 = inlined_call_operand.vmem [shape: bf16[8,1600], index: 0, kind: input, shape index: {}]   ;;  %s2115_s3 = inlined_call_operand.vmem [shape: bf16[128,10], index: 3, kind: input, shape index: {}]   ;;  %s2116_s2 = inlined_call_operand.vmem [shape: f32[1,128], index: 2, kind: input, shape index: {}]   ;;  %s2117_s4 = inlined_call_operand.vmem [shape: f32[1,10], index: 4, kind: input, shape index: {}]   ;;  %s2118_s5 = inlined_call_operand.vmem [shape: f32[8,10], index: 5, kind: output, shape index: {}]  }
   0x1   :  { %v1599_v0 = vld [vmem:[%s2113_s1 + $0x40] sm:$0xff]   ;;  %v1603_v4 = vld [vmem:[%s2113_s1 + $0x48] sm:$0xff]   ;;  %v1607_v8 = vld [vmem:[%s2113_s1 + $0x50] sm:$0xff]  }
   0x2   :  { %v1600_v1 = vld [vmem:[%s2113_s1] sm:$0xff]   ;;  %1419 = vmatprep.subr.bf16.mxu0 %v1599_v0  ;;  %v1604_v5 = vld [vmem:[%s2113_s1 + $0x8] sm:$0xff]   ;;  %v1608_v9 = vld [vmem:[%s2113_s1 + $0x10] sm:$0xff]  }
   0x3   :  { %v1601_v2 = vld [vmem:[%s2113_s1 + $0xc0] sm:$0xff]   ;;  %1420 = vmatpush3.bf16.msra.mxu0 %v1600_v1  ;;  %v1605_v6 = vld [vmem:[%s2113_s1 + $0xc8] sm:$0xff]   ;;  %v1609_v10 = vld [vmem:[%s2113_s1 + $0xd0] sm:$0xff]  }
   0x4   :  { %v1602_v3 = vld [vmem:[%s2113_s1 + $0x80] sm:$0xff]   ;;  %1441 = vmatprep.subr.bf16.mxu1 %v1601_v2  ;;  %1421 = vmatprep.subr.bf16.mxu0 %v1603_v4  ;;  %v1606_v7 = vld [vmem:[%s2113_s1 + $0x88] sm:$0xff]   ;;  %v1610_v11 = vld [vmem:[%s2113_s1 + $0x90] sm:$0xff]  }
   0x5   :  { %1442 = vmatpush3.bf16.msra.mxu1 %v1602_v3  ;;  %v1611_v12 = vld [vmem:[%s2113_s1 + $0x58] sm:$0xff]   ;;  %v1615_v16 = vld [vmem:[%s2113_s1 + $0x60] sm:$0xff]   ;;  %v1619_v20 = vld [vmem:[%s2113_s1 + $0x68] sm:$0xff]  }
   0x6   :  { %1443 = vmatprep.subr.bf16.mxu1 %v1605_v6  ;;  %v1612_v13 = vld [vmem:[%s2113_s1 + $0x18] sm:$0xff]   ;;  %v1616_v17 = vld [vmem:[%s2113_s1 + $0x20] sm:$0xff]   ;;  %v1620_v21 = vld [vmem:[%s2113_s1 + $0x28] sm:$0xff]  }
   0x7   :  { %1422 = vmatpush3.bf16.msra.mxu0 %v1604_v5  ;;  %v1613_v14 = vld [vmem:[%s2113_s1 + $0xd8] sm:$0xff]   ;;  %v1617_v18 = vld [vmem:[%s2113_s1 + $0xe0] sm:$0xff]   ;;  %v1621_v22 = vld [vmem:[%s2113_s1 + $0xe8] sm:$0xff]  }
   0x8   :  { %1423 = vmatprep.subr.bf16.mxu0 %v1607_v8  ;;  %v1614_v15 = vld [vmem:[%s2113_s1 + $0x98] sm:$0xff]   ;;  %v1618_v19 = vld [vmem:[%s2113_s1 + $0xa0] sm:$0xff]   ;;  %v1622_v23 = vld [vmem:[%s2113_s1 + $0xa8] sm:$0xff]  }
   0x9   :  { %1444 = vmatpush3.bf16.msra.mxu1 %v1606_v7  ;;  %v1623_v24 = vld [vmem:[%s2113_s1 + $0x70] sm:$0xff]   ;;  %v1627_v28 = vld [vmem:[%s2113_s1 + $0x78] sm:$0xff]   ;;  %v21_v31 = vld [vmem:[%s2114_s0] sm:$0xff] }
   0xa   :  { %1445 = vmatprep.subr.bf16.mxu1 %v1609_v10  ;;  %v1624_v25 = vld [vmem:[%s2113_s1 + $0x30] sm:$0xff]   ;;  %v1628_v29 = vld [vmem:[%s2113_s1 + $0x38] sm:$0xff]   ;;  %v1296_v32 = vcombine.low %v21_v31, %v21_v31  ;;  %v1297_v33 = vcombine.high %v21_v31, %v21_v31  ;;  %v1633_v35 = vld [vmem:[%s2113_s1 + $0x140] sm:$0xff]  }
   0xb   :  { %1424 = vmatpush3.bf16.msra.mxu0 %v1608_v9  ;;  %v1625_v26 = vld [vmem:[%s2113_s1 + $0xf0] sm:$0xff]   ;;  %v1629_v30 = vld [vmem:[%s2113_s1 + $0xf8] sm:$0xff]   ;;  %v22_v36 = vld [vmem:[%s2114_s0 + $0x8] sm:$0xff] }
   0xc   :  { %1425 = vmatprep.subr.bf16.mxu0 %v1611_v12  ;;  %v1626_v27 = vld [vmem:[%s2113_s1 + $0xb0] sm:$0xff]   ;;  %v1632_v34 = vld [vmem:[%s2113_s1 + $0xb8] sm:$0xff]   ;;  %916 = vmatprep.mubr.bf16.mxu0 %v1297_v33  ;;  %v1298_v37 = vcombine.low %v22_v36, %v22_v36  ;;  %v1299_v38 = vcombine.high %v22_v36, %v22_v36  ;;  %v1636_v39 = vld [vmem:[%s2113_s1 + $0x100] sm:$0xff]  }
   0xd   :  { %1446 = vmatpush3.bf16.msra.mxu1 %v1610_v11  ;;  %v1637_v40 = vld [vmem:[%s2113_s1 + $0x1c0] sm:$0xff]   ;;  %v1639_v42 = vld [vmem:[%s2113_s1 + $0x148] sm:$0xff]   ;;  %v1643_v46 = vld [vmem:[%s2113_s1 + $0x150] sm:$0xff]  }
   0xe   :  { %1447 = vmatprep.subr.bf16.mxu1 %v1613_v14  ;;  %956 = vmatprep.mubr.bf16.mxu1 %v1299_v38  ;;  %v1638_v41 = vld [vmem:[%s2113_s1 + $0x180] sm:$0xff]   ;;  %v1640_v43 = vld [vmem:[%s2113_s1 + $0x108] sm:$0xff]   ;;  %v1644_v47 = vld [vmem:[%s2113_s1 + $0x110] sm:$0xff]  }
   0xf   :  { %1426 = vmatpush3.bf16.msra.mxu0 %v1612_v13  ;;  %v1641_v44 = vld [vmem:[%s2113_s1 + $0x1c8] sm:$0xff]   ;;  %v1645_v48 = vld [vmem:[%s2113_s1 + $0x1d0] sm:$0xff]   ;;  %v1647_v50 = vld [vmem:[%s2113_s1 + $0x158] sm:$0xff]  }
  0x10   :  { %1427 = vmatprep.subr.bf16.mxu0 %v1615_v16  ;;  %v1642_v45 = vld [vmem:[%s2113_s1 + $0x188] sm:$0xff]   ;;  %v1646_v49 = vld [vmem:[%s2113_s1 + $0x190] sm:$0xff]   ;;  %v1648_v51 = vld [vmem:[%s2113_s1 + $0x118] sm:$0xff]  }
  0x11   :  { %1448 = vmatpush3.bf16.msra.mxu1 %v1614_v15  ;;  %v1649_v52 = vld [vmem:[%s2113_s1 + $0x1d8] sm:$0xff]   ;;  %v1651_v54 = vld [vmem:[%s2113_s1 + $0x160] sm:$0xff]   ;;  %v1655_v58 = vld [vmem:[%s2113_s1 + $0x168] sm:$0xff]  }
  0x12   :  { %1449 = vmatprep.subr.bf16.mxu1 %v1617_v18  ;;  %v1650_v53 = vld [vmem:[%s2113_s1 + $0x198] sm:$0xff]   ;;  %v1652_v55 = vld [vmem:[%s2113_s1 + $0x120] sm:$0xff]   ;;  %v1656_v59 = vld [vmem:[%s2113_s1 + $0x128] sm:$0xff]  }
  0x13   :  { %1428 = vmatpush3.bf16.msra.mxu0 %v1616_v17  ;;  %v1653_v56 = vld [vmem:[%s2113_s1 + $0x1e0] sm:$0xff]   ;;  %v1657_v60 = vld [vmem:[%s2113_s1 + $0x1e8] sm:$0xff]   ;;  %v1659_v62 = vld [vmem:[%s2113_s1 + $0x170] sm:$0xff]  }
  0x14   :  { %1429 = vmatprep.subr.bf16.mxu0 %v1619_v20  ;;  %v1654_v57 = vld [vmem:[%s2113_s1 + $0x1a0] sm:$0xff]   ;;  %v1658_v61 = vld [vmem:[%s2113_s1 + $0x1a8] sm:$0xff]   ;;  %v1660_v63 = vld [vmem:[%s2113_s1 + $0x130] sm:$0xff]  }
  0x15   :  { %1450 = vmatpush3.bf16.msra.mxu1 %v1618_v19  ;;  %v1661_v0 = vld [vmem:[%s2113_s1 + $0x1f0] sm:$0xff]   ;;  %v1663_v2 = vld [vmem:[%s2113_s1 + $0x178] sm:$0xff]   ;;  %v1669_v9 = vld [vmem:[%s2113_s1 + $0x240] sm:$0xff]  }
  0x16   :  { %1451 = vmatprep.subr.bf16.mxu1 %v1621_v22  ;;  %v1662_v1 = vld [vmem:[%s2113_s1 + $0x1b0] sm:$0xff]   ;;  %v1664_v3 = vld [vmem:[%s2113_s1 + $0x138] sm:$0xff]   ;;  %v1672_v13 = vld [vmem:[%s2113_s1 + $0x200] sm:$0xff]  }
  0x17   :  { %1430 = vmatpush3.bf16.msra.mxu0 %v1620_v21  ;;  %v1665_v4 = vld [vmem:[%s2113_s1 + $0x1f8] sm:$0xff]   ;;  %v23_v5 = vld [vmem:[%s2114_s0 + $0x10] sm:$0xff]  ;;  %v1673_v14 = vld [vmem:[%s2113_s1 + $0x2c0] sm:$0xff]  }
  0x18   :  { %1431 = vmatprep.subr.bf16.mxu0 %v1623_v24  ;;  %v1300_v6 = vcombine.low %v23_v5, %v23_v5  ;;  %v1301_v7 = vcombine.high %v23_v5, %v23_v5  ;;  %v1668_v8 = vld [vmem:[%s2113_s1 + $0x1b8] sm:$0xff]   ;;  %v1674_v15 = vld [vmem:[%s2113_s1 + $0x280] sm:$0xff]   ;;  %v1675_v16 = vld [vmem:[%s2113_s1 + $0x248] sm:$0xff]  }
  0x19   :  { %1452 = vmatpush3.bf16.msra.mxu1 %v1622_v23  ;;  %v24_v10 = vld [vmem:[%s2114_s0 + $0x18] sm:$0xff]  ;;  %v1676_v17 = vld [vmem:[%s2113_s1 + $0x208] sm:$0xff]   ;;  %v1679_v20 = vld [vmem:[%s2113_s1 + $0x250] sm:$0xff]  }
  0x1a   :  { %1453 = vmatprep.subr.bf16.mxu1 %v1625_v26  ;;  %v1302_v11 = vcombine.low %v24_v10, %v24_v10  ;;  %v1303_v12 = vcombine.high %v24_v10, %v24_v10  ;;  %v1677_v18 = vld [vmem:[%s2113_s1 + $0x2c8] sm:$0xff]   ;;  %v1680_v21 = vld [vmem:[%s2113_s1 + $0x210] sm:$0xff]   ;;  %v1683_v24 = vld [vmem:[%s2113_s1 + $0x258] sm:$0xff]  }
  0x1b   :  { %1432 = vmatpush3.bf16.msra.mxu0 %v1624_v25  ;;  %v1678_v19 = vld [vmem:[%s2113_s1 + $0x288] sm:$0xff]   ;;  %v1681_v22 = vld [vmem:[%s2113_s1 + $0x2d0] sm:$0xff]   ;;  %v1684_v25 = vld [vmem:[%s2113_s1 + $0x218] sm:$0xff]  }
  0x1c   :  { %1433 = vmatprep.subr.bf16.mxu0 %v1627_v28  ;;  %v1682_v23 = vld [vmem:[%s2113_s1 + $0x290] sm:$0xff]   ;;  %v1685_v26 = vld [vmem:[%s2113_s1 + $0x2d8] sm:$0xff]   ;;  %v1687_v28 = vld [vmem:[%s2113_s1 + $0x260] sm:$0xff]  }
  0x1d   :  { %1454 = vmatpush3.bf16.msra.mxu1 %v1626_v27  ;;  %v1686_v27 = vld [vmem:[%s2113_s1 + $0x298] sm:$0xff]   ;;  %v1690_v31 = vld [vmem:[%s2113_s1 + $0x2a0] sm:$0xff]   ;;  %v1692_v33 = vld [vmem:[%s2113_s1 + $0x228] sm:$0xff]  }
  0x1e   :  { %1455 = vmatprep.subr.bf16.mxu1 %v1629_v30  ;;  %v1689_v30 = vld [vmem:[%s2113_s1 + $0x2e0] sm:$0xff]   ;;  %v1695_v36 = vld [vmem:[%s2113_s1 + $0x270] sm:$0xff]  }
  0x1f   :  { %1434 = vmatpush3.bf16.msra.mxu0 %v1628_v29  ;;  %v1688_v29 = vld [vmem:[%s2113_s1 + $0x220] sm:$0xff]   ;;  %v1697_v38 = vld [vmem:[%s2113_s1 + $0x2f0] sm:$0xff]  }
  0x20   :  { %1463 = vmatprep.subr.bf16.mxu0 %v1633_v35  ;;  %v1694_v35 = vld [vmem:[%s2113_s1 + $0x2a8] sm:$0xff]  }
  0x21   :  { %1456 = vmatpush3.bf16.msra.mxu1 %v1632_v34  ;;  %v1693_v34 = vld [vmem:[%s2113_s1 + $0x2e8] sm:$0xff]  }
  0x22   :  { %917 = vmatmul.mubr.bf16.vlgmr.msra.gmra.mrb[0].mxu0 %v1296_v32  ;;  %1485 = vmatprep.subr.bf16.mxu1 %v1637_v40  ;;  %v1691_v32 = vld [vmem:[%s2113_s1 + $0x268] sm:$0xff]   ;;  %v1699_v40 = vld [vmem:[%s2113_s1 + $0x278] sm:$0xff]  }
  0x23   :  { %1464 = vmatpush3.bf16.msra.mxu0 %v1636_v39  ;;  %996 = vmatprep.mubr.bf16.mxu0 %v1301_v7  ;;  %v1698_v39 = vld [vmem:[%s2113_s1 + $0x2b0] sm:$0xff]  }
  0x24   :  { %957 = vmatmul.mubr.bf16.vlgmr.msra.gmra.mrb[0].mxu1 %v1298_v37  ;;  %1465 = vmatprep.subr.bf16.mxu0 %v1639_v42  ;;  %v1696_v37 = vld [vmem:[%s2113_s1 + $0x230] sm:$0xff]   ;;  %v1701_v42 = vld [vmem:[%s2113_s1 + $0x2f8] sm:$0xff]  }
  0x25   :  { %1486 = vmatpush3.bf16.msra.mxu1 %v1638_v41  ;;  %1036 = vmatprep.mubr.bf16.mxu1 %v1303_v12  ;;  %v1700_v41 = vld [vmem:[%s2113_s1 + $0x238] sm:$0xff]  }
  0x26   :  { %1487 = vmatprep.subr.bf16.mxu1 %v1641_v44 }
  0x27   :  { %1466 = vmatpush3.bf16.msra.mxu0 %v1640_v43  ;;  %v25_v43 = vld [vmem:[%s2114_s0 + $0x20] sm:$0xff] }
  0x28   :  { %1467 = vmatprep.subr.bf16.mxu0 %v1643_v46  ;;  %v1304_v44 = vcombine.low %v25_v43, %v25_v43  ;;  %v1704_v46 = vld [vmem:[%s2113_s1 + $0x2b8] sm:$0xff]  }
  0x29   :  { %1488 = vmatpush3.bf16.msra.mxu1 %v1642_v45  ;;  %v1305_v45 = vcombine.high %v25_v43, %v25_v43 }
  0x2a   :  { %1489 = vmatprep.subr.bf16.mxu1 %v1645_v48  ;;  %v1724_v48 = vmov 0.0  }
  0x2b   :  { %1468 = vmatpush3.bf16.msra.mxu0 %v1644_v47  ;;  %v26_v47 = vld [vmem:[%s2114_s0 + $0x28] sm:$0xff] }
  0x2c   :  { %1469 = vmatprep.subr.bf16.mxu0 %v1647_v50  ;;  %v1307_v50 = vcombine.high %v26_v47, %v26_v47 }
  0x2d   :  { %1490 = vmatpush3.bf16.msra.mxu1 %v1646_v49  ;;  %v1306_v49 = vcombine.low %v26_v47, %v26_v47 }
  0x2e   :  { %1491 = vmatprep.subr.bf16.mxu1 %v1649_v52  ;;  %v1708_v52 = vld [vmem:[%s2113_s1 + $0x308] sm:$0xff]  }
  0x2f   :  { %1470 = vmatpush3.bf16.msra.mxu0 %v1648_v51  ;;  %v1707_v51 = vld [vmem:[%s2113_s1 + $0x300] sm:$0xff]  }
  0x30   :  { %1471 = vmatprep.subr.bf16.mxu0 %v1651_v54  ;;  %v1710_v54 = vld [vmem:[%s2113_s1 + $0x318] sm:$0xff]  }
  0x31   :  { %1492 = vmatpush3.bf16.msra.mxu1 %v1650_v53  ;;  %v1709_v53 = vld [vmem:[%s2113_s1 + $0x310] sm:$0xff]  }
  0x32   :  { %1493 = vmatprep.subr.bf16.mxu1 %v1653_v56  ;;  %v1712_v56 = vld [vmem:[%s2115_s3] sm:$0xff]  }
  0x33   :  { %1472 = vmatpush3.bf16.msra.mxu0 %v1652_v55  ;;  %v1711_v55 = vld [vmem:[%s2114_s0 + $0x30] ss:$0 sps:$4 sm:$0xff]  }
  0x34   :  { %1473 = vmatprep.subr.bf16.mxu0 %v1655_v58  ;;  %v1714_v58 = vld [vmem:[%s2115_s3 + $0x10] sm:$0xff]  }
  0x35   :  { %1494 = vmatpush3.bf16.msra.mxu1 %v1654_v57  ;;  %v1713_v57 = vld [vmem:[%s2115_s3 + $0x8] sm:$0xff]  }
  0x36   :  { %1495 = vmatprep.subr.bf16.mxu1 %v1657_v60  ;;  %v1716_v60 = vld [vmem:[%s2115_s3 + $0x20] sm:$0xff]  }
  0x37   :  { %1474 = vmatpush3.bf16.msra.mxu0 %v1656_v59  ;;  %v1715_v59 = vld [vmem:[%s2115_s3 + $0x18] sm:$0xff]  }
  0x38   :  { %1475 = vmatprep.subr.bf16.mxu0 %v1659_v62  ;;  %v1718_v62 = vld [vmem:[%s2115_s3 + $0x30] sm:$0xff]  }
  0x39   :  { %1496 = vmatpush3.bf16.msra.mxu1 %v1658_v61  ;;  %v1717_v61 = vld [vmem:[%s2115_s3 + $0x28] sm:$0xff]  }
  0x3a   :  { %1497 = vmatprep.subr.bf16.mxu1 %v1661_v0 }
  0x3b   :  { %1476 = vmatpush3.bf16.msra.mxu0 %v1660_v63  ;;  %v1719_v63 = vld [vmem:[%s2115_s3 + $0x38] sm:$0xff]  }
  0x3c   :  { %1477 = vmatprep.subr.bf16.mxu0 %v1663_v2 }
  0x3d   :  { %1498 = vmatpush3.bf16.msra.mxu1 %v1662_v1  ;;  %v1295_v1 = vld [vmem:[%s2116_s2] ss:$0 sm:$0xff] }
  0x3e   :  { %1499 = vmatprep.subr.bf16.mxu1 %v1665_v4 }
  0x3f   :  { %1478 = vmatpush3.bf16.msra.mxu0 %v1664_v3 }
  0x40   :  { %1507 = vmatprep.subr.bf16.mxu0 %v1669_v9 }
  0x41   :  { %1500 = vmatpush3.bf16.msra.mxu1 %v1668_v8 }
  0x42   :  { %997 = vmatmul.mubr.bf16.vlgmr.msra.gmra.mrb[4].mxu0 %v1300_v6  ;;  %1529 = vmatprep.subr.bf16.mxu1 %v1673_v14 }
  0x43   :  { %1508 = vmatpush3.bf16.msra.mxu0 %v1672_v13  ;;  %1076 = vmatprep.mubr.bf16.mxu0 %v1305_v45 }
  0x44   :  { %1037 = vmatmul.mubr.bf16.vlgmr.msra.gmra.mrb[4].mxu1 %v1302_v11  ;;  %1509 = vmatprep.subr.bf16.mxu0 %v1675_v16 }
  0x45   :  { %1530 = vmatpush3.bf16.msra.mxu1 %v1674_v15  ;;  %1116 = vmatprep.mubr.bf16.mxu1 %v1307_v50 }
  0x46   :  { %1531 = vmatprep.subr.bf16.mxu1 %v1677_v18 }
  0x47   :  { %1510 = vmatpush3.bf16.msra.mxu0 %v1676_v17 }
  0x48   :  { %1511 = vmatprep.subr.bf16.mxu0 %v1679_v20 }
  0x49   :  { %1532 = vmatpush3.bf16.msra.mxu1 %v1678_v19 }
  0x4a   :  { %1533 = vmatprep.subr.bf16.mxu1 %v1681_v22 }
  0x4b   :  { %1512 = vmatpush3.bf16.msra.mxu0 %v1680_v21 }
  0x4c   :  { %1513 = vmatprep.subr.bf16.mxu0 %v1683_v24 }
  0x4d   :  { %1534 = vmatpush3.bf16.msra.mxu1 %v1682_v23 }
  0x4e   :  { %1535 = vmatprep.subr.bf16.mxu1 %v1685_v26 }
  0x4f   :  { %1514 = vmatpush3.bf16.msra.mxu0 %v1684_v25 }
  0x50   :  { %1515 = vmatprep.subr.bf16.mxu0 %v1687_v28 }
  0x51   :  { %1536 = vmatpush3.bf16.msra.mxu1 %v1686_v27 }
  0x52   :  { %1537 = vmatprep.subr.bf16.mxu1 %v1689_v30 }
  0x53   :  { %1516 = vmatpush3.bf16.msra.mxu0 %v1688_v29 }
  0x54   :  { %1517 = vmatprep.subr.bf16.mxu0 %v1691_v32 }
  0x55   :  { %1538 = vmatpush3.bf16.msra.mxu1 %v1690_v31 }
  0x56   :  { %1539 = vmatprep.subr.bf16.mxu1 %v1693_v34 }
  0x57   :  { %1518 = vmatpush3.bf16.msra.mxu0 %v1692_v33 }
  0x58   :  { %1519 = vmatprep.subr.bf16.mxu0 %v1695_v36 }
  0x59   :  { %1540 = vmatpush3.bf16.msra.mxu1 %v1694_v35 }
  0x5a   :  { %1541 = vmatprep.subr.bf16.mxu1 %v1697_v38 }
  0x5b   :  { %1520 = vmatpush3.bf16.msra.mxu0 %v1696_v37 }
  0x5c   :  { %1521 = vmatprep.subr.bf16.mxu0 %v1699_v40 }
  0x5d   :  { %1542 = vmatpush3.bf16.msra.mxu1 %v1698_v39 }
  0x5e   :  { %1543 = vmatprep.subr.bf16.mxu1 %v1701_v42 }
  0x5f   :  { %1522 = vmatpush3.bf16.msra.mxu0 %v1700_v41 }
  0x60   :  { %1565 = vmatprep.subr.bf16.mxu0 %v1724_v48 }
  0x61   :  { %1544 = vmatpush3.bf16.msra.mxu1 %v1704_v46 }
  0x62   :  { %1077 = vmatmul.mubr.bf16.vlgmr.msra.gmra.mrb[8].mxu0 %v1304_v44  ;;  %1577 = vmatprep.subr.bf16.mxu1 %v1724_v48  ;;  %v1410_v44 = vld [vmem:[%s2117_s4] ss:$0 sm:$0xff] }
  0x63   :  { %1566 = vmatpush3.bf16.msra.mxu0 %v1707_v51  ;;  %1573 = vmatprep.mubr.msk.bf16.mxu0 %vm1725_vm0, %v1724_v48 }
  0x64   :  { %1117 = vmatmul.mubr.bf16.vlgmr.msra.gmra.mrb[8].mxu1 %v1306_v49  ;;  %1567 = vmatprep.subr.bf16.mxu0 %v1724_v48 }
  0x65   :  { %1593 = vmatprep.mubr.msk.bf16.mxu1 %vm1725_vm0, %v1724_v48  ;;  %1578 = vmatpush3.bf16.msra.mxu1 %v1712_v56 }
  0x66   :  { %1579 = vmatprep.subr.bf16.mxu1 %v1724_v48 }
  0x67   :  { %1568 = vmatpush3.bf16.msra.mxu0 %v1708_v52 }
  0x68   :  { %1569 = vmatprep.subr.bf16.mxu0 %v1724_v48 }
  0x69   :  { %1580 = vmatpush3.bf16.msra.mxu1 %v1713_v57 }
  0x6a   :  { %1581 = vmatprep.subr.bf16.mxu1 %v1724_v48 }
  0x6b   :  { %1570 = vmatpush3.bf16.msra.mxu0 %v1709_v53 }
  0x6c   :  { %1571 = vmatprep.subr.bf16.mxu0 %v1724_v48 }
  0x6d   :  { %1582 = vmatpush3.bf16.msra.mxu1 %v1714_v58 }
  0x6e   :  { %1583 = vmatprep.subr.bf16.mxu1 %v1724_v48 }
  0x6f   :  { %1572 = vmatpush3.bf16.msra.mxu0 %v1710_v54 }
  0x71   :  { %1584 = vmatpush3.bf16.msra.mxu1 %v1715_v59 }
  0x72   :  { %1574 = vmatmul.mubr.msk.bf16.vlgmr.msra.gmra.mrb[12].mxu0 %vm880_vm1, %v1711_v55  ;;  %1585 = vmatprep.subr.bf16.mxu1 %v1724_v48 }
  0x75   :  { %1586 = vmatpush3.bf16.msra.mxu1 %v1716_v60 }
  0x76   :  { %1587 = vmatprep.subr.bf16.mxu1 %v1724_v48 }
  0x79   :  { %1588 = vmatpush3.bf16.msra.mxu1 %v1717_v61 }
  0x7a   :  { %1589 = vmatprep.subr.bf16.mxu1 %v1724_v48 }
  0x7d   :  { %1590 = vmatpush3.bf16.msra.mxu1 %v1718_v62 }
  0x7e   :  { %1591 = vmatprep.subr.bf16.mxu1 %v1724_v48 }
  0x81   :  { %1592 = vmatpush3.bf16.msra.mxu1 %v1719_v63 }
  0xf5   :  { %v1435_v0 = vpop.f32.mrb[0].mxu0 }
  0xf6   :  { %v1436_v2 = vpop.f32.mrb[1].mxu0 }
  0xf7   :  { %v1437_v3 = vadd.f32 %v1436_v2, %v1435_v0  ;;  %v1438_v4 = vpop.f32.mrb[2].mxu0  ;;  %v1457_v5 = vpop.f32.mrb[0].mxu1 }
  0xf8   :  { %v1439_v6 = vpop.f32.mrb[3].mxu0  ;;  %v1458_v7 = vpop.f32.mrb[1].mxu1 }
  0xf9   :  { %v919_v8 = vadd.f32 %v1437_v3, %v1295_v1  ;;  %v1459_v9 = vadd.f32 %v1458_v7, %v1457_v5  ;;  %v1460_v10 = vpop.f32.mrb[2].mxu1 }
  0xfa   :  { %v1461_v11 = vpop.f32.mrb[3].mxu1 }
  0xfb   :  { %v959_v12 = vadd.f32 %v1459_v9, %v919_v8 }
 0x115   :  { %v1479_v13 = vpop.f32.mrb[4].mxu0 }
 0x116   :  { %v1480_v14 = vpop.f32.mrb[5].mxu0 }
 0x117   :  { %v1481_v15 = vadd.f32 %v1480_v14, %v1479_v13  ;;  %v1482_v16 = vpop.f32.mrb[6].mxu0  ;;  %v1501_v17 = vpop.f32.mrb[4].mxu1 }
 0x118   :  { %v1483_v18 = vpop.f32.mrb[7].mxu0  ;;  %v1502_v20 = vpop.f32.mrb[5].mxu1 }
 0x119   :  { %v999_v19 = vadd.f32 %v1481_v15, %v959_v12  ;;  %v1503_v21 = vadd.f32 %v1502_v20, %v1501_v17  ;;  %v1504_v22 = vpop.f32.mrb[6].mxu1 }
 0x11a   :  { %v1505_v23 = vpop.f32.mrb[7].mxu1 }
 0x11b   :  { %v1039_v24 = vadd.f32 %v1503_v21, %v999_v19 }
 0x135   :  { %v1523_v25 = vpop.f32.mrb[8].mxu0 }
 0x136   :  { %v1524_v26 = vpop.f32.mrb[9].mxu0 }
 0x137   :  { %v1525_v27 = vadd.f32 %v1524_v26, %v1523_v25  ;;  %v1526_v28 = vpop.f32.mrb[10].mxu0  ;;  %v1545_v29 = vpop.f32.mrb[8].mxu1 }
 0x138   :  { %v1527_v30 = vpop.f32.mrb[11].mxu0  ;;  %v1546_v31 = vpop.f32.mrb[9].mxu1 }
 0x139   :  { %v1079_v32 = vadd.f32 %v1525_v27, %v1039_v24  ;;  %v1547_v33 = vadd.f32 %v1546_v31, %v1545_v29  ;;  %v1548_v34 = vpop.f32.mrb[10].mxu1 }
 0x13a   :  { %v1549_v35 = vpop.f32.mrb[11].mxu1 }
 0x13b   :  { %v1119_v36 = vadd.f32 %v1547_v33, %v1079_v32 }
 0x145   :  { %v1158_v37 = vpop.f32.mrb[12].mxu0 }
 0x146   :  { %v1159_v38 = vadd.f32 %v1158_v37, %v1119_v36  ;;  %v1575_v39 = vpop.f32.mrb[13].mxu0 }
 0x147   :  { %v1161_v40 = vpop.f32.mrb[14].mxu0 }
 0x148   :  { %v1164_v41 = vmax.f32 %v1159_v38, 0.0  ;;  %v1576_v42 = vpop.f32.mrb[15].mxu0 }
 0x14a   :  { %v1165_v43 = vpack.c.bf16 %v1164_v41, %v1164_v41 }
 0x14c   :  { %1594 = vmatmul.mubr.bf16.vlgmr.msra.gmra.mrb[12].mxu1 %v1165_v43 }
 0x21f   :  { %v1271_v45 = vpop.f32.mrb[12].mxu1 }
 0x220   :  { %v1272_v46 = vadd.f32 %v1410_v44, %v1271_v45  ;;  %v1595_v47 = vpop.f32.mrb[13].mxu1 }
 0x221   :  { %v1274_v48 = vpop.f32.mrb[14].mxu1 }
 0x222   :  { %v1596_v49 = vpop.f32.mrb[15].mxu1  ;;  %v1278_v50 = vsel %vm1277_vm2, %v1272_v46, -inf }
 0x223   :  { %1279 = vmax.xlane.f32.xlu0 %v1278_v50 }
 0x2b0   :  { %v1280_v51 = vpop.xlane.xlu0 %1279 }
 0x2b1   :  { %v1281_v52 = vsub.f32 %v1272_v46, %v1280_v51 }
 0x2b3   :  { %v1282_v53 = vmul.f32 1.442695, %v1281_v52 }
 0x2b5   :  { %1720 = vpow2.f32 %v1282_v53 }
 0x2bf   :  { %v1721_v54 = vpop.eup %1720 }
 0x2c0   :  { %v1284_v55 = vsel %vm1277_vm2, %v1721_v54, 0.0 }
 0x2c1   :  { %1285 = vadd.xlane.f32.xlu0 %v1284_v55 }
 0x34e   :  { %v1286_v56 = vpop.xlane.xlu0 %1285 }
 0x34f   :  { %1722 = vlog2.f32 %v1286_v56 }
 0x359   :  { %v1723_v57 = vpop.eup %1722 }
 0x35a   :  { %v1288_v58 = vmul.f32 0.6931472, %v1723_v57 }
 0x35c   :  { %v1289_v59 = vsub.f32 %v1281_v52, %v1288_v58 }
 0x35e   :  { %1290 = vst.msk [vmem:[%s2118_s5] sm:$0xff] %vm1277_vm2, %v1289_v59 }

</bundles_post_ra>
